<compile_context>
chip_gen: v7x
topology: tpu7x:2x2x1
jax: 0.10.0
libtpu: 0.0.40
codegen_flags: <defaults>
</compile_context>

<pallas_src>
import jax
import jax.numpy as jnp
from jax.experimental import pallas as pl
from jax.experimental.pallas import tpu as pltpu

IMG_DIM = 28 * 28     # 784
HIDDEN = 500
HIDDEN2 = 200
LATENT = 2
BATCH_TILE = 256      # batch rows processed per grid step


# ----------------------------------------------------------------------------
# Fused VAE forward kernel (one batch tile per grid step).
# ----------------------------------------------------------------------------
def _vae_kernel(x_ref, eps_ref,
                w1_ref, b1_ref,        # img_to_hiden        784 -> 500
                w2_ref, b2_ref,        # hidden_to_hidden2   500 -> 200 (shared enc/dec)
                wmu_ref, bmu_ref,      # hidden2_to_mu       200 -> 2
                wsg_ref, bsg_ref,      # hidden2_to_sigma    200 -> 2
                w3_ref, b3_ref,        # latent_to_hidden      2 -> 500
                w4_ref, b4_ref,        # hidden2_to_rec_img  200 -> 784
                rec_ref, mu_ref, sg_ref):
    x = x_ref[...]

    # ----- encoder -----
    h1 = jnp.maximum(
        jnp.dot(x, w1_ref[...], preferred_element_type=jnp.float32) + b1_ref[...], 0.0)
    h2 = jnp.maximum(
        jnp.dot(h1, w2_ref[...], preferred_element_type=jnp.float32) + b2_ref[...], 0.0)
    mu = jnp.dot(h2, wmu_ref[...], preferred_element_type=jnp.float32) + bmu_ref[...]
    sg = jnp.dot(h2, wsg_ref[...], preferred_element_type=jnp.float32) + bsg_ref[...]

    # ----- reparameterization -----
    z = mu + sg * eps_ref[...]

    # ----- decoder (reuses the shared hidden_to_hidden2 weights w2/b2) -----
    d1 = jnp.maximum(
        jnp.dot(z, w3_ref[...], preferred_element_type=jnp.float32) + b3_ref[...], 0.0)
    d2 = jnp.maximum(
        jnp.dot(d1, w2_ref[...], preferred_element_type=jnp.float32) + b2_ref[...], 0.0)
    logits = jnp.dot(d2, w4_ref[...], preferred_element_type=jnp.float32) + b4_ref[...]
    # sigmoid: exp on EUP, reciprocal pushed to the EUP slot (approx) -> frees VALU
    rec_ref[...] = pl.reciprocal(1.0 + jnp.exp(-logits), approx=True)

    mu_ref[...] = mu
    sg_ref[...] = sg


def _full_spec(arr):
    """Whole-array VMEM block with a constant index map (weight stays resident)."""
    nd = arr.ndim
    return pl.BlockSpec(arr.shape, lambda b, _nd=nd: (0,) * _nd)


@jax.jit
def vae_forward(x, eps, params):
    """x: (N, ...) flattening to 784 features. eps: (N, LATENT). Returns (rec, mu, sigma)."""
    n = x.shape[0]
    xf = x.reshape(n, -1).astype(jnp.float32)
    eps = eps.astype(jnp.float32)
    assert xf.shape[1] == IMG_DIM, "input must flatten to 28*28 features"

    # Batch tiling: weights resident across steps, batch tiled over a parallel grid axis.
    if n <= BATCH_TILE:
        tb, n_pad = n, n
    else:
        tb = BATCH_TILE
        n_pad = ((n + tb - 1) // tb) * tb
        xf = jnp.pad(xf, ((0, n_pad - n), (0, 0)))
        eps = jnp.pad(eps, ((0, n_pad - n), (0, 0)))

    weight_args = (
        params["w1"], params["b1"], params["w2"], params["b2"],
        params["w_mu"], params["b_mu"], params["w_sigma"], params["b_sigma"],
        params["w3"], params["b3"], params["w4"], params["b4"],
    )

    rec, mu, sigma = pl.pallas_call(
        _vae_kernel,
        out_shape=(
            jax.ShapeDtypeStruct((n_pad, IMG_DIM), jnp.float32),
            jax.ShapeDtypeStruct((n_pad, LATENT), jnp.float32),
            jax.ShapeDtypeStruct((n_pad, LATENT), jnp.float32),
        ),
        grid=(n_pad // tb,),
        in_specs=[
            pl.BlockSpec((tb, IMG_DIM), lambda b: (b, 0)),
            pl.BlockSpec((tb, LATENT), lambda b: (b, 0)),
        ] + [_full_spec(w) for w in weight_args],
        out_specs=(
            pl.BlockSpec((tb, IMG_DIM), lambda b: (b, 0)),
            pl.BlockSpec((tb, LATENT), lambda b: (b, 0)),
            pl.BlockSpec((tb, LATENT), lambda b: (b, 0)),
        ),
        compiler_params=pltpu.CompilerParams(
            dimension_semantics=("parallel",)),
    )(xf, eps, *weight_args)

    if n_pad != n:
        rec, mu, sigma = rec[:n], mu[:n], sigma[:n]
    return rec, mu, sigma


# ----------------------------------------------------------------------------
# Deterministic synthetic parameters (PyTorch-Linear-like uniform init, zero bias).
# ----------------------------------------------------------------------------
def init_params(key):
    shapes = {
        "w1": (IMG_DIM, HIDDEN),
        "w2": (HIDDEN, HIDDEN2),
        "w_mu": (HIDDEN2, LATENT),
        "w_sigma": (HIDDEN2, LATENT),
        "w3": (LATENT, HIDDEN),
        "w4": (HIDDEN2, IMG_DIM),
    }
    keys = jax.random.split(key, len(shapes))
    params = {}
    for (name, shp), k in zip(shapes.items(), keys):
        bound = 1.0 / jnp.sqrt(float(shp[0]))
        params[name] = jax.random.uniform(k, shp, jnp.float32, -bound, bound)
        params[name.replace("w", "b", 1)] = jnp.zeros((1, shp[1]), jnp.float32)
    return params


# Pure-JAX reference (same eps) for correctness checking.
def vae_forward_ref(x, eps, params):
    hp = jax.lax.Precision.HIGHEST
    xf = x.reshape(x.shape[0], -1).astype(jnp.float32)
    h1 = jax.nn.relu(jnp.dot(xf, params["w1"], precision=hp) + params["b1"])
    h2 = jax.nn.relu(jnp.dot(h1, params["w2"], precision=hp) + params["b2"])
    mu = jnp.dot(h2, params["w_mu"], precision=hp) + params["b_mu"]
    sg = jnp.dot(h2, params["w_sigma"], precision=hp) + params["b_sigma"]
    z = mu + sg * eps
    d1 = jax.nn.relu(jnp.dot(z, params["w3"], precision=hp) + params["b3"])
    d2 = jax.nn.relu(jnp.dot(d1, params["w2"], precision=hp) + params["b2"])
    rec = jax.nn.sigmoid(jnp.dot(d2, params["w4"], precision=hp) + params["b4"])
    return rec, mu, sg


if __name__ == "__main__":
    key = jax.random.PRNGKey(0)
    k_param, k_x, k_eps = jax.random.split(key, 3)
    params = init_params(k_param)

    x = jax.random.normal(k_x, (2, 1, 28, 28), jnp.float32)
    eps = jax.random.normal(k_eps, (2, LATENT), jnp.float32)

    rec, mu, sigma = jax.block_until_ready(vae_forward(x, eps, params))
    rec_r, mu_r, sg_r = vae_forward_ref(x, eps, params)

    assert rec.shape == (2, IMG_DIM) and mu.shape == (2, LATENT) and sigma.shape == (2, LATENT)
    assert all(bool(jnp.all(jnp.isfinite(a))) for a in (rec, mu, sigma))
    # sigmoid output stays in [0, 1] (small slack for the approx reciprocal)
    assert bool(jnp.all((rec >= -1e-3) & (rec <= 1.0 + 1e-3)))
    assert bool(jnp.allclose(mu, mu_r, rtol=1e-2, atol=1e-3))
    assert bool(jnp.allclose(sigma, sg_r, rtol=1e-2, atol=1e-3))
    assert bool(jnp.allclose(rec, rec_r, rtol=1e-2, atol=2e-3))
    print("KERNEL_OK")
</pallas_src>

<mosaic_0001>
module attributes {stable_mosaic.version = 11 : i64} {
  func.func @_vae_kernel(%arg0: i32, %arg1: memref<2x784xf32, #tpu.memory_space<vmem>>, %arg2: memref<2x2xf32, #tpu.memory_space<vmem>>, %arg3: memref<784x500xf32, #tpu.memory_space<vmem>>, %arg4: memref<1x500xf32, #tpu.memory_space<vmem>>, %arg5: memref<500x200xf32, #tpu.memory_space<vmem>>, %arg6: memref<1x200xf32, #tpu.memory_space<vmem>>, %arg7: memref<200x2xf32, #tpu.memory_space<vmem>>, %arg8: memref<1x2xf32, #tpu.memory_space<vmem>>, %arg9: memref<200x2xf32, #tpu.memory_space<vmem>>, %arg10: memref<1x2xf32, #tpu.memory_space<vmem>>, %arg11: memref<2x500xf32, #tpu.memory_space<vmem>>, %arg12: memref<1x500xf32, #tpu.memory_space<vmem>>, %arg13: memref<200x784xf32, #tpu.memory_space<vmem>>, %arg14: memref<1x784xf32, #tpu.memory_space<vmem>>, %arg15: memref<2x784xf32, #tpu.memory_space<vmem>>, %arg16: memref<2x2xf32, #tpu.memory_space<vmem>>, %arg17: memref<2x2xf32, #tpu.memory_space<vmem>>) attributes {dimension_semantics = [#tpu.dimension_semantics<parallel>], iteration_bounds = array<i64: 1>, scalar_prefetch = 0 : i64, scratch_operands = 0 : i64, tpu.core_type = #tpu.core_type<tc>, window_params = [{transform_indices = @transform_0, window_bounds = array<i64: 2, 784>}, {transform_indices = @transform_1, window_bounds = array<i64: 2, 2>}, {pipeline_mode = #tpu.pipeline_mode<synchronous>, transform_indices = @transform_2, window_bounds = array<i64: 784, 500>}, {pipeline_mode = #tpu.pipeline_mode<synchronous>, transform_indices = @transform_3, window_bounds = array<i64: 1, 500>}, {pipeline_mode = #tpu.pipeline_mode<synchronous>, transform_indices = @transform_4, window_bounds = array<i64: 500, 200>}, {pipeline_mode = #tpu.pipeline_mode<synchronous>, transform_indices = @transform_5, window_bounds = array<i64: 1, 200>}, {pipeline_mode = #tpu.pipeline_mode<synchronous>, transform_indices = @transform_6, window_bounds = array<i64: 200, 2>}, {pipeline_mode = #tpu.pipeline_mode<synchronous>, transform_indices = @transform_7, window_bounds = array<i64: 1, 2>}, {pipeline_mode = #tpu.pipeline_mode<synchronous>, transform_indices = @transform_8, window_bounds = array<i64: 200, 2>}, {pipeline_mode = #tpu.pipeline_mode<synchronous>, transform_indices = @transform_9, window_bounds = array<i64: 1, 2>}, {pipeline_mode = #tpu.pipeline_mode<synchronous>, transform_indices = @transform_10, window_bounds = array<i64: 2, 500>}, {pipeline_mode = #tpu.pipeline_mode<synchronous>, transform_indices = @transform_11, window_bounds = array<i64: 1, 500>}, {pipeline_mode = #tpu.pipeline_mode<synchronous>, transform_indices = @transform_12, window_bounds = array<i64: 200, 784>}, {pipeline_mode = #tpu.pipeline_mode<synchronous>, transform_indices = @transform_13, window_bounds = array<i64: 1, 784>}, {transform_indices = @transform_14, window_bounds = array<i64: 2, 784>}, {transform_indices = @transform_15, window_bounds = array<i64: 2, 2>}, {transform_indices = @transform_16, window_bounds = array<i64: 2, 2>}]} {
    %c0 = arith.constant 0 : index
    %c0_0 = arith.constant 0 : index
    %0 = vector.load %arg1[%c0, %c0_0] : memref<2x784xf32, #tpu.memory_space<vmem>>, vector<2x784xf32>
    %c0_1 = arith.constant 0 : index
    %c0_2 = arith.constant 0 : index
    %1 = vector.load %arg3[%c0_1, %c0_2] : memref<784x500xf32, #tpu.memory_space<vmem>>, vector<784x500xf32>
    %cst = arith.constant dense<0.000000e+00> : vector<2x500xf32>
    %2 = tpu.matmul %0, %1, %cst {dimension_numbers = #tpu.dot_dimension_numbers<[1], [0], [0], [1], [0, 0, 1, 1], [], []>} : vector<2x784xf32>, vector<784x500xf32>, vector<2x500xf32> -> vector<2x500xf32>
    %c0_3 = arith.constant 0 : index
    %c0_4 = arith.constant 0 : index
    %3 = vector.load %arg4[%c0_3, %c0_4] : memref<1x500xf32, #tpu.memory_space<vmem>>, vector<1x500xf32>
    %4 = vector.broadcast %3 : vector<1x500xf32> to vector<2x500xf32>
    %5 = arith.addf %2, %4 : vector<2x500xf32>
    %cst_5 = arith.constant 0.000000e+00 : f32
    %6 = vector.broadcast %cst_5 : f32 to vector<2x500xf32>
    %7 = arith.maximumf %5, %6 : vector<2x500xf32>
    %c0_6 = arith.constant 0 : index
    %c0_7 = arith.constant 0 : index
    %8 = vector.load %arg5[%c0_6, %c0_7] : memref<500x200xf32, #tpu.memory_space<vmem>>, vector<500x200xf32>
    %cst_8 = arith.constant dense<0.000000e+00> : vector<2x200xf32>
    %9 = tpu.matmul %7, %8, %cst_8 {dimension_numbers = #tpu.dot_dimension_numbers<[1], [0], [0], [1], [0, 0, 1, 1], [], []>} : vector<2x500xf32>, vector<500x200xf32>, vector<2x200xf32> -> vector<2x200xf32>
    %c0_9 = arith.constant 0 : index
    %c0_10 = arith.constant 0 : index
    %10 = vector.load %arg6[%c0_9, %c0_10] : memref<1x200xf32, #tpu.memory_space<vmem>>, vector<1x200xf32>
    %11 = vector.broadcast %10 : vector<1x200xf32> to vector<2x200xf32>
    %12 = arith.addf %9, %11 : vector<2x200xf32>
    %cst_11 = arith.constant 0.000000e+00 : f32
    %13 = vector.broadcast %cst_11 : f32 to vector<2x200xf32>
    %14 = arith.maximumf %12, %13 : vector<2x200xf32>
    %c0_12 = arith.constant 0 : index
    %c0_13 = arith.constant 0 : index
    %15 = vector.load %arg7[%c0_12, %c0_13] : memref<200x2xf32, #tpu.memory_space<vmem>>, vector<200x2xf32>
    %cst_14 = arith.constant dense<0.000000e+00> : vector<2x2xf32>
    %16 = tpu.matmul %14, %15, %cst_14 {dimension_numbers = #tpu.dot_dimension_numbers<[1], [0], [0], [1], [0, 0, 1, 1], [], []>} : vector<2x200xf32>, vector<200x2xf32>, vector<2x2xf32> -> vector<2x2xf32>
    %c0_15 = arith.constant 0 : index
    %c0_16 = arith.constant 0 : index
    %17 = vector.load %arg8[%c0_15, %c0_16] : memref<1x2xf32, #tpu.memory_space<vmem>>, vector<1x2xf32>
    %18 = vector.broadcast %17 : vector<1x2xf32> to vector<2x2xf32>
    %19 = arith.addf %16, %18 : vector<2x2xf32>
    %c0_17 = arith.constant 0 : index
    %c0_18 = arith.constant 0 : index
    %20 = vector.load %arg9[%c0_17, %c0_18] : memref<200x2xf32, #tpu.memory_space<vmem>>, vector<200x2xf32>
    %cst_19 = arith.constant dense<0.000000e+00> : vector<2x2xf32>
    %21 = tpu.matmul %14, %20, %cst_19 {dimension_numbers = #tpu.dot_dimension_numbers<[1], [0], [0], [1], [0, 0, 1, 1], [], []>} : vector<2x200xf32>, vector<200x2xf32>, vector<2x2xf32> -> vector<2x2xf32>
    %c0_20 = arith.constant 0 : index
    %c0_21 = arith.constant 0 : index
    %22 = vector.load %arg10[%c0_20, %c0_21] : memref<1x2xf32, #tpu.memory_space<vmem>>, vector<1x2xf32>
    %23 = vector.broadcast %22 : vector<1x2xf32> to vector<2x2xf32>
    %24 = arith.addf %21, %23 : vector<2x2xf32>
    %c0_22 = arith.constant 0 : index
    %c0_23 = arith.constant 0 : index
    %25 = vector.load %arg2[%c0_22, %c0_23] : memref<2x2xf32, #tpu.memory_space<vmem>>, vector<2x2xf32>
    %26 = arith.mulf %24, %25 : vector<2x2xf32>
    %27 = arith.addf %19, %26 : vector<2x2xf32>
    %c0_24 = arith.constant 0 : index
    %c0_25 = arith.constant 0 : index
    %28 = vector.load %arg11[%c0_24, %c0_25] : memref<2x500xf32, #tpu.memory_space<vmem>>, vector<2x500xf32>
    %cst_26 = arith.constant dense<0.000000e+00> : vector<2x500xf32>
    %29 = tpu.matmul %27, %28, %cst_26 {dimension_numbers = #tpu.dot_dimension_numbers<[1], [0], [0], [1], [0, 0, 1, 1], [], []>} : vector<2x2xf32>, vector<2x500xf32>, vector<2x500xf32> -> vector<2x500xf32>
    %c0_27 = arith.constant 0 : index
    %c0_28 = arith.constant 0 : index
    %30 = vector.load %arg12[%c0_27, %c0_28] : memref<1x500xf32, #tpu.memory_space<vmem>>, vector<1x500xf32>
    %31 = vector.broadcast %30 : vector<1x500xf32> to vector<2x500xf32>
    %32 = arith.addf %29, %31 : vector<2x500xf32>
    %cst_29 = arith.constant 0.000000e+00 : f32
    %33 = vector.broadcast %cst_29 : f32 to vector<2x500xf32>
    %34 = arith.maximumf %32, %33 : vector<2x500xf32>
    %c0_30 = arith.constant 0 : index
    %c0_31 = arith.constant 0 : index
    %35 = vector.load %arg5[%c0_30, %c0_31] : memref<500x200xf32, #tpu.memory_space<vmem>>, vector<500x200xf32>
    %cst_32 = arith.constant dense<0.000000e+00> : vector<2x200xf32>
    %36 = tpu.matmul %34, %35, %cst_32 {dimension_numbers = #tpu.dot_dimension_numbers<[1], [0], [0], [1], [0, 0, 1, 1], [], []>} : vector<2x500xf32>, vector<500x200xf32>, vector<2x200xf32> -> vector<2x200xf32>
    %c0_33 = arith.constant 0 : index
    %c0_34 = arith.constant 0 : index
    %37 = vector.load %arg6[%c0_33, %c0_34] : memref<1x200xf32, #tpu.memory_space<vmem>>, vector<1x200xf32>
    %38 = vector.broadcast %37 : vector<1x200xf32> to vector<2x200xf32>
    %39 = arith.addf %36, %38 : vector<2x200xf32>
    %cst_35 = arith.constant 0.000000e+00 : f32
    %40 = vector.broadcast %cst_35 : f32 to vector<2x200xf32>
    %41 = arith.maximumf %39, %40 : vector<2x200xf32>
    %c0_36 = arith.constant 0 : index
    %c0_37 = arith.constant 0 : index
    %42 = vector.load %arg13[%c0_36, %c0_37] : memref<200x784xf32, #tpu.memory_space<vmem>>, vector<200x784xf32>
    %cst_38 = arith.constant dense<0.000000e+00> : vector<2x784xf32>
    %43 = tpu.matmul %41, %42, %cst_38 {dimension_numbers = #tpu.dot_dimension_numbers<[1], [0], [0], [1], [0, 0, 1, 1], [], []>} : vector<2x200xf32>, vector<200x784xf32>, vector<2x784xf32> -> vector<2x784xf32>
    %c0_39 = arith.constant 0 : index
    %c0_40 = arith.constant 0 : index
    %44 = vector.load %arg14[%c0_39, %c0_40] : memref<1x784xf32, #tpu.memory_space<vmem>>, vector<1x784xf32>
    %45 = vector.broadcast %44 : vector<1x784xf32> to vector<2x784xf32>
    %46 = arith.addf %43, %45 : vector<2x784xf32>
    %cst_41 = arith.constant 0.000000e+00 : f32
    %47 = vector.broadcast %cst_41 : f32 to vector<2x784xf32>
    %48 = arith.subf %47, %46 : vector<2x784xf32>
    %49 = math.exp %48 : vector<2x784xf32>
    %cst_42 = arith.constant 1.000000e+00 : f32
    %50 = vector.broadcast %cst_42 : f32 to vector<2x784xf32>
    %51 = arith.addf %50, %49 : vector<2x784xf32>
    %52 = tpu.reciprocal %51 {approx = true} : vector<2x784xf32> -> vector<2x784xf32>
    %c0_43 = arith.constant 0 : index
    %c0_44 = arith.constant 0 : index
    %53 = vector.load %arg15[%c0_43, %c0_44] : memref<2x784xf32, #tpu.memory_space<vmem>>, vector<2x784xf32>
    tpu.vector_store %arg15[%c0_43, %c0_44], %52 {strides = array<i32>} : memref<2x784xf32, #tpu.memory_space<vmem>>, vector<2x784xf32>,
    %c0_45 = arith.constant 0 : index
    %c0_46 = arith.constant 0 : index
    %54 = vector.load %arg16[%c0_45, %c0_46] : memref<2x2xf32, #tpu.memory_space<vmem>>, vector<2x2xf32>
    tpu.vector_store %arg16[%c0_45, %c0_46], %19 {strides = array<i32>} : memref<2x2xf32, #tpu.memory_space<vmem>>, vector<2x2xf32>,
    %c0_47 = arith.constant 0 : index
    %c0_48 = arith.constant 0 : index
    %55 = vector.load %arg17[%c0_47, %c0_48] : memref<2x2xf32, #tpu.memory_space<vmem>>, vector<2x2xf32>
    tpu.vector_store %arg17[%c0_47, %c0_48], %24 {strides = array<i32>} : memref<2x2xf32, #tpu.memory_space<vmem>>, vector<2x2xf32>,
    return
  }
  func.func @transform_0(%arg0: i32) -> (i32, i32) {
    %c0_i32 = arith.constant 0 : i32
    %c0_i32_0 = arith.constant 0 : i32
    return %arg0, %c0_i32 : i32, i32
  }
  func.func @transform_1(%arg0: i32) -> (i32, i32) {
    %c0_i32 = arith.constant 0 : i32
    %c0_i32_0 = arith.constant 0 : i32
    return %arg0, %c0_i32 : i32, i32
  }
  func.func @transform_2(%arg0: i32) -> (i32, i32) {
    %c0_i32 = arith.constant 0 : i32
    %c0_i32_0 = arith.constant 0 : i32
    %c0_i32_1 = arith.constant 0 : i32
    return %c0_i32, %c0_i32_0 : i32, i32
  }
  func.func @transform_3(%arg0: i32) -> (i32, i32) {
    %c0_i32 = arith.constant 0 : i32
    %c0_i32_0 = arith.constant 0 : i32
    %c0_i32_1 = arith.constant 0 : i32
    return %c0_i32, %c0_i32_0 : i32, i32
  }
  func.func @transform_4(%arg0: i32) -> (i32, i32) {
    %c0_i32 = arith.constant 0 : i32
    %c0_i32_0 = arith.constant 0 : i32
    %c0_i32_1 = arith.constant 0 : i32
    return %c0_i32, %c0_i32_0 : i32, i32
  }
  func.func @transform_5(%arg0: i32) -> (i32, i32) {
    %c0_i32 = arith.constant 0 : i32
    %c0_i32_0 = arith.constant 0 : i32
    %c0_i32_1 = arith.constant 0 : i32
    return %c0_i32, %c0_i32_0 : i32, i32
  }
  func.func @transform_6(%arg0: i32) -> (i32, i32) {
    %c0_i32 = arith.constant 0 : i32
    %c0_i32_0 = arith.constant 0 : i32
    %c0_i32_1 = arith.constant 0 : i32
    return %c0_i32, %c0_i32_0 : i32, i32
  }
  func.func @transform_7(%arg0: i32) -> (i32, i32) {
    %c0_i32 = arith.constant 0 : i32
    %c0_i32_0 = arith.constant 0 : i32
    %c0_i32_1 = arith.constant 0 : i32
    return %c0_i32, %c0_i32_0 : i32, i32
  }
  func.func @transform_8(%arg0: i32) -> (i32, i32) {
    %c0_i32 = arith.constant 0 : i32
    %c0_i32_0 = arith.constant 0 : i32
    %c0_i32_1 = arith.constant 0 : i32
    return %c0_i32, %c0_i32_0 : i32, i32
  }
  func.func @transform_9(%arg0: i32) -> (i32, i32) {
    %c0_i32 = arith.constant 0 : i32
    %c0_i32_0 = arith.constant 0 : i32
    %c0_i32_1 = arith.constant 0 : i32
    return %c0_i32, %c0_i32_0 : i32, i32
  }
  func.func @transform_10(%arg0: i32) -> (i32, i32) {
    %c0_i32 = arith.constant 0 : i32
    %c0_i32_0 = arith.constant 0 : i32
    %c0_i32_1 = arith.constant 0 : i32
    return %c0_i32, %c0_i32_0 : i32, i32
  }
  func.func @transform_11(%arg0: i32) -> (i32, i32) {
    %c0_i32 = arith.constant 0 : i32
    %c0_i32_0 = arith.constant 0 : i32
    %c0_i32_1 = arith.constant 0 : i32
    return %c0_i32, %c0_i32_0 : i32, i32
  }
  func.func @transform_12(%arg0: i32) -> (i32, i32) {
    %c0_i32 = arith.constant 0 : i32
    %c0_i32_0 = arith.constant 0 : i32
    %c0_i32_1 = arith.constant 0 : i32
    return %c0_i32, %c0_i32_0 : i32, i32
  }
  func.func @transform_13(%arg0: i32) -> (i32, i32) {
    %c0_i32 = arith.constant 0 : i32
    %c0_i32_0 = arith.constant 0 : i32
    %c0_i32_1 = arith.constant 0 : i32
    return %c0_i32, %c0_i32_0 : i32, i32
  }
  func.func @transform_14(%arg0: i32) -> (i32, i32) {
    %c0_i32 = arith.constant 0 : i32
    %c0_i32_0 = arith.constant 0 : i32
    return %arg0, %c0_i32 : i32, i32
  }
  func.func @transform_15(%arg0: i32) -> (i32, i32) {
    %c0_i32 = arith.constant 0 : i32
    %c0_i32_0 = arith.constant 0 : i32
    return %arg0, %c0_i32 : i32, i32
  }
  func.func @transform_16(%arg0: i32) -> (i32, i32) {
    %c0_i32 = arith.constant 0 : i32
    %c0_i32_0 = arith.constant 0 : i32
    return %arg0, %c0_i32 : i32, i32
  }
}

</mosaic_0001>

<bundles_post_ra>
// kernel: vae_forward.1
= control target key start
LH: loop header
LB: loop body
LE: loop exit
PB: predicated region body
PF: predicated region fallthrough
CT: control target
= control target key end

     0   :  { %s5668_s0 = inlined_call_operand.vmem [shape: f32[2,784], index: 0, kind: input, shape index: {}]   ;;  %s5669_s1 = inlined_call_operand.hbm [shape: f32[2,2], index: 1, kind: input, shape index: {}]   ;;  %s5670_s2 = inlined_call_operand.hbm [shape: f32[784,500], index: 2, kind: input, shape index: {}]   ;;  %s5671_s3 = inlined_call_operand.hbm [shape: f32[1,500], index: 3, kind: input, shape index: {}]   ;;  %s5672_s4 = inlined_call_operand.vmem [shape: f32[500,200], index: 4, kind: input, shape index: {}]   ;;  %s5673_s5 = inlined_call_operand.hbm [shape: f32[1,200], index: 5, kind: input, shape index: {}]   ;;  %s5674_s6 = inlined_call_operand.vmem [shape: f32[200,2], index: 6, kind: input, shape index: {}]   ;;  %s5675_s7 = inlined_call_operand.hbm [shape: f32[1,2], index: 7, kind: input, shape index: {}]   ;;  %s5676_s8 = inlined_call_operand.vmem [shape: f32[200,2], index: 8, kind: input, shape index: {}]   ;;  %s5677_s9 = inlined_call_operand.hbm [shape: f32[1,2], index: 9, kind: input, shape index: {}]   ;;  %s5678_s10 = inlined_call_operand.hbm [shape: f32[2,500], index: 10, kind: input, shape index: {}]   ;;  %s5679_s11 = inlined_call_operand.hbm [shape: f32[1,500], index: 11, kind: input, shape index: {}]   ;;  %s5680_s12 = inlined_call_operand.vmem [shape: f32[200,784], index: 12, kind: input, shape index: {}]   ;;  %s5681_s13 = inlined_call_operand.hbm [shape: f32[1,784], index: 13, kind: input, shape index: {}]   ;;  %s5682_s14 = inlined_call_operand.hbm [shape: f32[2,784], index: 14, kind: output, shape index: {0}]   ;;  %s5683_s15 = inlined_call_operand.hbm [shape: f32[2,2], index: 15, kind: output, shape index: {1}]   ;;  %s5684_s16 = inlined_call_operand.hbm [shape: f32[2,2], index: 16, kind: output, shape index: {2}]  }
   0x1   :  { %5718 = sst [smem:[#allocation52_spill]] %s5668_s0 }
   0x2   :  { %5719 = sst [smem:[#allocation53_spill]] %s5682_s14 }
   0x3   :  { %22 = vsyncpa [#allocation3], 0 }
   0x4   :  { %23 = vsyncpa [#allocation6], 0 }
   0x5   :  { %24 = vsyncpa [#allocation9], 0 }
   0x6   :  { %25 = vsyncpa [#allocation12], 0 }
   0x7   :  { %26 = vsyncpa [#allocation15], 0 }
   0x8   :  { %27 = vsyncpa [#allocation4], 0 }
   0x9   :  { %28 = vsyncpa [#allocation19], 0  ;;  %s3935_s21 = smov [#allocation5]   ;;  %s3657_s25 = scalar_lea.hbm %s5670_s2, 50176 }
   0xa   :  { %s46_s22 = sshll.u32 %s3935_s21, 4  ;;  %p3658_p0 = scmp.ne.s32.totalorder %s5670_s2, %s3657_s25  ;;  %s47_s22 = int_to_ptr.vmem [resolvable:$true] %s46_s22 }
   0xb   :  { %p3661_p1 = scmp.lt.u32.totalorder %s3657_s25, %s5670_s2 }
   0xd   :  { %p3663_p2 = pnand %p3661_p1, %p3658_p0 }
   0xf   :  { %3666 = shalt.err (!%p3663_p2)
}
  0x10   :  { %s3667_s30 = scalar_lea.vmem %s47_s22, 50176  ;;  %p3672_p4 = scmp.lt.s32.totalorder %s47_s22, %s47_s22 }
  0x11   :  { %p3668_p3 = scmp.ne.s32.totalorder %s47_s22, %s3667_s30  ;;  %p3673_p5 = scmp.lt.s32.totalorder %s3667_s30, %s3667_s30 }
  0x13   :  { %p3674_p6 = por %p3673_p5, %p3672_p4 }
  0x15   :  { %p3675_p7 = pnand %p3674_p6, %p3668_p3 }
  0x17   :  { %3678 = shalt.err (!%p3675_p7)
}
  0x18   :  { %s3936_s0 = smov 512   ;;  %s3937_s17 = smov 32  }
  0x19   :  { %52 = dma.hbm_to_vmem [thread:$0]  %s5670_s2, 50176, %s47_s22, [#allocation6], %s3936_s0, %s3936_s0, %s3937_s17  }
  0x1a   :  { %s3938_s20 = smov [#allocation8]   ;;  %s3939_s23 = smov [#allocation11]  }
  0x1b   :  { %s71_s21 = sshll.u32 %s3938_s20, 4  ;;  %s95_s24 = sshll.u32 %s3939_s23, 4  ;;  %s72_s21 = int_to_ptr.vmem [resolvable:$true] %s71_s21  ;;  %s96_s24 = int_to_ptr.vmem [resolvable:$true] %s95_s24 }
  0x1c   :  { %s3679_s27 = scalar_lea.hbm %s5673_s5, 32 }
  0x1d   :  { %p3680_p8 = scmp.ne.s32.totalorder %s5673_s5, %s3679_s27  ;;  %p3683_p9 = scmp.lt.u32.totalorder %s3679_s27, %s5673_s5 }
  0x1f   :  { %p3685_p10 = pnand %p3683_p9, %p3680_p8 }
  0x21   :  { %3688 = shalt.err (!%p3685_p10)
}
  0x22   :  { %s3689_s2 = scalar_lea.vmem %s72_s21, 32  ;;  %p3694_p12 = scmp.lt.s32.totalorder %s72_s21, %s72_s21 }
  0x23   :  { %p3690_p11 = scmp.ne.s32.totalorder %s72_s21, %s3689_s2  ;;  %p3695_p13 = scmp.lt.s32.totalorder %s3689_s2, %s3689_s2 }
  0x25   :  { %p3696_p0 = por %p3695_p13, %p3694_p12 }
  0x27   :  { %p3697_p1 = pnand %p3696_p0, %p3690_p11 }
  0x29   :  { %3700 = shalt.err (!%p3697_p1)
}
  0x2a   :  { %74 = dma.hbm_to_vmem [thread:$0]  %s5673_s5, 32, %s72_s21, [#allocation9]  }
  0x2b   :  { %s3701_s19 = scalar_lea.hbm %s5677_s9, 16 }
  0x2c   :  { %p3702_p2 = scmp.ne.s32.totalorder %s5677_s9, %s3701_s19  ;;  %p3705_p3 = scmp.lt.u32.totalorder %s3701_s19, %s5677_s9 }
  0x2e   :  { %p3707_p4 = pnand %p3705_p3, %p3702_p2 }
  0x30   :  { %3710 = shalt.err (!%p3707_p4)
}
  0x31   :  { %s3711_s26 = scalar_lea.vmem %s96_s24, 16  ;;  %s3715_s27 = scalar_lea.vmem %s96_s24, 32 }
  0x32   :  { %p3712_p5 = scmp.ne.s32.totalorder %s96_s24, %s3711_s26  ;;  %p3716_p6 = scmp.lt.s32.totalorder %s96_s24, %s96_s24 }
  0x33   :  { %p3717_p7 = scmp.lt.s32.totalorder %s3715_s27, %s3711_s26 }
  0x35   :  { %p3718_p8 = por %p3717_p7, %p3716_p6 }
  0x37   :  { %p3719_p9 = pnand %p3718_p8, %p3712_p5 }
  0x39   :  { %3722 = shalt.err (!%p3719_p9)
}
  0x3a   :  { %98 = dma.hbm_to_vmem [thread:$0]  %s5677_s9, 16, %s96_s24, [#allocation12]  }
  0x3b   :  { %s3940_s28 = smov [#allocation14]   ;;  %s3941_s30 = smov [#allocation2]  }
  0x3c   :  { %s115_s29 = sshll.u32 %s3940_s28, 4  ;;  %s37_s2 = sshll.u32 %s3941_s30, 4  ;;  %s116_s29 = int_to_ptr.vmem [resolvable:$true] %s115_s29  ;;  %s38_s2 = int_to_ptr.vmem [resolvable:$true] %s37_s2 }
  0x3d   :  { %s3723_s17 = scalar_lea.hbm %s5679_s11, 64 }
  0x3e   :  { %p3724_p10 = scmp.ne.s32.totalorder %s5679_s11, %s3723_s17  ;;  %p3727_p11 = scmp.lt.u32.totalorder %s3723_s17, %s5679_s11 }
  0x40   :  { %p3729_p12 = pnand %p3727_p11, %p3724_p10 }
  0x42   :  { %3732 = shalt.err (!%p3729_p12)
}
  0x43   :  { %s3733_s9 = scalar_lea.vmem %s116_s29, 64  ;;  %p3738_p0 = scmp.lt.s32.totalorder %s116_s29, %s116_s29 }
  0x44   :  { %p3734_p13 = scmp.ne.s32.totalorder %s116_s29, %s3733_s9  ;;  %p3739_p1 = scmp.lt.s32.totalorder %s3733_s9, %s3733_s9 }
  0x46   :  { %p3740_p2 = por %p3739_p1, %p3738_p0 }
  0x48   :  { %p3741_p3 = pnand %p3740_p2, %p3734_p13 }
  0x4a   :  { %3744 = shalt.err (!%p3741_p3)
}
  0x4b   :  { %118 = dma.hbm_to_vmem [thread:$0]  %s5679_s11, 64, %s116_s29, [#allocation15]  }
  0x4c   :  { %s3745_s27 = scalar_lea.hbm %s5669_s1, 32 }
  0x4d   :  { %p3746_p4 = scmp.ne.s32.totalorder %s5669_s1, %s3745_s27  ;;  %p3749_p5 = scmp.lt.u32.totalorder %s3745_s27, %s5669_s1 }
  0x4f   :  { %p3751_p6 = pnand %p3749_p5, %p3746_p4 }
  0x51   :  { %3754 = shalt.err (!%p3751_p6)
}
  0x52   :  { %s3755_s22 = scalar_lea.vmem %s38_s2, 32  ;;  %p3760_p8 = scmp.lt.s32.totalorder %s38_s2, %s38_s2 }
  0x53   :  { %p3756_p7 = scmp.ne.s32.totalorder %s38_s2, %s3755_s22  ;;  %p3761_p9 = scmp.lt.s32.totalorder %s3755_s22, %s3755_s22 }
  0x55   :  { %p3762_p10 = por %p3761_p9, %p3760_p8 }
  0x57   :  { %p3763_p11 = pnand %p3762_p10, %p3756_p7 }
  0x59   :  { %3766 = shalt.err (!%p3763_p11)
}
  0x5a   :  { %40 = dma.hbm_to_vmem [thread:$0]  %s5669_s1, 32, %s38_s2, [#allocation3]  }
  0x5b   :  { %s3942_s0 = smov [#allocation7]   ;;  %s3943_s18 = smov [#allocation10]  }
  0x5c   :  { %s59_s17 = sshll.u32 %s3942_s0, 4  ;;  %s83_s19 = sshll.u32 %s3943_s18, 4  ;;  %s60_s17 = int_to_ptr.vmem [resolvable:$true] %s59_s17  ;;  %s84_s19 = int_to_ptr.vmem [resolvable:$true] %s83_s19 }
  0x5d   :  { %s3767_s9 = scalar_lea.hbm %s5671_s3, 64 }
  0x5e   :  { %p3768_p12 = scmp.ne.s32.totalorder %s5671_s3, %s3767_s9  ;;  %p3771_p13 = scmp.lt.u32.totalorder %s3767_s9, %s5671_s3 }
  0x60   :  { %p3773_p0 = pnand %p3771_p13, %p3768_p12 }
  0x62   :  { %3776 = shalt.err (!%p3773_p0)
}
  0x63   :  { %s3777_s1 = scalar_lea.vmem %s60_s17, 64  ;;  %p3782_p2 = scmp.lt.s32.totalorder %s60_s17, %s60_s17 }
  0x64   :  { %p3778_p1 = scmp.ne.s32.totalorder %s60_s17, %s3777_s1  ;;  %p3783_p3 = scmp.lt.s32.totalorder %s3777_s1, %s3777_s1 }
  0x66   :  { %p3784_p4 = por %p3783_p3, %p3782_p2 }
  0x68   :  { %p3785_p5 = pnand %p3784_p4, %p3778_p1 }
  0x6a   :  { %3788 = shalt.err (!%p3785_p5)
}
  0x6b   :  { %62 = dma.hbm_to_vmem [thread:$0]  %s5671_s3, 64, %s60_s17, [#allocation6]  }
  0x6c   :  { %s3789_s28 = scalar_lea.hbm %s5675_s7, 16 }
  0x6d   :  { %p3790_p6 = scmp.ne.s32.totalorder %s5675_s7, %s3789_s28  ;;  %p3793_p7 = scmp.lt.u32.totalorder %s3789_s28, %s5675_s7 }
  0x6f   :  { %p3795_p8 = pnand %p3793_p7, %p3790_p6 }
  0x71   :  { %3798 = shalt.err (!%p3795_p8)
}
  0x72   :  { %s3799_s0 = scalar_lea.vmem %s84_s19, 16  ;;  %s3803_s18 = scalar_lea.vmem %s84_s19, 32 }
  0x73   :  { %p3800_p9 = scmp.ne.s32.totalorder %s84_s19, %s3799_s0  ;;  %p3804_p10 = scmp.lt.s32.totalorder %s84_s19, %s84_s19 }
  0x74   :  { %p3805_p11 = scmp.lt.s32.totalorder %s3803_s18, %s3799_s0 }
  0x76   :  { %p3806_p12 = por %p3805_p11, %p3804_p10 }
  0x78   :  { %p3807_p13 = pnand %p3806_p12, %p3800_p9 }
  0x7a   :  { %3810 = shalt.err (!%p3807_p13)
}
  0x7b   :  { %86 = dma.hbm_to_vmem [thread:$0]  %s5675_s7, 16, %s84_s19, [#allocation9]  }
  0x7c   :  { %s3944_s14 = smov [#allocation13]   ;;  %s3945_s9 = smov [#allocation16]  }
  0x7d   :  { %s105_s20 = sshll.u32 %s3944_s14, 4  ;;  %s127_s24 = sshll.u32 %s3945_s9, 4  ;;  %s106_s20 = int_to_ptr.vmem [resolvable:$true] %s105_s20  ;;  %s128_s24 = int_to_ptr.vmem [resolvable:$true] %s127_s24 }
  0x7e   :  { %s3811_s26 = scalar_lea.hbm %s5678_s10, 128 }
  0x7f   :  { %p3812_p0 = scmp.ne.s32.totalorder %s5678_s10, %s3811_s26  ;;  %p3815_p1 = scmp.lt.u32.totalorder %s3811_s26, %s5678_s10 }
  0x81   :  { %p3817_p2 = pnand %p3815_p1, %p3812_p0 }
  0x83   :  { %3820 = shalt.err (!%p3817_p2)
}
  0x84   :  { %s3821_s7 = scalar_lea.vmem %s106_s20, 128  ;;  %p3826_p4 = scmp.lt.s32.totalorder %s106_s20, %s106_s20 }
  0x85   :  { %p3822_p3 = scmp.ne.s32.totalorder %s106_s20, %s3821_s7  ;;  %p3827_p5 = scmp.lt.s32.totalorder %s3821_s7, %s3821_s7 }
  0x87   :  { %p3828_p6 = por %p3827_p5, %p3826_p4 }
  0x89   :  { %p3829_p7 = pnand %p3828_p6, %p3822_p3 }
  0x8b   :  { %3832 = shalt.err (!%p3829_p7)
}
  0x8c   :  { %108 = dma.hbm_to_vmem [thread:$0]  %s5678_s10, 128, %s106_s20, [#allocation12]  }
  0x8d   :  { %s3833_s22 = scalar_lea.hbm %s5681_s13, 112 }
  0x8e   :  { %p3834_p8 = scmp.ne.s32.totalorder %s5681_s13, %s3833_s22  ;;  %p3837_p9 = scmp.lt.u32.totalorder %s3833_s22, %s5681_s13 }
  0x90   :  { %p3839_p10 = pnand %p3837_p9, %p3834_p8 }
  0x92   :  { %3842 = shalt.err (!%p3839_p10)
}
  0x93   :  { %s3843_s3 = scalar_lea.vmem %s128_s24, 112  ;;  %s3847_s17 = scalar_lea.vmem %s128_s24, 128 }
  0x94   :  { %p3844_p11 = scmp.ne.s32.totalorder %s128_s24, %s3843_s3  ;;  %p3848_p12 = scmp.lt.s32.totalorder %s128_s24, %s128_s24 }
  0x95   :  { %p3849_p13 = scmp.lt.s32.totalorder %s3847_s17, %s3843_s3 }
  0x97   :  { %p3850_p0 = por %p3849_p13, %p3848_p12 }
  0x99   :  { %p3851_p1 = pnand %p3850_p0, %p3844_p11 }
  0x9b   :  { %3854 = shalt.err (!%p3851_p1)
}
  0x9c   :  { %130 = dma.hbm_to_vmem [thread:$0]  %s5681_s13, 112, %s128_s24, [#allocation15]  }
  0x9d   :  { %3921 = dma.done.wait [#allocation3], 32  }
  0x9e   :  { %3922 = vsyncadd [#allocation3], 4294967264 }
  0x9f   :  { %3923 = dma.done.wait [#allocation6], 50240  }
  0xa0   :  { %3924 = vsyncadd [#allocation6], 4294917056 }
  0xa1   :  { %3925 = dma.done.wait [#allocation9], 48  }
  0xa2   :  { %3926 = vsyncadd [#allocation9], 4294967248 }
  0xa3   :  { %3927 = dma.done.wait [#allocation12], 144  }
  0xa4   :  { %3928 = vsyncadd [#allocation12], 4294967152 }
  0xa5   :  { %3929 = dma.done.wait [#allocation15], 176  }
  0xa6   :  { %3930 = vsyncadd [#allocation15], 4294967120  ;;  %v161_v0 = vld [vmem:[#allocation5 + $0x8] sm:$0xff]  ;;  %v163_v2 = vld [vmem:[#allocation5 + $0x18] sm:$0xff]  ;;  %s5721_s9 = sld [smem:[#allocation52_spill]]  ;;  %vm615_vm0 = vcmask 130048  }
  0xa7   :  { %v165_v1 = vld [vmem:[#allocation5 + $0x28] sm:$0xff]  ;;  %v167_v4 = vld [vmem:[#allocation5 + $0x38] sm:$0xff]  ;;  %v160_v5 = vld [vmem:[#allocation5] sm:$0xff]  ;;  %vm1328_vm1 = vcmask 949248   ;;  %vm1332_vm2 = vcmask 1043456   ;;  %vm1515_vm3 = vcmask 588800  }
  0xa8   :  { %v2693_v3 = vpack.c.bf16 %v165_v1, %v161_v0  ;;  %v164_v6 = vld [vmem:[#allocation5 + $0x20] sm:$0xff]  ;;  %v2889_v7 = vpack.c.bf16 %v167_v4, %v163_v2  ;;  %v162_v9 = vld [vmem:[#allocation5 + $0x10] sm:$0xff]  ;;  %v169_v11 = vld [vmem:[#allocation5 + $0x48] sm:$0xff]  ;;  %vm1739_vm4 = vcmask 1041408   ;;  %vm2622_vm5 = vcmask 9216   ;;  %s3949_s28 = smov [#allocation18]  }
  0xa9   :  { %v2695_v8 = vpack.c.bf16 %v164_v6, %v160_v5  ;;  %v166_v10 = vld [vmem:[#allocation5 + $0x30] sm:$0xff]  ;;  %v173_v13 = vld [vmem:[#allocation5 + $0x68] sm:$0xff]  ;;  %v171_v14 = vld [vmem:[#allocation5 + $0x58] sm:$0xff]  ;;  %vm1735_vm6 = vcmask 15360   ;;  %s2641_s30 = sshll.u32 %s3949_s28, 4  ;;  %s2642_s30 = int_to_ptr.vmem [resolvable:$true] %s2641_s30 }
  0xaa   :  { %2694 = vmatprep.subr.bf16.mxu0 %v2693_v3  ;;  %v2891_v12 = vpack.c.bf16 %v166_v10, %v162_v9  ;;  %v175_v15 = vld [vmem:[#allocation5 + $0x78] sm:$0xff]  ;;  %2890 = vmatprep.subr.bf16.mxu1 %v2889_v7  ;;  %v2697_v16 = vpack.c.bf16 %v173_v13, %v169_v11  ;;  %v168_v18 = vld [vmem:[#allocation5 + $0x40] sm:$0xff]  ;;  %v170_v20 = vld [vmem:[#allocation5 + $0x50] sm:$0xff]  ;;  %s3855_s22 = scalar_lea.vmem %s2642_s30, 32  ;;  %p3860_p3 = scmp.lt.s32.totalorder %s2642_s30, %s2642_s30 }
  0xab   :  { %2696 = vmatpush1.bf16.msra.mxu0 %v2695_v8  ;;  %v2893_v17 = vpack.c.bf16 %v175_v15, %v171_v14  ;;  %v172_v19 = vld [vmem:[#allocation5 + $0x60] sm:$0xff]  ;;  %v174_v22 = vld [vmem:[#allocation5 + $0x70] sm:$0xff]  ;;  %v177_v23 = vld [vmem:[#allocation5 + $0x88] sm:$0xff]  ;;  %p3856_p2 = scmp.ne.s32.totalorder %s2642_s30, %s3855_s22  ;;  %p3861_p4 = scmp.lt.s32.totalorder %s3855_s22, %s3855_s22 }
  0xac   :  { %2892 = vmatpush1.bf16.msra.mxu1 %v2891_v12  ;;  %v2699_v21 = vpack.c.bf16 %v172_v19, %v168_v18  ;;  %v181_v24 = vld [vmem:[#allocation5 + $0xa8] sm:$0xff]  ;;  %2698 = vmatprep.subr.bf16.mxu0 %v2697_v16  ;;  %v2895_v25 = vpack.c.bf16 %v174_v22, %v170_v20  ;;  %v179_v27 = vld [vmem:[#allocation5 + $0x98] sm:$0xff]  ;;  %v176_v29 = vld [vmem:[#allocation5 + $0x80] sm:$0xff] }
  0xad   :  { %2894 = vmatprep.subr.bf16.mxu1 %v2893_v17  ;;  %v2701_v26 = vpack.c.bf16 %v181_v24, %v177_v23  ;;  %v183_v28 = vld [vmem:[#allocation5 + $0xb8] sm:$0xff]  ;;  %v180_v31 = vld [vmem:[#allocation5 + $0xa0] sm:$0xff]  ;;  %v178_v32 = vld [vmem:[#allocation5 + $0x90] sm:$0xff]  ;;  %p3862_p5 = por %p3861_p4, %p3860_p3 }
  0xae   :  { %v2897_v30 = vpack.c.bf16 %v183_v28, %v179_v27  ;;  %v182_v33 = vld [vmem:[#allocation5 + $0xb0] sm:$0xff]  ;;  %v2703_v34 = vpack.c.bf16 %v180_v31, %v176_v29  ;;  %v185_v35 = vld [vmem:[#allocation5 + $0xc8] sm:$0xff]  ;;  %v187_v37 = vld [vmem:[#allocation5 + $0xd8] sm:$0xff] }
  0xaf   :  { %2700 = vmatpush1.bf16.msra.mxu0 %v2699_v21  ;;  %v189_v36 = vld [vmem:[#allocation5 + $0xe8] sm:$0xff]  ;;  %v2899_v38 = vpack.c.bf16 %v182_v33, %v178_v32  ;;  %v191_v40 = vld [vmem:[#allocation5 + $0xf8] sm:$0xff]  ;;  %v184_v41 = vld [vmem:[#allocation5 + $0xc0] sm:$0xff]  ;;  %p3863_p6 = pnand %p3862_p5, %p3856_p2 }
  0xb0   :  { %2896 = vmatpush1.bf16.msra.mxu1 %v2895_v25  ;;  %2702 = vmatprep.subr.bf16.mxu0 %v2701_v26  ;;  %v2705_v39 = vpack.c.bf16 %v189_v36, %v185_v35  ;;  %v188_v42 = vld [vmem:[#allocation5 + $0xe0] sm:$0xff]  ;;  %v2901_v43 = vpack.c.bf16 %v191_v40, %v187_v37  ;;  %v186_v44 = vld [vmem:[#allocation5 + $0xd0] sm:$0xff]  ;;  %v193_v46 = vld [vmem:[#allocation5 + $0x108] sm:$0xff] }
  0xb1   :  { %2898 = vmatprep.subr.bf16.mxu1 %v2897_v30  ;;  %v190_v45 = vld [vmem:[#allocation5 + $0xf0] sm:$0xff]  ;;  %v197_v47 = vld [vmem:[#allocation5 + $0x128] sm:$0xff]  ;;  %v195_v48 = vld [vmem:[#allocation5 + $0x118] sm:$0xff]  ;;  %v2707_v50 = vpack.c.bf16 %v188_v42, %v184_v41 }
  0xb2   :  { %v199_v49 = vld [vmem:[#allocation5 + $0x138] sm:$0xff]  ;;  %v2903_v51 = vpack.c.bf16 %v190_v45, %v186_v44  ;;  %v2709_v52 = vpack.c.bf16 %v197_v47, %v193_v46  ;;  %v192_v53 = vld [vmem:[#allocation5 + $0x100] sm:$0xff]  ;;  %v194_v55 = vld [vmem:[#allocation5 + $0x110] sm:$0xff]  ;;  %v554_v46 = vlaneseq  ;;  %v3946_v47 = vmov 1983009808  }
  0xb3   :  { %2704 = vmatpush1.bf16.msra.mxu0 %v2703_v34  ;;  %v196_v54 = vld [vmem:[#allocation5 + $0x120] sm:$0xff]  ;;  %v2905_v56 = vpack.c.bf16 %v199_v49, %v195_v48  ;;  %v198_v57 = vld [vmem:[#allocation5 + $0x130] sm:$0xff]  ;;  %v201_v58 = vld [vmem:[#allocation5 + $0x148] sm:$0xff]  ;;  %v578_v48 = vunpack.c.l.s4 %v3946_v47 }
  0xb4   :  { %2900 = vmatpush1.bf16.msra.mxu1 %v2899_v38  ;;  %2706 = vmatprep.subr.bf16.mxu0 %v2705_v39  ;;  %v205_v59 = vld [vmem:[#allocation5 + $0x168] sm:$0xff]  ;;  %v203_v60 = vld [vmem:[#allocation5 + $0x158] sm:$0xff]  ;;  %v2711_v62 = vpack.c.bf16 %v196_v54, %v192_v53  ;;  %v2907_v63 = vpack.c.bf16 %v198_v57, %v194_v55  ;;  %v200_v1 = vld [vmem:[#allocation5 + $0x140] sm:$0xff] }
  0xb5   :  { %2902 = vmatprep.subr.bf16.mxu1 %v2901_v43  ;;  %v207_v61 = vld [vmem:[#allocation5 + $0x178] sm:$0xff]  ;;  %v2713_v0 = vpack.c.bf16 %v205_v59, %v201_v58  ;;  %v204_v2 = vld [vmem:[#allocation5 + $0x160] sm:$0xff]  ;;  %v202_v3 = vld [vmem:[#allocation5 + $0x150] sm:$0xff] }
  0xb6   :  { %v2909_v4 = vpack.c.bf16 %v207_v61, %v203_v60  ;;  %v206_v5 = vld [vmem:[#allocation5 + $0x170] sm:$0xff]  ;;  %v209_v6 = vld [vmem:[#allocation5 + $0x188] sm:$0xff]  ;;  %v211_v8 = vld [vmem:[#allocation5 + $0x198] sm:$0xff]  ;;  %v2715_v10 = vpack.c.bf16 %v204_v2, %v200_v1  ;;  %v4145_v61 = vshrl.u32 %v554_v46, 7 }
  0xb7   :  { %2708 = vmatpush1.bf16.msra.mxu0 %v2707_v50  ;;  %v213_v7 = vld [vmem:[#allocation5 + $0x1a8] sm:$0xff]  ;;  %v215_v9 = vld [vmem:[#allocation5 + $0x1b8] sm:$0xff]  ;;  %v2911_v11 = vpack.c.bf16 %v206_v5, %v202_v3  ;;  %v208_v13 = vld [vmem:[#allocation5 + $0x180] sm:$0xff] }
  0xb8   :  { %2904 = vmatpush1.bf16.msra.mxu1 %v2903_v51  ;;  %2710 = vmatprep.subr.bf16.mxu0 %v2709_v52  ;;  %v2717_v12 = vpack.c.bf16 %v213_v7, %v209_v6  ;;  %v212_v14 = vld [vmem:[#allocation5 + $0x1a0] sm:$0xff]  ;;  %v210_v15 = vld [vmem:[#allocation5 + $0x190] sm:$0xff]  ;;  %v2913_v16 = vpack.c.bf16 %v215_v9, %v211_v8  ;;  %v217_v18 = vld [vmem:[#allocation5 + $0x1c8] sm:$0xff]  ;;  %5720 = vst [vmem:[#allocation28_spill] sm:$0xff] %v4145_v61 }
  0xb9   :  { %2906 = vmatprep.subr.bf16.mxu1 %v2905_v56  ;;  %v214_v17 = vld [vmem:[#allocation5 + $0x1b0] sm:$0xff]  ;;  %v221_v19 = vld [vmem:[#allocation5 + $0x1e8] sm:$0xff]  ;;  %v219_v20 = vld [vmem:[#allocation5 + $0x1d8] sm:$0xff]  ;;  %v2719_v22 = vpack.c.bf16 %v212_v14, %v208_v13 }
  0xba   :  { %v223_v21 = vld [vmem:[#allocation5 + $0x1f8] sm:$0xff]  ;;  %v2915_v23 = vpack.c.bf16 %v214_v17, %v210_v15  ;;  %v2721_v24 = vpack.c.bf16 %v221_v19, %v217_v18  ;;  %v216_v25 = vld [vmem:[#allocation5 + $0x1c0] sm:$0xff]  ;;  %v218_v27 = vld [vmem:[#allocation5 + $0x1d0] sm:$0xff] }
  0xbb   :  { %2712 = vmatpush1.bf16.msra.mxu0 %v2711_v62  ;;  %v220_v26 = vld [vmem:[#allocation5 + $0x1e0] sm:$0xff]  ;;  %v2917_v28 = vpack.c.bf16 %v223_v21, %v219_v20  ;;  %v222_v29 = vld [vmem:[#allocation5 + $0x1f0] sm:$0xff]  ;;  %v225_v30 = vld [vmem:[#allocation5 + $0x208] sm:$0xff]  ;;  %v579_v62 = vunpack.c.0.s8 %v578_v48 }
  0xbc   :  { %2908 = vmatpush1.bf16.msra.mxu1 %v2907_v63  ;;  %2714 = vmatprep.subr.bf16.mxu0 %v2713_v0  ;;  %v229_v31 = vld [vmem:[#allocation5 + $0x228] sm:$0xff]  ;;  %v227_v32 = vld [vmem:[#allocation5 + $0x218] sm:$0xff]  ;;  %v2723_v34 = vpack.c.bf16 %v220_v26, %v216_v25  ;;  %v2919_v35 = vpack.c.bf16 %v222_v29, %v218_v27  ;;  %v224_v37 = vld [vmem:[#allocation5 + $0x200] sm:$0xff] }
  0xbd   :  { %2910 = vmatprep.subr.bf16.mxu1 %v2909_v4  ;;  %v231_v33 = vld [vmem:[#allocation5 + $0x238] sm:$0xff]  ;;  %v2725_v36 = vpack.c.bf16 %v229_v31, %v225_v30  ;;  %v228_v38 = vld [vmem:[#allocation5 + $0x220] sm:$0xff]  ;;  %v226_v39 = vld [vmem:[#allocation5 + $0x210] sm:$0xff] }
  0xbe   :  { %v2921_v40 = vpack.c.bf16 %v231_v33, %v227_v32  ;;  %v230_v41 = vld [vmem:[#allocation5 + $0x230] sm:$0xff]  ;;  %v233_v42 = vld [vmem:[#allocation5 + $0x248] sm:$0xff]  ;;  %v235_v44 = vld [vmem:[#allocation5 + $0x258] sm:$0xff]  ;;  %v2727_v49 = vpack.c.bf16 %v228_v38, %v224_v37 }
  0xbf   :  { %2716 = vmatpush1.bf16.msra.mxu0 %v2715_v10  ;;  %v237_v43 = vld [vmem:[#allocation5 + $0x268] sm:$0xff]  ;;  %v239_v45 = vld [vmem:[#allocation5 + $0x278] sm:$0xff]  ;;  %v2923_v50 = vpack.c.bf16 %v230_v41, %v226_v39  ;;  %v232_v52 = vld [vmem:[#allocation5 + $0x240] sm:$0xff] }
  0xc0   :  { %2912 = vmatpush1.bf16.msra.mxu1 %v2911_v11  ;;  %2718 = vmatprep.subr.bf16.mxu0 %v2717_v12  ;;  %v2729_v51 = vpack.c.bf16 %v237_v43, %v233_v42  ;;  %v236_v53 = vld [vmem:[#allocation5 + $0x260] sm:$0xff]  ;;  %v234_v54 = vld [vmem:[#allocation5 + $0x250] sm:$0xff]  ;;  %v2925_v55 = vpack.c.bf16 %v239_v45, %v235_v44  ;;  %v241_v57 = vld [vmem:[#allocation5 + $0x288] sm:$0xff]  ;;  %v4148_v11 = vsub.s32 %v579_v62, %v4145_v61 }
  0xc1   :  { %2914 = vmatprep.subr.bf16.mxu1 %v2913_v16  ;;  %v238_v56 = vld [vmem:[#allocation5 + $0x270] sm:$0xff]  ;;  %v245_v58 = vld [vmem:[#allocation5 + $0x2a8] sm:$0xff]  ;;  %v243_v59 = vld [vmem:[#allocation5 + $0x298] sm:$0xff]  ;;  %v2731_v63 = vpack.c.bf16 %v236_v53, %v232_v52 }
  0xc2   :  { %v247_v60 = vld [vmem:[#allocation5 + $0x2b8] sm:$0xff]  ;;  %v2927_v0 = vpack.c.bf16 %v238_v56, %v234_v54  ;;  %v2733_v1 = vpack.c.bf16 %v245_v58, %v241_v57  ;;  %v240_v2 = vld [vmem:[#allocation5 + $0x280] sm:$0xff]  ;;  %v242_v4 = vld [vmem:[#allocation5 + $0x290] sm:$0xff] }
  0xc3   :  { %2720 = vmatpush1.bf16.msra.mxu0 %v2719_v22  ;;  %v244_v3 = vld [vmem:[#allocation5 + $0x2a0] sm:$0xff]  ;;  %v2929_v5 = vpack.c.bf16 %v247_v60, %v243_v59  ;;  %v246_v6 = vld [vmem:[#allocation5 + $0x2b0] sm:$0xff]  ;;  %v249_v7 = vld [vmem:[#allocation5 + $0x2c8] sm:$0xff] }
  0xc4   :  { %2916 = vmatpush1.bf16.msra.mxu1 %v2915_v23  ;;  %2722 = vmatprep.subr.bf16.mxu0 %v2721_v24  ;;  %v253_v8 = vld [vmem:[#allocation5 + $0x2e8] sm:$0xff]  ;;  %v251_v9 = vld [vmem:[#allocation5 + $0x2d8] sm:$0xff]  ;;  %v2735_v12 = vpack.c.bf16 %v244_v3, %v240_v2  ;;  %v248_v13 = vld [vmem:[#allocation5 + $0x2c0] sm:$0xff]  ;;  %v2931_v14 = vpack.c.bf16 %v246_v6, %v242_v4 }
  0xc5   :  { %2918 = vmatprep.subr.bf16.mxu1 %v2917_v28  ;;  %v255_v10 = vld [vmem:[#allocation5 + $0x2f8] sm:$0xff]  ;;  %v2737_v15 = vpack.c.bf16 %v253_v8, %v249_v7  ;;  %v252_v16 = vld [vmem:[#allocation5 + $0x2e0] sm:$0xff]  ;;  %v250_v17 = vld [vmem:[#allocation5 + $0x2d0] sm:$0xff] }
  0xc6   :  { %v254_v18 = vld [vmem:[#allocation5 + $0x2f0] sm:$0xff]  ;;  %v2933_v19 = vpack.c.bf16 %v255_v10, %v251_v9  ;;  %v257_v20 = vld [vmem:[#allocation5 + $0x308] sm:$0xff]  ;;  %v259_v23 = vld [vmem:[#allocation5 + $0x318] sm:$0xff]  ;;  %v2739_v26 = vpack.c.bf16 %v252_v16, %v248_v13 }
  0xc7   :  { %2724 = vmatpush1.bf16.msra.mxu0 %v2723_v34  ;;  %v261_v21 = vld [vmem:[#allocation5 + $0x328] sm:$0xff]  ;;  %v263_v24 = vld [vmem:[#allocation5 + $0x338] sm:$0xff]  ;;  %v2935_v27 = vpack.c.bf16 %v254_v18, %v250_v17  ;;  %v256_v29 = vld [vmem:[#allocation5 + $0x300] sm:$0xff] }
  0xc8   :  { %2920 = vmatpush1.bf16.msra.mxu1 %v2919_v35  ;;  %2726 = vmatprep.subr.bf16.mxu0 %v2725_v36  ;;  %v4153_v22 = vld [vmem:[%s5721_s9] sm:$0xff]  ;;  %v2741_v28 = vpack.c.bf16 %v261_v21, %v257_v20  ;;  %v258_v31 = vld [vmem:[#allocation5 + $0x310] sm:$0xff]  ;;  %v2937_v33 = vpack.c.bf16 %v263_v24, %v259_v23  ;;  %v267_v37 = vld [vmem:[#allocation5 + $0x358] sm:$0xff] }
  0xc9   :  { %2922 = vmatprep.subr.bf16.mxu1 %v2921_v40  ;;  %v4157_v25 = vrot.slane %v4153_v22, %v4148_v11  ;;  %v260_v30 = vld [vmem:[#allocation5 + $0x320] sm:$0xff]  ;;  %v262_v34 = vld [vmem:[#allocation5 + $0x330] sm:$0xff]  ;;  %v265_v35 = vld [vmem:[#allocation5 + $0x348] sm:$0xff]  ;;  %v576_v8 = vcombine.high %v4153_v22, %v4153_v22 }
  0xca   :  { %v269_v36 = vld [vmem:[#allocation5 + $0x368] sm:$0xff]  ;;  %v271_v38 = vld [vmem:[#allocation5 + $0x378] sm:$0xff]  ;;  %v2743_v39 = vpack.c.bf16 %v260_v30, %v256_v29  ;;  %v2939_v40 = vpack.c.bf16 %v262_v34, %v258_v31  ;;  %v264_v42 = vld [vmem:[#allocation5 + $0x340] sm:$0xff] }
  0xcb   :  { %2728 = vmatpush1.bf16.msra.mxu0 %v2727_v49  ;;  %v591_v32 = vcombine.high %v4157_v25, %v4157_v25  ;;  %v2745_v41 = vpack.c.bf16 %v269_v36, %v265_v35  ;;  %v268_v43 = vld [vmem:[#allocation5 + $0x360] sm:$0xff]  ;;  %v266_v44 = vld [vmem:[#allocation5 + $0x350] sm:$0xff]  ;;  %v2941_v45 = vpack.c.bf16 %v271_v38, %v267_v37  ;;  %v273_v47 = vld [vmem:[#allocation5 + $0x388] sm:$0xff]  ;;  %v4164_v22 = vrot.slane %v576_v8, %v4148_v11 }
  0xcc   :  { %2924 = vmatpush1.bf16.msra.mxu1 %v2923_v50  ;;  %2730 = vmatprep.subr.bf16.mxu0 %v2729_v51  ;;  %v270_v46 = vld [vmem:[#allocation5 + $0x370] sm:$0xff]  ;;  %v277_v48 = vld [vmem:[#allocation5 + $0x3a8] sm:$0xff]  ;;  %v275_v49 = vld [vmem:[#allocation5 + $0x398] sm:$0xff]  ;;  %v2747_v51 = vpack.c.bf16 %v268_v43, %v264_v42 }
  0xcd   :  { %2926 = vmatprep.subr.bf16.mxu1 %v2925_v55  ;;  %682 = vmatprep.mubr.f32.mxu0 %v591_v32  ;;  %v279_v50 = vld [vmem:[#allocation5 + $0x3b8] sm:$0xff]  ;;  %v2943_v52 = vpack.c.bf16 %v270_v46, %v266_v44  ;;  %v2749_v53 = vpack.c.bf16 %v277_v48, %v273_v47  ;;  %v272_v54 = vld [vmem:[#allocation5 + $0x380] sm:$0xff]  ;;  %v274_v56 = vld [vmem:[#allocation5 + $0x390] sm:$0xff]  ;;  %v592_v38 = vcombine.high %v4164_v22, %v4164_v22 }
  0xce   :  { %966 = vmatprep.mubr.f32.mxu1 %v591_v32  ;;  %v276_v55 = vld [vmem:[#allocation5 + $0x3a0] sm:$0xff]  ;;  %v2945_v57 = vpack.c.bf16 %v279_v50, %v275_v49  ;;  %v278_v58 = vld [vmem:[#allocation5 + $0x3b0] sm:$0xff]  ;;  %v281_v59 = vld [vmem:[#allocation5 + $0x3c8] sm:$0xff] }
  0xcf   :  { %2732 = vmatpush1.bf16.msra.mxu0 %v2731_v63  ;;  %v285_v60 = vld [vmem:[#allocation5 + $0x3e8] sm:$0xff]  ;;  %v283_v62 = vld [vmem:[#allocation5 + $0x3d8] sm:$0xff]  ;;  %v280_v3 = vld [vmem:[#allocation5 + $0x3c0] sm:$0xff] }
  0xd0   :  { %2928 = vmatpush1.bf16.msra.mxu1 %v2927_v0  ;;  %2734 = vmatprep.subr.bf16.mxu0 %v2733_v1  ;;  %v287_v63 = vld [vmem:[#allocation5 + $0x3f8] sm:$0xff]  ;;  %v2751_v0 = vpack.c.bf16 %v276_v55, %v272_v54  ;;  %v2947_v1 = vpack.c.bf16 %v278_v58, %v274_v56  ;;  %v2753_v2 = vpack.c.bf16 %v285_v60, %v281_v59  ;;  %v284_v4 = vld [vmem:[#allocation5 + $0x3e0] sm:$0xff]  ;;  %v286_v7 = vld [vmem:[#allocation5 + $0x3f0] sm:$0xff] }
  0xd1   :  { %2930 = vmatprep.subr.bf16.mxu1 %v2929_v5  ;;  %v282_v5 = vld [vmem:[#allocation5 + $0x3d0] sm:$0xff]  ;;  %v2949_v6 = vpack.c.bf16 %v287_v63, %v283_v62  ;;  %v289_v9 = vld [vmem:[#allocation5 + $0x408] sm:$0xff]  ;;  %v295_v13 = vld [vmem:[#allocation5 + $0x438] sm:$0xff] }
  0xd2   :  { %v293_v10 = vld [vmem:[#allocation5 + $0x428] sm:$0xff]  ;;  %v288_v17 = vld [vmem:[#allocation5 + $0x400] sm:$0xff]  ;;  %v294_v21 = vld [vmem:[#allocation5 + $0x430] sm:$0xff] }
  0xd3   :  { %2736 = vmatpush1.bf16.msra.mxu0 %v2735_v12  ;;  %v291_v12 = vld [vmem:[#allocation5 + $0x418] sm:$0xff]  ;;  %v2757_v16 = vpack.c.bf16 %v293_v10, %v289_v9  ;;  %v292_v18 = vld [vmem:[#allocation5 + $0x420] sm:$0xff]  ;;  %v297_v23 = vld [vmem:[#allocation5 + $0x448] sm:$0xff] }
  0xd4   :  { %2932 = vmatpush1.bf16.msra.mxu1 %v2931_v14  ;;  %2738 = vmatprep.subr.bf16.mxu0 %v2737_v15  ;;  %v2755_v14 = vpack.c.bf16 %v284_v4, %v280_v3  ;;  %v2951_v15 = vpack.c.bf16 %v286_v7, %v282_v5  ;;  %v2953_v20 = vpack.c.bf16 %v295_v13, %v291_v12  ;;  %v301_v24 = vld [vmem:[#allocation5 + $0x468] sm:$0xff]  ;;  %v296_v31 = vld [vmem:[#allocation5 + $0x440] sm:$0xff]  ;;  %v302_v35 = vld [vmem:[#allocation5 + $0x470] sm:$0xff] }
  0xd5   :  { %2934 = vmatprep.subr.bf16.mxu1 %v2933_v19  ;;  %v290_v19 = vld [vmem:[#allocation5 + $0x410] sm:$0xff]  ;;  %v2761_v30 = vpack.c.bf16 %v301_v24, %v297_v23  ;;  %v300_v32 = vld [vmem:[#allocation5 + $0x460] sm:$0xff]  ;;  %v305_v36 = vld [vmem:[#allocation5 + $0x488] sm:$0xff] }
  0xd6   :  { %v2955_v29 = vpack.c.bf16 %v294_v21, %v290_v19  ;;  %v309_v37 = vld [vmem:[#allocation5 + $0x4a8] sm:$0xff]  ;;  %v304_v44 = vld [vmem:[#allocation5 + $0x480] sm:$0xff]  ;;  %v306_v46 = vld [vmem:[#allocation5 + $0x490] sm:$0xff] }
  0xd7   :  { %2740 = vmatpush1.bf16.msra.mxu0 %v2739_v26  ;;  %v299_v26 = vld [vmem:[#allocation5 + $0x458] sm:$0xff]  ;;  %v2765_v43 = vpack.c.bf16 %v309_v37, %v305_v36  ;;  %v310_v48 = vld [vmem:[#allocation5 + $0x4b0] sm:$0xff]  ;;  %v313_v49 = vld [vmem:[#allocation5 + $0x4c8] sm:$0xff] }
  0xd8   :  { %2936 = vmatpush1.bf16.msra.mxu1 %v2935_v27  ;;  %2742 = vmatprep.subr.bf16.mxu0 %v2741_v28  ;;  %v303_v27 = vld [vmem:[#allocation5 + $0x478] sm:$0xff]  ;;  %v2759_v28 = vpack.c.bf16 %v292_v18, %v288_v17  ;;  %v317_v50 = vld [vmem:[#allocation5 + $0x4e8] sm:$0xff]  ;;  %v312_v55 = vld [vmem:[#allocation5 + $0x4c0] sm:$0xff] }
  0xd9   :  { %2938 = vmatprep.subr.bf16.mxu1 %v2937_v33  ;;  %v298_v33 = vld [vmem:[#allocation5 + $0x450] sm:$0xff]  ;;  %v2957_v34 = vpack.c.bf16 %v303_v27, %v299_v26  ;;  %v2769_v54 = vpack.c.bf16 %v317_v50, %v313_v49  ;;  %v316_v56 = vld [vmem:[#allocation5 + $0x4e0] sm:$0xff]  ;;  %v321_v60 = vld [vmem:[#allocation5 + $0x508] sm:$0xff] }
  0xda   :  { %v2959_v42 = vpack.c.bf16 %v302_v35, %v298_v33  ;;  %v318_v59 = vld [vmem:[#allocation5 + $0x4f0] sm:$0xff]  ;;  %v325_v62 = vld [vmem:[#allocation5 + $0x528] sm:$0xff]  ;;  %v323_v63 = vld [vmem:[#allocation5 + $0x518] sm:$0xff] }
  0xdb   :  { %2744 = vmatpush1.bf16.msra.mxu0 %v2743_v39  ;;  %v307_v39 = vld [vmem:[#allocation5 + $0x498] sm:$0xff]  ;;  %v2773_v3 = vpack.c.bf16 %v325_v62, %v321_v60  ;;  %v320_v4 = vld [vmem:[#allocation5 + $0x500] sm:$0xff]  ;;  %v326_v8 = vld [vmem:[#allocation5 + $0x530] sm:$0xff] }
  0xdc   :  { %2940 = vmatpush1.bf16.msra.mxu1 %v2939_v40  ;;  %2746 = vmatprep.subr.bf16.mxu0 %v2745_v41  ;;  %v311_v40 = vld [vmem:[#allocation5 + $0x4b8] sm:$0xff]  ;;  %v2763_v41 = vpack.c.bf16 %v300_v32, %v296_v31  ;;  %v324_v5 = vld [vmem:[#allocation5 + $0x520] sm:$0xff]  ;;  %v329_v9 = vld [vmem:[#allocation5 + $0x548] sm:$0xff] }
  0xdd   :  { %2942 = vmatprep.subr.bf16.mxu1 %v2941_v45  ;;  %v308_v45 = vld [vmem:[#allocation5 + $0x4a0] sm:$0xff]  ;;  %v2961_v47 = vpack.c.bf16 %v311_v40, %v307_v39  ;;  %v333_v10 = vld [vmem:[#allocation5 + $0x568] sm:$0xff]  ;;  %v331_v12 = vld [vmem:[#allocation5 + $0x558] sm:$0xff] }
  0xde   :  { %v335_v13 = vld [vmem:[#allocation5 + $0x578] sm:$0xff]  ;;  %v328_v17 = vld [vmem:[#allocation5 + $0x540] sm:$0xff]  ;;  %v330_v19 = vld [vmem:[#allocation5 + $0x550] sm:$0xff] }
  0xdf   :  { %2748 = vmatpush1.bf16.msra.mxu0 %v2747_v51  ;;  %v315_v51 = vld [vmem:[#allocation5 + $0x4d8] sm:$0xff]  ;;  %v332_v18 = vld [vmem:[#allocation5 + $0x560] sm:$0xff]  ;;  %v334_v21 = vld [vmem:[#allocation5 + $0x570] sm:$0xff] }
  0xe0   :  { %2944 = vmatpush1.bf16.msra.mxu1 %v2943_v52  ;;  %2750 = vmatprep.subr.bf16.mxu0 %v2749_v53  ;;  %v319_v52 = vld [vmem:[#allocation5 + $0x4f8] sm:$0xff]  ;;  %v2767_v53 = vpack.c.bf16 %v308_v45, %v304_v44  ;;  %v337_v23 = vld [vmem:[#allocation5 + $0x588] sm:$0xff]  ;;  %v336_v31 = vld [vmem:[#allocation5 + $0x580] sm:$0xff] }
  0xe1   :  { %2946 = vmatprep.subr.bf16.mxu1 %v2945_v57  ;;  %v314_v57 = vld [vmem:[#allocation5 + $0x4d0] sm:$0xff]  ;;  %v2965_v58 = vpack.c.bf16 %v319_v52, %v315_v51  ;;  %v341_v24 = vld [vmem:[#allocation5 + $0x5a8] sm:$0xff]  ;;  %v339_v26 = vld [vmem:[#allocation5 + $0x598] sm:$0xff] }
  0xe2   :  { %v343_v27 = vld [vmem:[#allocation5 + $0x5b8] sm:$0xff]  ;;  %v340_v32 = vld [vmem:[#allocation5 + $0x5a0] sm:$0xff]  ;;  %v338_v33 = vld [vmem:[#allocation5 + $0x590] sm:$0xff] }
  0xe3   :  { %2752 = vmatpush1.bf16.msra.mxu0 %v2751_v0  ;;  %v327_v0 = vld [vmem:[#allocation5 + $0x538] sm:$0xff]  ;;  %v342_v35 = vld [vmem:[#allocation5 + $0x5b0] sm:$0xff]  ;;  %v345_v36 = vld [vmem:[#allocation5 + $0x5c8] sm:$0xff]  ;;  %v2783_v40 = vpack.c.bf16 %v340_v32, %v336_v31 }
  0xe4   :  { %2948 = vmatpush1.bf16.msra.mxu1 %v2947_v1  ;;  %2754 = vmatprep.subr.bf16.mxu0 %v2753_v2  ;;  %v2771_v1 = vpack.c.bf16 %v316_v56, %v312_v55  ;;  %v2967_v2 = vpack.c.bf16 %v318_v59, %v314_v57  ;;  %v2969_v7 = vpack.c.bf16 %v327_v0, %v323_v63  ;;  %v349_v37 = vld [vmem:[#allocation5 + $0x5e8] sm:$0xff]  ;;  %v351_v39 = vld [vmem:[#allocation5 + $0x5f8] sm:$0xff]  ;;  %v348_v44 = vld [vmem:[#allocation5 + $0x5e0] sm:$0xff] }
  0xe5   :  { %2950 = vmatprep.subr.bf16.mxu1 %v2949_v6  ;;  %v322_v6 = vld [vmem:[#allocation5 + $0x510] sm:$0xff]  ;;  %v357_v49 = vld [vmem:[#allocation5 + $0x628] sm:$0xff]  ;;  %v355_v50 = vld [vmem:[#allocation5 + $0x618] sm:$0xff] }
  0xe6   :  { %v346_v45 = vld [vmem:[#allocation5 + $0x5d0] sm:$0xff]  ;;  %v359_v51 = vld [vmem:[#allocation5 + $0x638] sm:$0xff]  ;;  %v356_v55 = vld [vmem:[#allocation5 + $0x620] sm:$0xff] }
  0xe7   :  { %2756 = vmatpush1.bf16.msra.mxu0 %v2755_v14  ;;  %v2775_v14 = vpack.c.bf16 %v324_v5, %v320_v4  ;;  %v354_v56 = vld [vmem:[#allocation5 + $0x610] sm:$0xff]  ;;  %v2985_v57 = vpack.c.bf16 %v359_v51, %v355_v50  ;;  %v361_v59 = vld [vmem:[#allocation5 + $0x648] sm:$0xff]  ;;  %v363_v62 = vld [vmem:[#allocation5 + $0x658] sm:$0xff] }
  0xe8   :  { %2952 = vmatpush1.bf16.msra.mxu1 %v2951_v15  ;;  %2758 = vmatprep.subr.bf16.mxu0 %v2757_v16  ;;  %v2971_v15 = vpack.c.bf16 %v326_v8, %v322_v6  ;;  %v2777_v16 = vpack.c.bf16 %v333_v10, %v329_v9  ;;  %v365_v60 = vld [vmem:[#allocation5 + $0x668] sm:$0xff]  ;;  %v367_v63 = vld [vmem:[#allocation5 + $0x678] sm:$0xff]  ;;  %v364_v4 = vld [vmem:[#allocation5 + $0x660] sm:$0xff] }
  0xe9   :  { %2954 = vmatprep.subr.bf16.mxu1 %v2953_v20  ;;  %v2973_v20 = vpack.c.bf16 %v335_v13, %v331_v12  ;;  %v362_v5 = vld [vmem:[#allocation5 + $0x650] sm:$0xff]  ;;  %v2989_v6 = vpack.c.bf16 %v367_v63, %v363_v62  ;;  %v369_v8 = vld [vmem:[#allocation5 + $0x688] sm:$0xff]  ;;  %v371_v10 = vld [vmem:[#allocation5 + $0x698] sm:$0xff] }
  0xea   :  { %683 = vmatmul.mubr.f32.vlgmr.msra.gmra.mrb[0].mxu0 %v4157_v25  ;;  %v373_v9 = vld [vmem:[#allocation5 + $0x6a8] sm:$0xff]  ;;  %v375_v12 = vld [vmem:[#allocation5 + $0x6b8] sm:$0xff]  ;;  %v380_v31 = vld [vmem:[#allocation5 + $0x6e0] sm:$0xff] }
  0xeb   :  { %2760 = vmatpush1.bf16.msra.mxu0 %v2759_v28  ;;  %967 = vmatmul.mubr.f32.vlgmr.msra.gmra.mrb[0].mxu1 %v4157_v25  ;;  %v2963_v25 = vpack.c.bf16 %v310_v48, %v306_v46  ;;  %v2779_v28 = vpack.c.bf16 %v332_v18, %v328_v17  ;;  %v353_v48 = vld [vmem:[#allocation5 + $0x608] sm:$0xff]  ;;  %v372_v17 = vld [vmem:[#allocation5 + $0x6a0] sm:$0xff]  ;;  %v370_v18 = vld [vmem:[#allocation5 + $0x690] sm:$0xff] }
  0xec   :  { %2956 = vmatpush1.bf16.msra.mxu1 %v2955_v29  ;;  %2762 = vmatprep.subr.bf16.mxu0 %v2761_v30  ;;  %v2975_v29 = vpack.c.bf16 %v334_v21, %v330_v19  ;;  %v2781_v30 = vpack.c.bf16 %v341_v24, %v337_v23  ;;  %v2993_v19 = vpack.c.bf16 %v375_v12, %v371_v10  ;;  %v377_v21 = vld [vmem:[#allocation5 + $0x6c8] sm:$0xff]  ;;  %v379_v24 = vld [vmem:[#allocation5 + $0x6d8] sm:$0xff]  ;;  %v378_v32 = vld [vmem:[#allocation5 + $0x6d0] sm:$0xff] }
  0xed   :  { %2958 = vmatprep.subr.bf16.mxu1 %v2957_v34  ;;  %753 = vmatprep.mubr.f32.mxu0 %v592_v38  ;;  %v2977_v34 = vpack.c.bf16 %v343_v27, %v339_v26  ;;  %v381_v23 = vld [vmem:[#allocation5 + $0x6e8] sm:$0xff]  ;;  %v383_v26 = vld [vmem:[#allocation5 + $0x6f8] sm:$0xff] }
  0xee   :  { %1037 = vmatprep.mubr.f32.mxu1 %v592_v38  ;;  %v347_v38 = vld [vmem:[#allocation5 + $0x5d8] sm:$0xff] }
  0xef   :  { %2764 = vmatpush1.bf16.msra.mxu0 %v2763_v41  ;;  %v2979_v41 = vpack.c.bf16 %v342_v35, %v338_v33  ;;  %v2981_v46 = vpack.c.bf16 %v351_v39, %v347_v38  ;;  %v2997_v33 = vpack.c.bf16 %v383_v26, %v379_v24  ;;  %v385_v35 = vld [vmem:[#allocation5 + $0x708] sm:$0xff]  ;;  %v391_v38 = vld [vmem:[#allocation5 + $0x738] sm:$0xff] }
  0xf0   :  { %2960 = vmatpush1.bf16.msra.mxu1 %v2959_v42  ;;  %2766 = vmatprep.subr.bf16.mxu0 %v2765_v43  ;;  %v2785_v42 = vpack.c.bf16 %v349_v37, %v345_v36  ;;  %v344_v43 = vld [vmem:[#allocation5 + $0x5c0] sm:$0xff]  ;;  %v389_v36 = vld [vmem:[#allocation5 + $0x728] sm:$0xff]  ;;  %v387_v37 = vld [vmem:[#allocation5 + $0x718] sm:$0xff] }
  0xf1   :  { %2962 = vmatprep.subr.bf16.mxu1 %v2961_v47  ;;  %v350_v47 = vld [vmem:[#allocation5 + $0x5f0] sm:$0xff]  ;;  %v2787_v52 = vpack.c.bf16 %v348_v44, %v344_v43  ;;  %v388_v43 = vld [vmem:[#allocation5 + $0x720] sm:$0xff]  ;;  %v399_v50 = vld [vmem:[#allocation5 + $0x778] sm:$0xff] }
  0xf2   :  { %v386_v44 = vld [vmem:[#allocation5 + $0x710] sm:$0xff]  ;;  %v407_v62 = vld [vmem:[#allocation5 + $0x7b8] sm:$0xff] }
  0xf3   :  { %2768 = vmatpush1.bf16.msra.mxu0 %v2767_v53  ;;  %v2983_v53 = vpack.c.bf16 %v350_v47, %v346_v45  ;;  %v3001_v45 = vpack.c.bf16 %v391_v38, %v387_v37  ;;  %v393_v47 = vld [vmem:[#allocation5 + $0x748] sm:$0xff]  ;;  %v415_v10 = vld [vmem:[#allocation5 + $0x7f8] sm:$0xff] }
  0xf4   :  { %2964 = vmatpush1.bf16.msra.mxu1 %v2963_v25  ;;  %2770 = vmatprep.subr.bf16.mxu0 %v2769_v54  ;;  %v2789_v25 = vpack.c.bf16 %v357_v49, %v353_v48  ;;  %v352_v54 = vld [vmem:[#allocation5 + $0x600] sm:$0xff]  ;;  %v397_v48 = vld [vmem:[#allocation5 + $0x768] sm:$0xff]  ;;  %v395_v49 = vld [vmem:[#allocation5 + $0x758] sm:$0xff] }
  0xf5   :  { %2966 = vmatprep.subr.bf16.mxu1 %v2965_v58  ;;  %v358_v58 = vld [vmem:[#allocation5 + $0x630] sm:$0xff]  ;;  %v2791_v0 = vpack.c.bf16 %v356_v55, %v352_v54  ;;  %v396_v54 = vld [vmem:[#allocation5 + $0x760] sm:$0xff]  ;;  %v423_v24 = vld [vmem:[#allocation5 + $0x838] sm:$0xff] }
  0xf6   :  { %v394_v55 = vld [vmem:[#allocation5 + $0x750] sm:$0xff]  ;;  %v431_v37 = vld [vmem:[#allocation5 + $0x878] sm:$0xff] }
  0xf7   :  { %2772 = vmatpush1.bf16.msra.mxu0 %v2771_v1  ;;  %v2987_v1 = vpack.c.bf16 %v358_v58, %v354_v56  ;;  %v3005_v56 = vpack.c.bf16 %v399_v50, %v395_v49  ;;  %v401_v58 = vld [vmem:[#allocation5 + $0x788] sm:$0xff]  ;;  %v435_v50 = vld [vmem:[#allocation5 + $0x898] sm:$0xff] }
  0xf8   :  { %2968 = vmatpush1.bf16.msra.mxu1 %v2967_v2  ;;  %2774 = vmatprep.subr.bf16.mxu0 %v2773_v3  ;;  %v2793_v2 = vpack.c.bf16 %v365_v60, %v361_v59  ;;  %v360_v3 = vld [vmem:[#allocation5 + $0x640] sm:$0xff]  ;;  %v405_v59 = vld [vmem:[#allocation5 + $0x7a8] sm:$0xff]  ;;  %v403_v60 = vld [vmem:[#allocation5 + $0x798] sm:$0xff] }
  0xf9   :  { %2970 = vmatprep.subr.bf16.mxu1 %v2969_v7  ;;  %v366_v7 = vld [vmem:[#allocation5 + $0x670] sm:$0xff]  ;;  %v2795_v13 = vpack.c.bf16 %v364_v4, %v360_v3  ;;  %v404_v3 = vld [vmem:[#allocation5 + $0x7a0] sm:$0xff]  ;;  %v437_v49 = vld [vmem:[#allocation5 + $0x8a8] sm:$0xff] }
  0xfa   :  { %v402_v4 = vld [vmem:[#allocation5 + $0x790] sm:$0xff] }
  0xfb   :  { %2776 = vmatpush1.bf16.msra.mxu0 %v2775_v14  ;;  %v2991_v14 = vpack.c.bf16 %v366_v7, %v362_v5  ;;  %v3009_v5 = vpack.c.bf16 %v407_v62, %v403_v60  ;;  %v409_v7 = vld [vmem:[#allocation5 + $0x7c8] sm:$0xff] }
  0xfc   :  { %2972 = vmatpush1.bf16.msra.mxu1 %v2971_v15  ;;  %2778 = vmatprep.subr.bf16.mxu0 %v2777_v16  ;;  %v2797_v15 = vpack.c.bf16 %v373_v9, %v369_v8  ;;  %v368_v16 = vld [vmem:[#allocation5 + $0x680] sm:$0xff]  ;;  %v413_v8 = vld [vmem:[#allocation5 + $0x7e8] sm:$0xff]  ;;  %v411_v9 = vld [vmem:[#allocation5 + $0x7d8] sm:$0xff] }
  0xfd   :  { %2974 = vmatprep.subr.bf16.mxu1 %v2973_v20  ;;  %v374_v20 = vld [vmem:[#allocation5 + $0x6b0] sm:$0xff]  ;;  %v2799_v27 = vpack.c.bf16 %v372_v17, %v368_v16  ;;  %v412_v16 = vld [vmem:[#allocation5 + $0x7e0] sm:$0xff]  ;;  %v441_v60 = vld [vmem:[#allocation5 + $0x8c8] sm:$0xff] }
  0xfe   :  { %v410_v17 = vld [vmem:[#allocation5 + $0x7d0] sm:$0xff]  ;;  %v445_v62 = vld [vmem:[#allocation5 + $0x8e8] sm:$0xff] }
  0xff   :  { %2780 = vmatpush1.bf16.msra.mxu0 %v2779_v28  ;;  %v2995_v28 = vpack.c.bf16 %v374_v20, %v370_v18  ;;  %v3013_v18 = vpack.c.bf16 %v415_v10, %v411_v9  ;;  %v417_v20 = vld [vmem:[#allocation5 + $0x808] sm:$0xff]  ;;  %v451_v10 = vld [vmem:[#allocation5 + $0x918] sm:$0xff] }
 0x100   :  { %2976 = vmatpush1.bf16.msra.mxu1 %v2975_v29  ;;  %2782 = vmatprep.subr.bf16.mxu0 %v2781_v30  ;;  %v2801_v29 = vpack.c.bf16 %v381_v23, %v377_v21  ;;  %v376_v30 = vld [vmem:[#allocation5 + $0x6c0] sm:$0xff]  ;;  %v421_v21 = vld [vmem:[#allocation5 + $0x828] sm:$0xff]  ;;  %v419_v23 = vld [vmem:[#allocation5 + $0x818] sm:$0xff] }
 0x101   :  { %2978 = vmatprep.subr.bf16.mxu1 %v2977_v34  ;;  %v382_v34 = vld [vmem:[#allocation5 + $0x6f0] sm:$0xff]  ;;  %v2803_v39 = vpack.c.bf16 %v380_v31, %v376_v30  ;;  %v420_v30 = vld [vmem:[#allocation5 + $0x820] sm:$0xff]  ;;  %v453_v9 = vld [vmem:[#allocation5 + $0x928] sm:$0xff] }
 0x102   :  { %v418_v31 = vld [vmem:[#allocation5 + $0x810] sm:$0xff] }
 0x103   :  { %2784 = vmatpush1.bf16.msra.mxu0 %v2783_v40  ;;  %v2999_v40 = vpack.c.bf16 %v382_v34, %v378_v32  ;;  %v3017_v32 = vpack.c.bf16 %v423_v24, %v419_v23  ;;  %v425_v34 = vld [vmem:[#allocation5 + $0x848] sm:$0xff]  ;;  %v459_v24 = vld [vmem:[#allocation5 + $0x958] sm:$0xff] }
 0x104   :  { %2980 = vmatpush1.bf16.msra.mxu1 %v2979_v41  ;;  %2786 = vmatprep.subr.bf16.mxu0 %v2785_v42  ;;  %v2805_v41 = vpack.c.bf16 %v389_v36, %v385_v35  ;;  %v384_v42 = vld [vmem:[#allocation5 + $0x700] sm:$0xff]  ;;  %v429_v35 = vld [vmem:[#allocation5 + $0x868] sm:$0xff]  ;;  %v427_v36 = vld [vmem:[#allocation5 + $0x858] sm:$0xff] }
 0x105   :  { %2982 = vmatprep.subr.bf16.mxu1 %v2981_v46  ;;  %v390_v46 = vld [vmem:[#allocation5 + $0x730] sm:$0xff]  ;;  %v2807_v51 = vpack.c.bf16 %v388_v43, %v384_v42  ;;  %v424_v42 = vld [vmem:[#allocation5 + $0x840] sm:$0xff]  ;;  %v461_v23 = vld [vmem:[#allocation5 + $0x968] sm:$0xff] }
 0x106   :  { %v428_v43 = vld [vmem:[#allocation5 + $0x860] sm:$0xff] }
 0x107   :  { %2788 = vmatpush1.bf16.msra.mxu0 %v2787_v52  ;;  %v3003_v52 = vpack.c.bf16 %v390_v46, %v386_v44  ;;  %v426_v44 = vld [vmem:[#allocation5 + $0x850] sm:$0xff]  ;;  %v3021_v46 = vpack.c.bf16 %v431_v37, %v427_v36  ;;  %v469_v36 = vld [vmem:[#allocation5 + $0x9a8] sm:$0xff]  ;;  %v467_v37 = vld [vmem:[#allocation5 + $0x998] sm:$0xff] }
 0x108   :  { %2984 = vmatpush1.bf16.msra.mxu1 %v2983_v53  ;;  %2790 = vmatprep.subr.bf16.mxu0 %v2789_v25  ;;  %v2809_v53 = vpack.c.bf16 %v397_v48, %v393_v47  ;;  %v392_v25 = vld [vmem:[#allocation5 + $0x740] sm:$0xff]  ;;  %v430_v47 = vld [vmem:[#allocation5 + $0x870] sm:$0xff]  ;;  %v433_v48 = vld [vmem:[#allocation5 + $0x888] sm:$0xff] }
 0x109   :  { %2986 = vmatprep.subr.bf16.mxu1 %v2985_v57  ;;  %v398_v57 = vld [vmem:[#allocation5 + $0x770] sm:$0xff]  ;;  %v2811_v63 = vpack.c.bf16 %v396_v54, %v392_v25  ;;  %v3023_v25 = vpack.c.bf16 %v430_v47, %v426_v44  ;;  %v2829_v54 = vpack.c.bf16 %v437_v49, %v433_v48  ;;  %v468_v44 = vld [vmem:[#allocation5 + $0x9a0] sm:$0xff]  ;;  %v473_v49 = vld [vmem:[#allocation5 + $0x9c8] sm:$0xff] }
 0x10a   :  { %v470_v48 = vld [vmem:[#allocation5 + $0x9b0] sm:$0xff] }
 0x10b   :  { %2792 = vmatpush1.bf16.msra.mxu0 %v2791_v0  ;;  %v3007_v0 = vpack.c.bf16 %v398_v57, %v394_v55  ;;  %v432_v55 = vld [vmem:[#allocation5 + $0x880] sm:$0xff]  ;;  %v434_v57 = vld [vmem:[#allocation5 + $0x890] sm:$0xff] }
 0x10c   :  { %2988 = vmatpush1.bf16.msra.mxu1 %v2987_v1  ;;  %2794 = vmatprep.subr.bf16.mxu0 %v2793_v2  ;;  %v2813_v1 = vpack.c.bf16 %v405_v59, %v401_v58  ;;  %v400_v2 = vld [vmem:[#allocation5 + $0x780] sm:$0xff]  ;;  %v438_v59 = vld [vmem:[#allocation5 + $0x8b0] sm:$0xff] }
 0x10d   :  { %2990 = vmatprep.subr.bf16.mxu1 %v2989_v6  ;;  %v406_v6 = vld [vmem:[#allocation5 + $0x7b0] sm:$0xff]  ;;  %v2815_v12 = vpack.c.bf16 %v404_v3, %v400_v2  ;;  %v2833_v2 = vpack.c.bf16 %v445_v62, %v441_v60  ;;  %v440_v3 = vld [vmem:[#allocation5 + $0x8c0] sm:$0xff]  ;;  %v481_v60 = vld [vmem:[#allocation5 + $0xa08] sm:$0xff] }
 0x10e   :  { %v485_v62 = vld [vmem:[#allocation5 + $0xa28] sm:$0xff] }
 0x10f   :  { %2796 = vmatpush1.bf16.msra.mxu0 %v2795_v13  ;;  %v3011_v13 = vpack.c.bf16 %v406_v6, %v402_v4  ;;  %v444_v4 = vld [vmem:[#allocation5 + $0x8e0] sm:$0xff] }
 0x110   :  { %2992 = vmatpush1.bf16.msra.mxu1 %v2991_v14  ;;  %2798 = vmatprep.subr.bf16.mxu0 %v2797_v15  ;;  %v2817_v14 = vpack.c.bf16 %v413_v8, %v409_v7  ;;  %v408_v15 = vld [vmem:[#allocation5 + $0x7c0] sm:$0xff]  ;;  %v446_v7 = vld [vmem:[#allocation5 + $0x8f0] sm:$0xff]  ;;  %v449_v8 = vld [vmem:[#allocation5 + $0x908] sm:$0xff] }
 0x111   :  { %2994 = vmatprep.subr.bf16.mxu1 %v2993_v19  ;;  %v414_v19 = vld [vmem:[#allocation5 + $0x7f0] sm:$0xff]  ;;  %v2819_v26 = vpack.c.bf16 %v412_v16, %v408_v15  ;;  %v2837_v15 = vpack.c.bf16 %v453_v9, %v449_v8  ;;  %v448_v16 = vld [vmem:[#allocation5 + $0x900] sm:$0xff]  ;;  %v489_v8 = vld [vmem:[#allocation5 + $0xa48] sm:$0xff] }
 0x112   :  { %v493_v9 = vld [vmem:[#allocation5 + $0xa68] sm:$0xff] }
 0x113   :  { %2800 = vmatpush1.bf16.msra.mxu0 %v2799_v27  ;;  %v3015_v27 = vpack.c.bf16 %v414_v19, %v410_v17  ;;  %v452_v17 = vld [vmem:[#allocation5 + $0x920] sm:$0xff] }
 0x114   :  { %2996 = vmatpush1.bf16.msra.mxu1 %v2995_v28  ;;  %2802 = vmatprep.subr.bf16.mxu0 %v2801_v29  ;;  %v2821_v28 = vpack.c.bf16 %v421_v21, %v417_v20  ;;  %v416_v29 = vld [vmem:[#allocation5 + $0x800] sm:$0xff]  ;;  %v454_v20 = vld [vmem:[#allocation5 + $0x930] sm:$0xff]  ;;  %v457_v21 = vld [vmem:[#allocation5 + $0x948] sm:$0xff] }
 0x115   :  { %2998 = vmatprep.subr.bf16.mxu1 %v2997_v33  ;;  %v422_v33 = vld [vmem:[#allocation5 + $0x830] sm:$0xff]  ;;  %v2823_v38 = vpack.c.bf16 %v420_v30, %v416_v29  ;;  %v2841_v29 = vpack.c.bf16 %v461_v23, %v457_v21  ;;  %v456_v30 = vld [vmem:[#allocation5 + $0x940] sm:$0xff]  ;;  %v497_v21 = vld [vmem:[#allocation5 + $0xa88] sm:$0xff] }
 0x116   :  { %v501_v23 = vld [vmem:[#allocation5 + $0xaa8] sm:$0xff] }
 0x117   :  { %2804 = vmatpush1.bf16.msra.mxu0 %v2803_v39  ;;  %v4173_v39 = vld [vmem:[%s5721_s9 + $0x8] sm:$0x3f] }
 0x118   :  { %3000 = vmatpush1.bf16.msra.mxu1 %v2999_v40  ;;  %2806 = vmatprep.subr.bf16.mxu0 %v2805_v41  ;;  %v3019_v40 = vpack.c.bf16 %v422_v33, %v418_v31  ;;  %v2825_v41 = vpack.c.bf16 %v429_v35, %v425_v34  ;;  %v460_v31 = vld [vmem:[#allocation5 + $0x960] sm:$0xff]  ;;  %v462_v34 = vld [vmem:[#allocation5 + $0x970] sm:$0xff]  ;;  %v465_v35 = vld [vmem:[#allocation5 + $0x988] sm:$0xff] }
 0x119   :  { %3002 = vmatprep.subr.bf16.mxu1 %v3001_v45  ;;  %v4177_v45 = vrot.slane %v4173_v39, %v4148_v11 }
 0x11b   :  { %2808 = vmatpush1.bf16.msra.mxu0 %v2807_v51  ;;  %v439_v51 = vld [vmem:[#allocation5 + $0x8b8] sm:$0xff] }
 0x11c   :  { %3004 = vmatpush1.bf16.msra.mxu1 %v3003_v52  ;;  %2810 = vmatprep.subr.bf16.mxu0 %v2809_v53  ;;  %v608_v52 = vcombine.high %v4177_v45, %v4177_v45  ;;  %v2827_v53 = vpack.c.bf16 %v428_v43, %v424_v42  ;;  %v3025_v58 = vpack.c.bf16 %v439_v51, %v435_v50  ;;  %v464_v43 = vld [vmem:[#allocation5 + $0x980] sm:$0xff]  ;;  %v477_v50 = vld [vmem:[#allocation5 + $0x9e8] sm:$0xff]  ;;  %v475_v51 = vld [vmem:[#allocation5 + $0x9d8] sm:$0xff] }
 0x11d   :  { %3006 = vmatprep.subr.bf16.mxu1 %v3005_v56  ;;  %v436_v56 = vld [vmem:[#allocation5 + $0x8a0] sm:$0xff]  ;;  %v2845_v42 = vpack.c.bf16 %v469_v36, %v465_v35  ;;  %v505_v35 = vld [vmem:[#allocation5 + $0xac8] sm:$0xff] }
 0x11e   :  { %v509_v36 = vld [vmem:[#allocation5 + $0xae8] sm:$0xff] }
 0x11f   :  { %2812 = vmatpush1.bf16.msra.mxu0 %v2811_v63  ;;  %v443_v63 = vld [vmem:[#allocation5 + $0x8d8] sm:$0xff] }
 0x120   :  { %3008 = vmatpush1.bf16.msra.mxu1 %v3007_v0  ;;  %2814 = vmatprep.subr.bf16.mxu0 %v2813_v1  ;;  %v447_v0 = vld [vmem:[#allocation5 + $0x8f8] sm:$0xff]  ;;  %v2831_v1 = vpack.c.bf16 %v436_v56, %v432_v55  ;;  %v472_v55 = vld [vmem:[#allocation5 + $0x9c0] sm:$0xff] }
 0x121   :  { %3010 = vmatprep.subr.bf16.mxu1 %v3009_v5  ;;  %v442_v5 = vld [vmem:[#allocation5 + $0x8d0] sm:$0xff]  ;;  %v3029_v6 = vpack.c.bf16 %v447_v0, %v443_v63  ;;  %v476_v56 = vld [vmem:[#allocation5 + $0x9e0] sm:$0xff]  ;;  %v483_v63 = vld [vmem:[#allocation5 + $0xa18] sm:$0xff] }
 0x122   :  { %v487_v0 = vld [vmem:[#allocation5 + $0xa38] sm:$0xff] }
 0x123   :  { %2816 = vmatpush1.bf16.msra.mxu0 %v2815_v12  ;;  %v455_v12 = vld [vmem:[#allocation5 + $0x938] sm:$0xff] }
 0x124   :  { %3012 = vmatpush1.bf16.msra.mxu1 %v3011_v13  ;;  %2818 = vmatprep.subr.bf16.mxu0 %v2817_v14  ;;  %v2835_v13 = vpack.c.bf16 %v444_v4, %v440_v3  ;;  %v3031_v14 = vpack.c.bf16 %v446_v7, %v442_v5  ;;  %v3033_v19 = vpack.c.bf16 %v455_v12, %v451_v10  ;;  %v480_v3 = vld [vmem:[#allocation5 + $0xa00] sm:$0xff]  ;;  %v482_v5 = vld [vmem:[#allocation5 + $0xa10] sm:$0xff]  ;;  %v491_v10 = vld [vmem:[#allocation5 + $0xa58] sm:$0xff] }
 0x125   :  { %3014 = vmatprep.subr.bf16.mxu1 %v3013_v18  ;;  %v450_v18 = vld [vmem:[#allocation5 + $0x910] sm:$0xff]  ;;  %v484_v4 = vld [vmem:[#allocation5 + $0xa20] sm:$0xff]  ;;  %v495_v12 = vld [vmem:[#allocation5 + $0xa78] sm:$0xff] }
 0x126   :  { %v486_v7 = vld [vmem:[#allocation5 + $0xa30] sm:$0xff] }
 0x127   :  { %2820 = vmatpush1.bf16.msra.mxu0 %v2819_v26  ;;  %v463_v26 = vld [vmem:[#allocation5 + $0x978] sm:$0xff] }
 0x128   :  { %3016 = vmatpush1.bf16.msra.mxu1 %v3015_v27  ;;  %2822 = vmatprep.subr.bf16.mxu0 %v2821_v28  ;;  %v2839_v27 = vpack.c.bf16 %v452_v17, %v448_v16  ;;  %v3035_v28 = vpack.c.bf16 %v454_v20, %v450_v18  ;;  %v3037_v33 = vpack.c.bf16 %v463_v26, %v459_v24  ;;  %v488_v16 = vld [vmem:[#allocation5 + $0xa40] sm:$0xff]  ;;  %v490_v18 = vld [vmem:[#allocation5 + $0xa50] sm:$0xff]  ;;  %v499_v24 = vld [vmem:[#allocation5 + $0xa98] sm:$0xff] }
 0x129   :  { %3018 = vmatprep.subr.bf16.mxu1 %v3017_v32  ;;  %v458_v32 = vld [vmem:[#allocation5 + $0x950] sm:$0xff]  ;;  %v492_v17 = vld [vmem:[#allocation5 + $0xa60] sm:$0xff]  ;;  %v503_v26 = vld [vmem:[#allocation5 + $0xab8] sm:$0xff] }
 0x12a   :  { %754 = vmatmul.mubr.f32.vlgmr.msra.gmra.mrb[0].mxu0 %v4164_v22  ;;  %v494_v20 = vld [vmem:[#allocation5 + $0xa70] sm:$0xff] }
 0x12b   :  { %2824 = vmatpush1.bf16.msra.mxu0 %v2823_v38  ;;  %1038 = vmatmul.mubr.f32.vlgmr.msra.gmra.mrb[0].mxu1 %v4164_v22  ;;  %v3027_v22 = vpack.c.bf16 %v438_v59, %v434_v57  ;;  %v471_v38 = vld [vmem:[#allocation5 + $0x9b8] sm:$0xff]  ;;  %v474_v57 = vld [vmem:[#allocation5 + $0x9d0] sm:$0xff] }
 0x12c   :  { %3020 = vmatpush1.bf16.msra.mxu1 %v3019_v40  ;;  %2826 = vmatprep.subr.bf16.mxu0 %v2825_v41  ;;  %v2843_v40 = vpack.c.bf16 %v460_v31, %v456_v30  ;;  %v3039_v41 = vpack.c.bf16 %v462_v34, %v458_v32  ;;  %v3041_v47 = vpack.c.bf16 %v471_v38, %v467_v37  ;;  %v478_v59 = vld [vmem:[#allocation5 + $0x9f0] sm:$0xff]  ;;  %v496_v30 = vld [vmem:[#allocation5 + $0xa80] sm:$0xff]  ;;  %v507_v37 = vld [vmem:[#allocation5 + $0xad8] sm:$0xff] }
 0x12d   :  { %3022 = vmatprep.subr.bf16.mxu1 %v3021_v46  ;;  %824 = vmatprep.mubr.f32.mxu0 %v608_v52  ;;  %v466_v46 = vld [vmem:[#allocation5 + $0x990] sm:$0xff]  ;;  %v500_v31 = vld [vmem:[#allocation5 + $0xaa0] sm:$0xff]  ;;  %v511_v38 = vld [vmem:[#allocation5 + $0xaf8] sm:$0xff] }
 0x12e   :  { %1108 = vmatprep.mubr.f32.mxu1 %v608_v52  ;;  %v479_v52 = vld [vmem:[#allocation5 + $0x9f8] sm:$0xff]  ;;  %v498_v32 = vld [vmem:[#allocation5 + $0xa90] sm:$0xff] }
 0x12f   :  { %2828 = vmatpush1.bf16.msra.mxu0 %v2827_v53  ;;  %v2847_v53 = vpack.c.bf16 %v468_v44, %v464_v43  ;;  %v502_v34 = vld [vmem:[#allocation5 + $0xab0] sm:$0xff]  ;;  %v504_v43 = vld [vmem:[#allocation5 + $0xac0] sm:$0xff] }
 0x130   :  { %3024 = vmatpush1.bf16.msra.mxu1 %v3023_v25  ;;  %2830 = vmatprep.subr.bf16.mxu0 %v2829_v54  ;;  %v3043_v25 = vpack.c.bf16 %v470_v48, %v466_v46  ;;  %v2849_v54 = vpack.c.bf16 %v477_v50, %v473_v49  ;;  %v508_v44 = vld [vmem:[#allocation5 + $0xae0] sm:$0xff]  ;;  %v506_v46 = vld [vmem:[#allocation5 + $0xad0] sm:$0xff]  ;;  %v513_v49 = vld [vmem:[#allocation5 + $0xb08] sm:$0xff] }
 0x131   :  { %3026 = vmatprep.subr.bf16.mxu1 %v3025_v58  ;;  %v3045_v58 = vpack.c.bf16 %v479_v52, %v475_v51  ;;  %v510_v48 = vld [vmem:[#allocation5 + $0xaf0] sm:$0xff]  ;;  %v517_v50 = vld [vmem:[#allocation5 + $0xb28] sm:$0xff]  ;;  %v515_v51 = vld [vmem:[#allocation5 + $0xb18] sm:$0xff] }
 0x132   :  { %v519_v52 = vld [vmem:[#allocation5 + $0xb38] sm:$0xff] }
 0x133   :  { %2832 = vmatpush1.bf16.msra.mxu0 %v2831_v1  ;;  %v2851_v1 = vpack.c.bf16 %v476_v56, %v472_v55  ;;  %v512_v55 = vld [vmem:[#allocation5 + $0xb00] sm:$0xff] }
 0x134   :  { %3028 = vmatpush1.bf16.msra.mxu1 %v3027_v22  ;;  %2834 = vmatprep.subr.bf16.mxu0 %v2833_v2  ;;  %v3047_v22 = vpack.c.bf16 %v478_v59, %v474_v57  ;;  %v2853_v2 = vpack.c.bf16 %v485_v62, %v481_v60  ;;  %v516_v56 = vld [vmem:[#allocation5 + $0xb20] sm:$0xff]  ;;  %v514_v57 = vld [vmem:[#allocation5 + $0xb10] sm:$0xff]  ;;  %v521_v60 = vld [vmem:[#allocation5 + $0xb48] sm:$0xff] }
 0x135   :  { %3030 = vmatprep.subr.bf16.mxu1 %v3029_v6  ;;  %v3049_v6 = vpack.c.bf16 %v487_v0, %v483_v63  ;;  %v518_v59 = vld [vmem:[#allocation5 + $0xb30] sm:$0xff]  ;;  %v525_v62 = vld [vmem:[#allocation5 + $0xb68] sm:$0xff]  ;;  %v523_v63 = vld [vmem:[#allocation5 + $0xb58] sm:$0xff] }
 0x136   :  { %v527_v0 = vld [vmem:[#allocation5 + $0xb78] sm:$0xff] }
 0x137   :  { %2836 = vmatpush1.bf16.msra.mxu0 %v2835_v13  ;;  %v2855_v13 = vpack.c.bf16 %v484_v4, %v480_v3  ;;  %v520_v3 = vld [vmem:[#allocation5 + $0xb40] sm:$0xff] }
 0x138   :  { %3032 = vmatpush1.bf16.msra.mxu1 %v3031_v14  ;;  %2838 = vmatprep.subr.bf16.mxu0 %v2837_v15  ;;  %v3051_v14 = vpack.c.bf16 %v486_v7, %v482_v5  ;;  %v2857_v15 = vpack.c.bf16 %v493_v9, %v489_v8  ;;  %v524_v4 = vld [vmem:[#allocation5 + $0xb60] sm:$0xff]  ;;  %v522_v5 = vld [vmem:[#allocation5 + $0xb50] sm:$0xff]  ;;  %v529_v8 = vld [vmem:[#allocation5 + $0xb88] sm:$0xff] }
 0x139   :  { %3034 = vmatprep.subr.bf16.mxu1 %v3033_v19  ;;  %v3053_v19 = vpack.c.bf16 %v495_v12, %v491_v10  ;;  %v526_v7 = vld [vmem:[#allocation5 + $0xb70] sm:$0xff]  ;;  %v533_v9 = vld [vmem:[#allocation5 + $0xba8] sm:$0xff]  ;;  %v531_v10 = vld [vmem:[#allocation5 + $0xb98] sm:$0xff] }
 0x13a   :  { %v535_v12 = vld [vmem:[#allocation5 + $0xbb8] sm:$0xff] }
 0x13b   :  { %2840 = vmatpush1.bf16.msra.mxu0 %v2839_v27  ;;  %v2859_v27 = vpack.c.bf16 %v492_v17, %v488_v16  ;;  %v528_v16 = vld [vmem:[#allocation5 + $0xb80] sm:$0xff] }
 0x13c   :  { %3036 = vmatpush1.bf16.msra.mxu1 %v3035_v28  ;;  %2842 = vmatprep.subr.bf16.mxu0 %v2841_v29  ;;  %v3055_v28 = vpack.c.bf16 %v494_v20, %v490_v18  ;;  %v2861_v29 = vpack.c.bf16 %v501_v23, %v497_v21  ;;  %v532_v17 = vld [vmem:[#allocation5 + $0xba0] sm:$0xff]  ;;  %v530_v18 = vld [vmem:[#allocation5 + $0xb90] sm:$0xff]  ;;  %v537_v21 = vld [vmem:[#allocation5 + $0xbc8] sm:$0xff] }
 0x13d   :  { %3038 = vmatprep.subr.bf16.mxu1 %v3037_v33  ;;  %v3057_v33 = vpack.c.bf16 %v503_v26, %v499_v24  ;;  %v534_v20 = vld [vmem:[#allocation5 + $0xbb0] sm:$0xff]  ;;  %v541_v23 = vld [vmem:[#allocation5 + $0xbe8] sm:$0xff]  ;;  %v539_v24 = vld [vmem:[#allocation5 + $0xbd8] sm:$0xff] }
 0x13e   :  { %v543_v26 = vld [vmem:[#allocation5 + $0xbf8] sm:$0xff] }
 0x13f   :  { %2844 = vmatpush1.bf16.msra.mxu0 %v2843_v40  ;;  %v2863_v40 = vpack.c.bf16 %v500_v31, %v496_v30  ;;  %v536_v30 = vld [vmem:[#allocation5 + $0xbc0] sm:$0xff] }
 0x140   :  { %3040 = vmatpush1.bf16.msra.mxu1 %v3039_v41  ;;  %2846 = vmatprep.subr.bf16.mxu0 %v2845_v42  ;;  %v3059_v41 = vpack.c.bf16 %v502_v34, %v498_v32  ;;  %v2865_v42 = vpack.c.bf16 %v509_v36, %v505_v35  ;;  %v540_v31 = vld [vmem:[#allocation5 + $0xbe0] sm:$0xff]  ;;  %v538_v32 = vld [vmem:[#allocation5 + $0xbd0] sm:$0xff]  ;;  %v545_v35 = vld [vmem:[#allocation5 + $0xc08] sm:$0xff] }
 0x141   :  { %3042 = vmatprep.subr.bf16.mxu1 %v3041_v47  ;;  %v3061_v47 = vpack.c.bf16 %v511_v38, %v507_v37  ;;  %v542_v34 = vld [vmem:[#allocation5 + $0xbf0] sm:$0xff]  ;;  %v549_v36 = vld [vmem:[#allocation5 + $0xc28] sm:$0xff]  ;;  %v2883_v37 = vpack.c.bf16 %v540_v31, %v536_v30 }
 0x142   :  { %v3079_v38 = vpack.c.bf16 %v542_v34, %v538_v32  ;;  %v1216_v30 = vld [vmem:[%s5672_s4 + $0xd0] sm:$0xff]  ;;  %v1219_v31 = vld [vmem:[%s5672_s4 + $0xe8] sm:$0xff]  ;;  %v1221_v32 = vld [vmem:[%s5672_s4 + $0xf8] sm:$0xff] }
 0x143   :  { %2848 = vmatpush1.bf16.msra.mxu0 %v2847_v53  ;;  %v2867_v53 = vpack.c.bf16 %v508_v44, %v504_v43  ;;  %v547_v43 = vld [vmem:[#allocation5 + $0xc18] sm:$0xff]  ;;  %v4323_v34 = vpack.c.bf16 %v1221_v32, %v1219_v31  ;;  %v1251_v32 = vld [vmem:[%s5672_s4 + $0x1e8] sm:$0xff] }
 0x144   :  { %3044 = vmatpush1.bf16.msra.mxu1 %v3043_v25  ;;  %2850 = vmatprep.subr.bf16.mxu0 %v2849_v54  ;;  %v3063_v25 = vpack.c.bf16 %v510_v48, %v506_v46  ;;  %v2869_v54 = vpack.c.bf16 %v517_v50, %v513_v49  ;;  %v551_v44 = vld [vmem:[#allocation5 + $0xc38] sm:$0xff]  ;;  %v593_v48 = vcombine.high %v4173_v39, %v4173_v39  ;;  %v5689_v49 = vmov 0.0   ;;  %v546_v50 = vld [vmem:[#allocation5 + $0xc10] sm:$0xff] }
 0x145   :  { %3046 = vmatprep.subr.bf16.mxu1 %v3045_v58  ;;  %v3065_v58 = vpack.c.bf16 %v519_v52, %v515_v51  ;;  %v550_v51 = vld [vmem:[#allocation5 + $0xc30] sm:$0xff] }
 0x146   :  { %v1191_v52 = vld [vmem:[%s5672_s4 + $0x8] sm:$0xff]  ;;  %v607_v39 = vrot.slane %v593_v48, %v4148_v11 }
 0x147   :  { %2852 = vmatpush1.bf16.msra.mxu0 %v2851_v1  ;;  %v2871_v1 = vpack.c.bf16 %v516_v56, %v512_v55  ;;  %v1192_v55 = vld [vmem:[%s5672_s4 + $0x10] sm:$0xff]  ;;  %v1195_v56 = vld [vmem:[%s5672_s4 + $0x28] sm:$0xff] }
 0x148   :  { %3048 = vmatpush1.bf16.msra.mxu1 %v3047_v22  ;;  %2854 = vmatprep.subr.bf16.mxu0 %v2853_v2  ;;  %v3067_v22 = vpack.c.bf16 %v518_v59, %v514_v57  ;;  %v2873_v2 = vpack.c.bf16 %v525_v62, %v521_v60  ;;  %v1197_v57 = vld [vmem:[%s5672_s4 + $0x38] sm:$0xff]  ;;  %v1194_v60 = vld [vmem:[%s5672_s4 + $0x20] sm:$0xff]  ;;  %v1196_v62 = vld [vmem:[%s5672_s4 + $0x30] sm:$0xff] }
 0x149   :  { %3050 = vmatprep.subr.bf16.mxu1 %v3049_v6  ;;  %v3069_v6 = vpack.c.bf16 %v527_v0, %v523_v63  ;;  %v4214_v59 = vpack.c.bf16 %v1197_v57, %v1195_v56  ;;  %v1199_v63 = vld [vmem:[%s5672_s4 + $0x48] sm:$0xff]  ;;  %v1201_v0 = vld [vmem:[%s5672_s4 + $0x58] sm:$0xff] }
 0x14a   :  { %v1235_v56 = vld [vmem:[%s5672_s4 + $0x168] sm:$0xff]  ;;  %v1237_v57 = vld [vmem:[%s5672_s4 + $0x178] sm:$0xff] }
 0x14b   :  { %2856 = vmatpush1.bf16.msra.mxu0 %v2855_v13  ;;  %v2875_v13 = vpack.c.bf16 %v524_v4, %v520_v3  ;;  %v1200_v3 = vld [vmem:[%s5672_s4 + $0x50] sm:$0xff]  ;;  %v1203_v4 = vld [vmem:[%s5672_s4 + $0x68] sm:$0xff] }
 0x14c   :  { %3052 = vmatpush1.bf16.msra.mxu1 %v3051_v14  ;;  %2858 = vmatprep.subr.bf16.mxu0 %v2857_v15  ;;  %v3071_v14 = vpack.c.bf16 %v526_v7, %v522_v5  ;;  %v2877_v15 = vpack.c.bf16 %v533_v9, %v529_v8  ;;  %v1205_v5 = vld [vmem:[%s5672_s4 + $0x78] sm:$0xff]  ;;  %v1202_v8 = vld [vmem:[%s5672_s4 + $0x60] sm:$0xff]  ;;  %v1204_v9 = vld [vmem:[%s5672_s4 + $0x70] sm:$0xff] }
 0x14d   :  { %3054 = vmatprep.subr.bf16.mxu1 %v3053_v19  ;;  %v3073_v19 = vpack.c.bf16 %v535_v12, %v531_v10  ;;  %v4251_v7 = vpack.c.bf16 %v1205_v5, %v1203_v4  ;;  %v1207_v10 = vld [vmem:[%s5672_s4 + $0x88] sm:$0xff]  ;;  %v1209_v12 = vld [vmem:[%s5672_s4 + $0x98] sm:$0xff] }
 0x14f   :  { %2860 = vmatpush1.bf16.msra.mxu0 %v2859_v27  ;;  %v2879_v27 = vpack.c.bf16 %v532_v17, %v528_v16  ;;  %v1208_v16 = vld [vmem:[%s5672_s4 + $0x90] sm:$0xff]  ;;  %v1211_v17 = vld [vmem:[%s5672_s4 + $0xa8] sm:$0xff] }
 0x150   :  { %3056 = vmatpush1.bf16.msra.mxu1 %v3055_v28  ;;  %2862 = vmatprep.subr.bf16.mxu0 %v2861_v29  ;;  %v3075_v28 = vpack.c.bf16 %v534_v20, %v530_v18  ;;  %v2881_v29 = vpack.c.bf16 %v541_v23, %v537_v21  ;;  %v1213_v18 = vld [vmem:[%s5672_s4 + $0xb8] sm:$0xff]  ;;  %v1210_v21 = vld [vmem:[%s5672_s4 + $0xa0] sm:$0xff]  ;;  %v1212_v23 = vld [vmem:[%s5672_s4 + $0xb0] sm:$0xff] }
 0x151   :  { %3058 = vmatprep.subr.bf16.mxu1 %v3057_v33  ;;  %v3077_v33 = vpack.c.bf16 %v543_v26, %v539_v24  ;;  %v4287_v20 = vpack.c.bf16 %v1213_v18, %v1211_v17  ;;  %v1215_v24 = vld [vmem:[%s5672_s4 + $0xc8] sm:$0xff]  ;;  %v1217_v26 = vld [vmem:[%s5672_s4 + $0xd8] sm:$0xff]  ;;  %v1242_v17 = vld [vmem:[%s5672_s4 + $0x1a0] sm:$0xff] }
 0x152   :  { %v1244_v18 = vld [vmem:[%s5672_s4 + $0x1b0] sm:$0xff] }
 0x153   :  { %2864 = vmatpush1.bf16.msra.mxu0 %v2863_v40  ;;  %v2885_v40 = vpack.c.bf16 %v549_v36, %v545_v35  ;;  %v1218_v35 = vld [vmem:[%s5672_s4 + $0xe0] sm:$0xff]  ;;  %v1220_v36 = vld [vmem:[%s5672_s4 + $0xf0] sm:$0xff] }
 0x154   :  { %3060 = vmatpush1.bf16.msra.mxu1 %v3059_v41  ;;  %2866 = vmatprep.subr.bf16.mxu0 %v2865_v42  ;;  %v544_v41 = vld [vmem:[#allocation5 + $0xc00] sm:$0xff] }
 0x155   :  { %3062 = vmatprep.subr.bf16.mxu1 %v3061_v47  ;;  %v548_v42 = vld [vmem:[#allocation5 + $0xc20] sm:$0xff]  ;;  %v3081_v47 = vpack.c.bf16 %v551_v44, %v547_v43  ;;  %v1224_v43 = vld [vmem:[%s5672_s4 + $0x110] sm:$0xff]  ;;  %v1227_v44 = vld [vmem:[%s5672_s4 + $0x128] sm:$0xff] }
 0x156   :  { %v2887_v46 = vpack.c.bf16 %v548_v42, %v544_v41  ;;  %v1222_v42 = vld [vmem:[%s5672_s4 + $0x100] sm:$0xff] }
 0x157   :  { %2868 = vmatpush1.bf16.msra.mxu0 %v2867_v53  ;;  %v1193_v53 = vld [vmem:[%s5672_s4 + $0x18] sm:$0xff] }
 0x158   :  { %3064 = vmatpush1.bf16.msra.mxu1 %v3063_v25  ;;  %2870 = vmatprep.subr.bf16.mxu0 %v2869_v54  ;;  %v3083_v25 = vpack.c.bf16 %v550_v51, %v546_v50  ;;  %v1190_v54 = vld [vmem:[%s5672_s4] sm:$0xff]  ;;  %v1228_v51 = vld [vmem:[%s5672_s4 + $0x130] sm:$0xff] }
 0x159   :  { %3066 = vmatprep.subr.bf16.mxu1 %v3065_v58  ;;  %v4211_v58 = vpack.c.bf16 %v1192_v55, %v1190_v54  ;;  %v1226_v50 = vld [vmem:[%s5672_s4 + $0x120] sm:$0xff]  ;;  %v1232_v55 = vld [vmem:[%s5672_s4 + $0x150] sm:$0xff] }
 0x15a   :  { %v1230_v54 = vld [vmem:[%s5672_s4 + $0x140] sm:$0xff] }
 0x15b   :  { %2872 = vmatpush1.bf16.msra.mxu0 %v2871_v1  ;;  %v4230_v1 = vpack.c.bf16 %v1196_v62, %v1194_v60  ;;  %v4392_v60 = vpack.c.bf16 %v1232_v55, %v1230_v54  ;;  %v4395_v62 = vpack.c.bf16 %v1237_v57, %v1235_v56  ;;  %v1486_v55 = vld [vmem:[%s5674_s6 + $0x18] sm:$0xff]  ;;  %v1487_v57 = vld [vmem:[%s5674_s6 + $0x20] sm:$0xff] }
 0x15c   :  { %3068 = vmatpush1.bf16.msra.mxu1 %v3067_v22  ;;  %2874 = vmatprep.subr.bf16.mxu0 %v2873_v2  ;;  %v4233_v22 = vpack.c.bf16 %v1201_v0, %v1199_v63  ;;  %v1198_v2 = vld [vmem:[%s5672_s4 + $0x40] sm:$0xff]  ;;  %v1236_v0 = vld [vmem:[%s5672_s4 + $0x170] sm:$0xff] }
 0x15d   :  { %3070 = vmatprep.subr.bf16.mxu1 %v3069_v6  ;;  %v4248_v6 = vpack.c.bf16 %v1200_v3, %v1198_v2  ;;  %v1234_v63 = vld [vmem:[%s5672_s4 + $0x160] sm:$0xff]  ;;  %v1239_v2 = vld [vmem:[%s5672_s4 + $0x188] sm:$0xff]  ;;  %v1241_v3 = vld [vmem:[%s5672_s4 + $0x198] sm:$0xff] }
 0x15e   :  { %v4410_v4 = vpack.c.bf16 %v1236_v0, %v1234_v63  ;;  %v4413_v5 = vpack.c.bf16 %v1241_v3, %v1239_v2  ;;  %v1488_v63 = vld [vmem:[%s5674_s6 + $0x28] sm:$0xff]  ;;  %v1489_v2 = vld [vmem:[%s5674_s6 + $0x30] sm:$0xff]  ;;  %v1490_v3 = vld [vmem:[%s5674_s6 + $0x38] sm:$0xff] }
 0x15f   :  { %2876 = vmatpush1.bf16.msra.mxu0 %v2875_v13  ;;  %v4266_v13 = vpack.c.bf16 %v1204_v9, %v1202_v8  ;;  %v1238_v8 = vld [vmem:[%s5672_s4 + $0x180] sm:$0xff]  ;;  %v1240_v9 = vld [vmem:[%s5672_s4 + $0x190] sm:$0xff]  ;;  %v3216_v0 = vpack.c.bf16 %v1488_v63, %v1487_v57  ;;  %v4568_v63 = vsub.s32 0, %v4145_v61 }
 0x160   :  { %3072 = vmatpush1.bf16.msra.mxu1 %v3071_v14  ;;  %2878 = vmatprep.subr.bf16.mxu0 %v2877_v15  ;;  %v4269_v14 = vpack.c.bf16 %v1209_v12, %v1207_v10  ;;  %v1206_v15 = vld [vmem:[%s5672_s4 + $0x80] sm:$0xff]  ;;  %v4422_v10 = vpack.c.bf16 %v1240_v9, %v1238_v8  ;;  %v1243_v12 = vld [vmem:[%s5672_s4 + $0x1a8] sm:$0xff]  ;;  %v3219_v8 = vpack.c.bf16 %v1490_v3, %v1489_v2  ;;  %v4571_v2 = vsub.s32 1, %v4145_v61 }
 0x161   :  { %3074 = vmatprep.subr.bf16.mxu1 %v3073_v19  ;;  %v4284_v19 = vpack.c.bf16 %v1208_v16, %v1206_v15  ;;  %v1245_v15 = vld [vmem:[%s5672_s4 + $0x1b8] sm:$0xff]  ;;  %v1491_v9 = vld [vmem:[%s5674_s6 + $0x40] sm:$0xff]  ;;  %v4574_v3 = vsub.s32 2, %v4145_v61 }
 0x162   :  { %v4432_v16 = vpack.c.bf16 %v1245_v15, %v1243_v12  ;;  %v1492_v12 = vld [vmem:[%s5674_s6 + $0x48] sm:$0xff] }
 0x163   :  { %2880 = vmatpush1.bf16.msra.mxu0 %v2879_v27  ;;  %v4302_v27 = vpack.c.bf16 %v1212_v23, %v1210_v21  ;;  %v4440_v21 = vpack.c.bf16 %v1244_v18, %v1242_v17  ;;  %v1247_v23 = vld [vmem:[%s5672_s4 + $0x1c8] sm:$0xff]  ;;  %v3222_v15 = vpack.c.bf16 %v1492_v12, %v1491_v9  ;;  %v1493_v17 = vld [vmem:[%s5674_s6 + $0x50] sm:$0xff]  ;;  %v1494_v18 = vld [vmem:[%s5674_s6 + $0x58] sm:$0xff]  ;;  %5722 = vst [vmem:[#allocation29_spill] sm:$0xff] %v4574_v3  ;;  %v4577_v9 = vsub.s32 3, %v4145_v61 }
 0x164   :  { %3076 = vmatpush1.bf16.msra.mxu1 %v3075_v28  ;;  %2882 = vmatprep.subr.bf16.mxu0 %v2881_v29  ;;  %v4305_v28 = vpack.c.bf16 %v1217_v26, %v1215_v24  ;;  %v1214_v29 = vld [vmem:[%s5672_s4 + $0xc0] sm:$0xff]  ;;  %v1249_v24 = vld [vmem:[%s5672_s4 + $0x1d8] sm:$0xff]  ;;  %v1295_v61 = vld [vmem:[%s5672_s4 + $0x348] sm:$0xff] }
 0x165   :  { %3078 = vmatprep.subr.bf16.mxu1 %v3077_v33  ;;  %v4320_v33 = vpack.c.bf16 %v1216_v30, %v1214_v29  ;;  %v1246_v26 = vld [vmem:[%s5672_s4 + $0x1c0] sm:$0xff]  ;;  %v4453_v29 = vpack.c.bf16 %v1249_v24, %v1247_v23  ;;  %v1248_v30 = vld [vmem:[%s5672_s4 + $0x1d0] sm:$0xff]  ;;  %v3225_v23 = vpack.c.bf16 %v1494_v18, %v1493_v17 }
 0x166   :  { %v4458_v31 = vpack.c.bf16 %v1248_v30, %v1246_v26  ;;  %v1495_v24 = vld [vmem:[%s5674_s6 + $0x60] sm:$0xff]  ;;  %v1496_v26 = vld [vmem:[%s5674_s6 + $0x68] sm:$0xff] }
 0x167   :  { %2884 = vmatpush1.bf16.msra.mxu0 %v2883_v37  ;;  %v1223_v37 = vld [vmem:[%s5672_s4 + $0x108] sm:$0xff]  ;;  %v3228_v30 = vpack.c.bf16 %v1496_v26, %v1495_v24 }
 0x168   :  { %3080 = vmatpush1.bf16.msra.mxu1 %v3079_v38  ;;  %2886 = vmatprep.subr.bf16.mxu0 %v2885_v40  ;;  %v1225_v38 = vld [vmem:[%s5672_s4 + $0x118] sm:$0xff]  ;;  %v4338_v40 = vpack.c.bf16 %v1220_v36, %v1218_v35 }
 0x169   :  { %v4341_v41 = vpack.c.bf16 %v1225_v38, %v1223_v37  ;;  %v1253_v35 = vld [vmem:[%s5672_s4 + $0x1f8] sm:$0xff]  ;;  %v1250_v37 = vld [vmem:[%s5672_s4 + $0x1e0] sm:$0xff]  ;;  %v1252_v38 = vld [vmem:[%s5672_s4 + $0x1f0] sm:$0xff] }
 0x16a   :  { %825 = vmatmul.mubr.f32.vlgmr.msra.gmra.mrb[0].mxu0 %v4177_v45  ;;  %v4468_v36 = vpack.c.bf16 %v1253_v35, %v1251_v32  ;;  %v1497_v32 = vld [vmem:[%s5674_s6 + $0x70] sm:$0xff]  ;;  %v1498_v35 = vld [vmem:[%s5674_s6 + $0x78] sm:$0xff] }
 0x16b   :  { %1109 = vmatmul.mubr.f32.vlgmr.msra.gmra.mrb[0].mxu1 %v4177_v45  ;;  %2888 = vmatpush1.bf16.msra.mxu0 %v2887_v46  ;;  %v4195_v45 = vpack.c.bf16 %v1193_v53, %v1191_v52  ;;  %v1229_v46 = vld [vmem:[%s5672_s4 + $0x138] sm:$0xff]  ;;  %v1231_v52 = vld [vmem:[%s5672_s4 + $0x148] sm:$0xff] }
 0x16c   :  { %895 = vmatprep.mubr.f32.mxu0 %v5689_v49  ;;  %3082 = vmatprep.subr.bf16.mxu0 %v3081_v47  ;;  %v4356_v47 = vpack.c.bf16 %v1224_v43, %v1222_v42  ;;  %v4359_v48 = vpack.c.bf16 %v1229_v46, %v1227_v44  ;;  %v1233_v53 = vld [vmem:[%s5672_s4 + $0x158] sm:$0xff]  ;;  %v4476_v42 = vpack.c.bf16 %v1252_v38, %v1250_v37  ;;  %v1255_v43 = vld [vmem:[%s5672_s4 + $0x208] sm:$0xff]  ;;  %v1499_v38 = vld [vmem:[%s5674_s6 + $0x80] sm:$0xff] }
 0x16d   :  { %v1257_v44 = vld [vmem:[%s5672_s4 + $0x218] sm:$0xff]  ;;  %v3231_v37 = vpack.c.bf16 %v1498_v35, %v1497_v32  ;;  %v1256_v32 = vld [vmem:[%s5672_s4 + $0x210] sm:$0xff] }
 0x16e   :  { %v4486_v46 = vpack.c.bf16 %v1257_v44, %v1255_v43  ;;  %v1500_v43 = vld [vmem:[%s5674_s6 + $0x88] sm:$0xff] }
 0x16f   :  { %v3234_v44 = vpack.c.bf16 %v1500_v43, %v1499_v38  ;;  %v1261_v38 = vld [vmem:[%s5672_s4 + $0x238] sm:$0xff] }
 0x172   :  { %2671 = vmatmul.mubr.msk.f32.vlgmr.msra.gmra.mrb[0].mxu0 %vm615_vm0, %v607_v39 }
 0x173   :  { %3084 = vmatpush1.bf16.msra.mxu0 %v3083_v25  ;;  %1179 = vmatprep.mubr.f32.mxu0 %v5689_v49  ;;  %v4377_v25 = vpack.c.bf16 %v1233_v53, %v1231_v52  ;;  %v1485_v52 = vld [vmem:[%s5674_s6 + $0x10] sm:$0xff]  ;;  %v5687_v53 = vmov 0.0|0.0  }
 0x174   :  { %3086 = vmatprep.subr.bf16.mxu0 %v4195_v45  ;;  %3209 = vmatprep.subr.bf16.mxu1 %v5687_v53  ;;  %v3213_v56 = vpack.c.bf16 %v1486_v55, %v1485_v52  ;;  %v1504_v55 = vld [vmem:[%s5674_s6 + $0xa8] sm:$0xff]  ;;  %v1292_v49 = vld [vmem:[%s5672_s4 + $0x330] sm:$0xff] }
 0x176   :  { %2672 = vmatmul.mubr.msk.f32.vlgmr.msra.gmra.mrb[2].mxu0 %vm615_vm0, %v607_v39  ;;  %v4374_v39 = vpack.c.bf16 %v1228_v51, %v1226_v50  ;;  %v1483_v50 = vld [vmem:[%s5674_s6] sm:$0xff]  ;;  %v1484_v51 = vld [vmem:[%s5674_s6 + $0x8] sm:$0xff] }
 0x177   :  { %3088 = vmatpush1.bf16.msra.mxu0 %v4211_v58  ;;  %v3210_v54 = vpack.c.bf16 %v1484_v51, %v1483_v50  ;;  %v1501_v50 = vld [vmem:[%s5674_s6 + $0x90] sm:$0xff]  ;;  %v1502_v51 = vld [vmem:[%s5674_s6 + $0x98] sm:$0xff] }
 0x178   :  { %3090 = vmatprep.subr.bf16.mxu0 %v4214_v59  ;;  %v3237_v52 = vpack.c.bf16 %v1502_v51, %v1501_v50 }
 0x179   :  { %3211 = vmatpush1.bf16.msra.mxu1 %v3210_v54  ;;  %v1503_v54 = vld [vmem:[%s5674_s6 + $0xa0] sm:$0xff] }
 0x17a   :  { %3212 = vmatprep.subr.bf16.mxu1 %v5687_v53 }
 0x17b   :  { %3092 = vmatpush1.bf16.msra.mxu0 %v4230_v1 }
 0x17c   :  { %3094 = vmatprep.subr.bf16.mxu0 %v4233_v22 }
 0x17d   :  { %3214 = vmatpush1.bf16.msra.mxu1 %v3213_v56  ;;  %v3240_v56 = vpack.c.bf16 %v1504_v55, %v1503_v54 }
 0x17e   :  { %3215 = vmatprep.subr.bf16.mxu1 %v5687_v53 }
 0x17f   :  { %3096 = vmatpush1.bf16.msra.mxu0 %v4248_v6 }
 0x180   :  { %3098 = vmatprep.subr.bf16.mxu0 %v4251_v7 }
 0x181   :  { %3217 = vmatpush1.bf16.msra.mxu1 %v3216_v0 }
 0x182   :  { %3218 = vmatprep.subr.bf16.mxu1 %v5687_v53 }
 0x183   :  { %3100 = vmatpush1.bf16.msra.mxu0 %v4266_v13 }
 0x184   :  { %3102 = vmatprep.subr.bf16.mxu0 %v4269_v14 }
 0x185   :  { %3220 = vmatpush1.bf16.msra.mxu1 %v3219_v8  ;;  %v552_v8 = vld [vmem:[#allocation7] sm:$0xf] }
 0x186   :  { %3221 = vmatprep.subr.bf16.mxu1 %v5687_v53  ;;  %v557_v12 = vrot.slane %v552_v8, %v4568_v63  ;;  %v565_v17 = vrot.slane %v552_v8, %v4574_v3  ;;  %v569_v18 = vrot.slane %v552_v8, %v4577_v9  ;;  %v1296_v3 = vld [vmem:[%s5672_s4 + $0x350] sm:$0xff] }
 0x187   :  { %3104 = vmatpush1.bf16.msra.mxu0 %v4284_v19 }
 0x188   :  { %3106 = vmatprep.subr.bf16.mxu0 %v4287_v20 }
 0x189   :  { %3223 = vmatpush1.bf16.msra.mxu1 %v3222_v15  ;;  %v561_v15 = vrot.slane %v552_v8, %v4571_v2 }
 0x18a   :  { %3224 = vmatprep.subr.bf16.mxu1 %v5687_v53 }
 0x18b   :  { %3108 = vmatpush1.bf16.msra.mxu0 %v4302_v27 }
 0x18c   :  { %3110 = vmatprep.subr.bf16.mxu0 %v4305_v28 }
 0x18d   :  { %3226 = vmatpush1.bf16.msra.mxu1 %v3225_v23 }
 0x18e   :  { %3227 = vmatprep.subr.bf16.mxu1 %v5687_v53 }
 0x18f   :  { %3112 = vmatpush1.bf16.msra.mxu0 %v4320_v33 }
 0x190   :  { %3114 = vmatprep.subr.bf16.mxu0 %v4323_v34 }
 0x191   :  { %3229 = vmatpush1.bf16.msra.mxu1 %v3228_v30  ;;  %v1254_v30 = vld [vmem:[%s5672_s4 + $0x200] sm:$0xff] }
 0x192   :  { %3230 = vmatprep.subr.bf16.mxu1 %v5687_v53 }
 0x193   :  { %3116 = vmatpush1.bf16.msra.mxu0 %v4338_v40 }
 0x194   :  { %3118 = vmatprep.subr.bf16.mxu0 %v4341_v41 }
 0x195   :  { %3232 = vmatpush1.bf16.msra.mxu1 %v3231_v37  ;;  %v1259_v37 = vld [vmem:[%s5672_s4 + $0x228] sm:$0xff] }
 0x196   :  { %3233 = vmatprep.subr.bf16.mxu1 %v5687_v53  ;;  %v4599_v8 = vpack.c.bf16 %v1261_v38, %v1259_v37 }
 0x197   :  { %3120 = vmatpush1.bf16.msra.mxu0 %v4356_v47 }
 0x198   :  { %3122 = vmatprep.subr.bf16.mxu0 %v4359_v48 }
 0x199   :  { %3235 = vmatpush1.bf16.msra.mxu1 %v3234_v44 }
 0x19a   :  { %3236 = vmatprep.subr.bf16.mxu1 %v5687_v53 }
 0x19b   :  { %3124 = vmatpush1.bf16.msra.mxu0 %v4374_v39 }
 0x19c   :  { %3126 = vmatprep.subr.bf16.mxu0 %v4377_v25 }
 0x19d   :  { %3238 = vmatpush1.bf16.msra.mxu1 %v3237_v52  ;;  %v4595_v52 = vpack.c.bf16 %v1256_v32, %v1254_v30  ;;  %v1264_v30 = vld [vmem:[%s5672_s4 + $0x250] sm:$0xff]  ;;  %v1267_v32 = vld [vmem:[%s5672_s4 + $0x268] sm:$0xff] }
 0x19e   :  { %3239 = vmatprep.subr.bf16.mxu1 %v5687_v53 }
 0x19f   :  { %3128 = vmatpush1.bf16.msra.mxu0 %v4392_v60 }
 0x1a0   :  { %3130 = vmatprep.subr.bf16.mxu0 %v4395_v62 }
 0x1a1   :  { %3241 = vmatpush1.bf16.msra.mxu1 %v3240_v56 }
 0x1a2   :  { %3242 = vmatprep.subr.bf16.mxu1 %v5687_v53  ;;  %v1291_v53 = vld [vmem:[%s5672_s4 + $0x328] sm:$0xff] }
 0x1a3   :  { %3132 = vmatpush1.bf16.msra.mxu0 %v4410_v4 }
 0x1a4   :  { %3134 = vmatprep.subr.bf16.mxu0 %v4413_v5 }
 0x1a7   :  { %3136 = vmatpush1.bf16.msra.mxu0 %v4422_v10 }
 0x1a8   :  { %3138 = vmatprep.subr.bf16.mxu0 %v4432_v16 }
 0x1ab   :  { %3140 = vmatpush1.bf16.msra.mxu0 %v4440_v21 }
 0x1ac   :  { %3142 = vmatprep.subr.bf16.mxu0 %v4453_v29 }
 0x1af   :  { %3144 = vmatpush1.bf16.msra.mxu0 %v4458_v31 }
 0x1b0   :  { %3146 = vmatprep.subr.bf16.mxu0 %v4468_v36 }
 0x1b3   :  { %3148 = vmatpush1.bf16.msra.mxu0 %v4476_v42 }
 0x1b4   :  { %3150 = vmatprep.subr.bf16.mxu0 %v4486_v46 }
 0x23e   :  { %v1110_v57 = vpop.f32.mrb[0].mxu1 }
 0x23f   :  { %v1112_v0 = vpop.f32.mrb[1].mxu1  ;;  %v3587_v43 = vadd.f32 %v1110_v57, %v565_v17  ;;  %v1265_v17 = vld [vmem:[%s5672_s4 + $0x258] sm:$0xff] }
 0x240   :  { %v3589_v44 = vadd.f32 %v1112_v0, %v569_v18  ;;  %v1263_v0 = vld [vmem:[%s5672_s4 + $0x248] sm:$0xff] }
 0x245   :  { %v897_v23 = vpop.f32.mrb[0].mxu0 }
 0x246   :  { %v3585_v24 = vadd.f32 %v897_v23, %v557_v12  ;;  %v899_v26 = vpop.f32.mrb[1].mxu0  ;;  %v1258_v12 = vld [vmem:[%s5672_s4 + $0x220] sm:$0xff] }
 0x247   :  { %v3586_v35 = vadd.f32 %v899_v26, %v561_v15  ;;  %v1260_v15 = vld [vmem:[%s5672_s4 + $0x230] sm:$0xff]  ;;  %v1262_v26 = vld [vmem:[%s5672_s4 + $0x240] sm:$0xff] }
 0x248   :  { %v1186_v54 = vmax.f32 %v3585_v24, 0.0  ;;  %v4614_v23 = vpack.c.bf16 %v1260_v15, %v1258_v12  ;;  %v4617_v24 = vpack.c.bf16 %v1265_v17, %v1263_v0  ;;  %v4633_v37 = vpack.c.bf16 %v1264_v30, %v1262_v26  ;;  %v1270_v12 = vld [vmem:[%s5672_s4 + $0x280] sm:$0xff]  ;;  %v1272_v15 = vld [vmem:[%s5672_s4 + $0x290] sm:$0xff]  ;;  %v1277_v0 = vld [vmem:[%s5672_s4 + $0x2b8] sm:$0xff] }
 0x249   :  { %v1187_v50 = vmax.f32 %v3586_v35, 0.0  ;;  %v1181_v51 = vpop.f32.mrb[2].mxu0  ;;  %v1269_v35 = vld [vmem:[%s5672_s4 + $0x278] sm:$0xff]  ;;  %v4669_v17 = vpack.c.bf16 %v1272_v15, %v1270_v12  ;;  %v1274_v26 = vld [vmem:[%s5672_s4 + $0x2a0] sm:$0xff]  ;;  %v1276_v30 = vld [vmem:[%s5672_s4 + $0x2b0] sm:$0xff] }
 0x24a   :  { %v4597_v55 = vadd.f32 %v3587_v43, %v1181_v51  ;;  %v1183_v56 = vpop.f32.mrb[3].mxu0  ;;  %v4636_v38 = vpack.c.bf16 %v1269_v35, %v1267_v32  ;;  %v1266_v43 = vld [vmem:[%s5672_s4 + $0x260] sm:$0xff]  ;;  %v1273_v51 = vld [vmem:[%s5672_s4 + $0x298] sm:$0xff]  ;;  %v1279_v32 = vld [vmem:[%s5672_s4 + $0x2c8] sm:$0xff] }
 0x24b   :  { %v3590_v57 = vadd.f32 %v3589_v44, %v1183_v56  ;;  %1403 = vmatprep.mubr.f32.mxu0 %v1187_v50  ;;  %v1268_v44 = vld [vmem:[%s5672_s4 + $0x270] sm:$0xff]  ;;  %v1271_v50 = vld [vmem:[%s5672_s4 + $0x288] sm:$0xff]  ;;  %v1281_v35 = vld [vmem:[%s5672_s4 + $0x2d8] sm:$0xff] }
 0x24c   :  { %1404 = vmatmul.mubr.f32.vlgmr.msra.gmra.mrb[4].mxu0 %v1186_v54  ;;  %v4651_v54 = vpack.c.bf16 %v1268_v44, %v1266_v43  ;;  %v4654_v56 = vpack.c.bf16 %v1273_v51, %v1271_v50  ;;  %v4687_v43 = vpack.c.bf16 %v1276_v30, %v1274_v26  ;;  %v4690_v44 = vpack.c.bf16 %v1281_v35, %v1279_v32  ;;  %v1278_v50 = vld [vmem:[%s5672_s4 + $0x2c0] sm:$0xff]  ;;  %v1280_v51 = vld [vmem:[%s5672_s4 + $0x2d0] sm:$0xff]  ;;  %v1283_v12 = vld [vmem:[%s5672_s4 + $0x2e8] sm:$0xff] }
 0x24d   :  { %v1189_v18 = vmax.f32 %v3590_v57, 0.0  ;;  %3152 = vmatpush1.bf16.msra.mxu0 %v4595_v52  ;;  %v1275_v57 = vld [vmem:[%s5672_s4 + $0x2a8] sm:$0xff]  ;;  %v1285_v15 = vld [vmem:[%s5672_s4 + $0x2f8] sm:$0xff]  ;;  %v1282_v26 = vld [vmem:[%s5672_s4 + $0x2e0] sm:$0xff] }
 0x24e   :  { %3154 = vmatprep.subr.bf16.mxu0 %v4599_v8  ;;  %5723 = vst [vmem:[#allocation30_spill] sm:$0xff] %v4690_v44  ;;  %v1284_v30 = vld [vmem:[%s5672_s4 + $0x2f0] sm:$0xff]  ;;  %v1287_v32 = vld [vmem:[%s5672_s4 + $0x308] sm:$0xff]  ;;  %v1289_v35 = vld [vmem:[%s5672_s4 + $0x318] sm:$0xff] }
 0x24f   :  { %2675 = vmatprep.mubr.msk.f32.mxu0 %vm1328_vm1, %v1189_v18  ;;  %v4672_v18 = vpack.c.bf16 %v1277_v0, %v1275_v57  ;;  %v4705_v57 = vpack.c.bf16 %v1280_v51, %v1278_v50  ;;  %v4708_v0 = vpack.c.bf16 %v1285_v15, %v1283_v12  ;;  %v4723_v50 = vpack.c.bf16 %v1284_v30, %v1282_v26  ;;  %v1286_v12 = vld [vmem:[%s5672_s4 + $0x300] sm:$0xff]  ;;  %v1288_v15 = vld [vmem:[%s5672_s4 + $0x310] sm:$0xff]  ;;  %v1293_v26 = vld [vmem:[%s5672_s4 + $0x338] sm:$0xff] }
 0x250   :  { %v4726_v51 = vpack.c.bf16 %v1289_v35, %v1287_v32  ;;  %v4741_v30 = vpack.c.bf16 %v1288_v15, %v1286_v12  ;;  %v4744_v32 = vpack.c.bf16 %v1293_v26, %v1291_v53  ;;  %v1290_v35 = vld [vmem:[%s5672_s4 + $0x320] sm:$0xff]  ;;  %v1297_v12 = vld [vmem:[%s5672_s4 + $0x358] sm:$0xff] }
 0x251   :  { %3156 = vmatpush1.bf16.msra.mxu0 %v4614_v23  ;;  %5724 = vst [vmem:[#allocation31_spill] sm:$0xff] %v4705_v57  ;;  %5725 = vst [vmem:[#allocation32_spill] sm:$0xff] %v4708_v0  ;;  %v4759_v53 = vpack.c.bf16 %v1292_v49, %v1290_v35  ;;  %v4762_v15 = vpack.c.bf16 %v1297_v12, %v1295_v61  ;;  %v1294_v26 = vld [vmem:[%s5672_s4 + $0x340] sm:$0xff]  ;;  %v1301_v49 = vld [vmem:[%s5672_s4 + $0x378] sm:$0xff] }
 0x252   :  { %3158 = vmatprep.subr.bf16.mxu0 %v4617_v24  ;;  %5726 = vst [vmem:[#allocation33_spill] sm:$0xff] %v4723_v50  ;;  %5727 = vst [vmem:[#allocation34_spill] sm:$0xff] %v4726_v51  ;;  %v4777_v61 = vpack.c.bf16 %v1296_v3, %v1294_v26  ;;  %v1298_v12 = vld [vmem:[%s5672_s4 + $0x360] sm:$0xff]  ;;  %v1305_v3 = vld [vmem:[%s5672_s4 + $0x398] sm:$0xff] }
 0x253   :  { %5728 = vst [vmem:[#allocation35_spill] sm:$0xff] %v4741_v30  ;;  %5729 = vst [vmem:[#allocation36_spill] sm:$0xff] %v4744_v32 }
 0x254   :  { %5730 = vst [vmem:[#allocation37_spill] sm:$0xff] %v4759_v53  ;;  %5731 = vst [vmem:[#allocation38_spill] sm:$0xff] %v4762_v15 }
 0x255   :  { %3160 = vmatpush1.bf16.msra.mxu0 %v4633_v37  ;;  %5732 = vst [vmem:[#allocation39_spill] sm:$0xff] %v4777_v61 }
 0x256   :  { %3162 = vmatprep.subr.bf16.mxu0 %v4636_v38 }
 0x259   :  { %3164 = vmatpush1.bf16.msra.mxu0 %v4651_v54 }
 0x25a   :  { %3166 = vmatprep.subr.bf16.mxu0 %v4654_v56 }
 0x25d   :  { %3168 = vmatpush1.bf16.msra.mxu0 %v4669_v17 }
 0x25e   :  { %3170 = vmatprep.subr.bf16.mxu0 %v4672_v18 }
 0x261   :  { %3172 = vmatpush1.bf16.msra.mxu0 %v4687_v43 }
 0x262   :  { %3174 = vmatprep.subr.bf16.mxu0 %v4690_v44 }
 0x265   :  { %3176 = vmatpush1.bf16.msra.mxu0 %v4705_v57 }
 0x266   :  { %3178 = vmatprep.subr.bf16.mxu0 %v4708_v0  ;;  %v1691_v0 = vld [vmem:[#allocation2] sm:$0x3] }
 0x269   :  { %3180 = vmatpush1.bf16.msra.mxu0 %v4723_v50 }
 0x26a   :  { %3182 = vmatprep.subr.bf16.mxu0 %v4726_v51  ;;  %v1299_v51 = vld [vmem:[%s5672_s4 + $0x368] sm:$0xff] }
 0x26b   :  { %v4780_v35 = vpack.c.bf16 %v1301_v49, %v1299_v51  ;;  %v1302_v49 = vld [vmem:[%s5672_s4 + $0x380] sm:$0xff] }
 0x26d   :  { %3184 = vmatpush1.bf16.msra.mxu0 %v4741_v30  ;;  %5733 = vst [vmem:[#allocation40_spill] sm:$0xff] %v4780_v35  ;;  %v1303_v30 = vld [vmem:[%s5672_s4 + $0x388] sm:$0xff] }
 0x26e   :  { %3186 = vmatprep.subr.bf16.mxu0 %v4744_v32  ;;  %v1300_v32 = vld [vmem:[%s5672_s4 + $0x370] sm:$0xff]  ;;  %v4798_v26 = vpack.c.bf16 %v1305_v3, %v1303_v30  ;;  %v1306_v3 = vld [vmem:[%s5672_s4 + $0x3a0] sm:$0xff] }
 0x26f   :  { %v4795_v51 = vpack.c.bf16 %v1300_v32, %v1298_v12  ;;  %v1309_v32 = vld [vmem:[%s5672_s4 + $0x3b8] sm:$0xff] }
 0x270   :  { %5735 = vst [vmem:[#allocation42_spill] sm:$0xff] %v4798_v26 }
 0x271   :  { %3188 = vmatpush1.bf16.msra.mxu0 %v4759_v53  ;;  %5734 = vst [vmem:[#allocation41_spill] sm:$0xff] %v4795_v51  ;;  %v1307_v53 = vld [vmem:[%s5672_s4 + $0x3a8] sm:$0xff] }
 0x272   :  { %3190 = vmatprep.subr.bf16.mxu0 %v4762_v15  ;;  %v1304_v15 = vld [vmem:[%s5672_s4 + $0x390] sm:$0xff]  ;;  %v4816_v12 = vpack.c.bf16 %v1309_v32, %v1307_v53  ;;  %v1310_v32 = vld [vmem:[%s5672_s4 + $0x3c0] sm:$0xff] }
 0x273   :  { %v4813_v30 = vpack.c.bf16 %v1304_v15, %v1302_v49  ;;  %v1313_v15 = vld [vmem:[%s5672_s4 + $0x3d8] sm:$0xff] }
 0x274   :  { %5737 = vst [vmem:[#allocation44_spill] sm:$0xff] %v4816_v12 }
 0x275   :  { %3192 = vmatpush1.bf16.msra.mxu0 %v4777_v61  ;;  %5736 = vst [vmem:[#allocation43_spill] sm:$0xff] %v4813_v30  ;;  %v1311_v61 = vld [vmem:[%s5672_s4 + $0x3c8] sm:$0xff] }
 0x276   :  { %3194 = vmatprep.subr.bf16.mxu0 %v4780_v35  ;;  %v1308_v35 = vld [vmem:[%s5672_s4 + $0x3b0] sm:$0xff]  ;;  %v4834_v49 = vpack.c.bf16 %v1313_v15, %v1311_v61  ;;  %v4857_v61 = vld [vmem:[%s5672_s4 + $0x3e0] sm:$0xf]  ;;  %v1506_v15 = vld [vmem:[%s5674_s6 + $0xb8] sm:$0xff] }
 0x277   :  { %v4831_v53 = vpack.c.bf16 %v1308_v35, %v1306_v3  ;;  %v4849_v35 = vld [vmem:[%s5672_s4 + $0x3e8] sm:$0xf]  ;;  %5742 = vst [vmem:[#allocation49_spill] sm:$0xff] %v4857_v61  ;;  %v1505_v3 = vld [vmem:[%s5674_s6 + $0xb0] sm:$0xff] }
 0x278   :  { %5739 = vst [vmem:[#allocation46_spill] sm:$0xff] %v4834_v49  ;;  %5741 = vst [vmem:[#allocation48_spill] sm:$0xff] %v4849_v35 }
 0x279   :  { %3196 = vmatpush1.bf16.msra.mxu0 %v4795_v51  ;;  %5738 = vst [vmem:[#allocation45_spill] sm:$0xff] %v4831_v53 }
 0x27a   :  { %3198 = vmatprep.subr.bf16.mxu0 %v4798_v26  ;;  %v1312_v26 = vld [vmem:[%s5672_s4 + $0x3d0] sm:$0xff] }
 0x27b   :  { %v4843_v51 = vpack.c.bf16 %v1312_v26, %v1310_v32  ;;  %v1188_v26 = vmax.f32 %v4597_v55, 0.0  ;;  %v3243_v32 = vpack.c.bf16 %v1506_v15, %v1505_v3  ;;  %v1507_v55 = vld [vmem:[%s5674_s6 + $0xc0] sm:$0xff] }
 0x27d   :  { %3200 = vmatpush1.bf16.msra.mxu0 %v4813_v30  ;;  %5740 = vst [vmem:[#allocation47_spill] sm:$0xff] %v4843_v51  ;;  %3244 = vmatpush1.bf16.msra.mxu1 %v3243_v32  ;;  %v1589_v32 = vld [vmem:[%s5676_s8] sm:$0xff] }
 0x27e   :  { %3202 = vmatprep.subr.bf16.mxu0 %v4816_v12 }
 0x281   :  { %3204 = vmatpush1.bf16.msra.mxu0 %v4831_v53 }
 0x282   :  { %3206 = vmatprep.subr.bf16.mxu0 %v4834_v49 }
 0x285   :  { %3208 = vmatpush1.bf16.msra.mxu0 %v4843_v51  ;;  %v5744_v51 = vmov 0.0|0.0  }
 0x286   :  { %2673 = vmatprep.subr.msk.mxu0 %vm1332_vm2, %v4849_v35  ;;  %v5743_v35 = vmov 0.0  }
 0x287   :  { %1567 = vmatprep.subr.mxu1 %v5743_v35 }
 0x288   :  { %1568 = vmatpush1.msra.mxu1 %v1507_v55  ;;  %v1590_v55 = vld [vmem:[%s5676_s8 + $0x8] sm:$0xff] }
 0x289   :  { %2674 = vmatpush1.msk.msra.mxu0 %vm1332_vm2, %v4857_v61  ;;  %3245 = vmatprep.subr.bf16.mxu1 %v5744_v51  ;;  %v3246_v50 = vpack.c.bf16 %v1590_v55, %v1589_v32  ;;  %v1597_v55 = vld [vmem:[%s5676_s8 + $0x40] sm:$0xff] }
 0x28a   :  { %1475 = vmatmul.mubr.f32.vlgmr.msra.gmra.mrb[4].mxu0 %v1188_v26  ;;  %v1316_v26 = vld [vmem:[#allocation8] sm:$0x3] }
 0x28b   :  { %v4874_v61 = vrot.slane %v1316_v26, %v4568_v63  ;;  %v4877_v49 = vrot.slane %v1316_v26, %v4571_v2 }
 0x28d   :  { %5745 = vst [vmem:[#allocation50_spill] sm:$0xff] %v4874_v61  ;;  %5746 = vst [vmem:[#allocation51_spill] sm:$0xff] %v4877_v49 }
 0x35d   :  { %v1476_v53 = vpop.f32.mrb[4].mxu0 }
 0x35e   :  { %v4880_v3 = vadd.f32 %v1476_v53, %v4874_v61  ;;  %v1478_v15 = vpop.f32.mrb[5].mxu0  ;;  %v1591_v53 = vld [vmem:[%s5676_s8 + $0x10] sm:$0xff]  ;;  %v1592_v61 = vld [vmem:[%s5676_s8 + $0x18] sm:$0xff] }
 0x35f   :  { %v3592_v12 = vadd.f32 %v1478_v15, %v4877_v49  ;;  %v3249_v15 = vpack.c.bf16 %v1592_v61, %v1591_v53  ;;  %v1598_v53 = vld [vmem:[%s5676_s8 + $0x48] sm:$0xff]  ;;  %v2678_v49 = vld [vmem:[#allocation11] ss:$0 sm:$0xff] }
 0x360   :  { %v1481_v26 = vmax.f32 %v4880_v3, 0.0  ;;  %v1594_v3 = vld [vmem:[%s5676_s8 + $0x28] sm:$0xff] }
 0x361   :  { %v1482_v30 = vmax.f32 %v3592_v12, 0.0  ;;  %v1593_v12 = vld [vmem:[%s5676_s8 + $0x20] sm:$0xff] }
 0x362   :  { %v3252_v32 = vpack.c.bf16 %v1594_v3, %v1593_v12  ;;  %v1599_v12 = vld [vmem:[%s5676_s8 + $0x50] sm:$0xff]  ;;  %v1600_v3 = vld [vmem:[%s5676_s8 + $0x58] sm:$0xff] }
 0x363   :  { %2677 = vmatprep.mubr.msk.f32.mxu1 %vm1515_vm3, %v1482_v30 }
 0x364   :  { %1584 = vmatmul.mubr.f32.vlgmr.msra.gmra.mrb[2].mxu1 %v1481_v26 }
 0x365   :  { %3247 = vmatpush1.bf16.msra.mxu1 %v3246_v50  ;;  %2679 = vmatprep.mubr.msk.f32.mxu1 %vm1515_vm3, %v1482_v30  ;;  %v1595_v50 = vld [vmem:[%s5676_s8 + $0x30] sm:$0xff]  ;;  %v1596_v30 = vld [vmem:[%s5676_s8 + $0x38] sm:$0xff] }
 0x366   :  { %3248 = vmatprep.subr.bf16.mxu1 %v5744_v51  ;;  %v3255_v61 = vpack.c.bf16 %v1596_v30, %v1595_v50  ;;  %v1601_v50 = vld [vmem:[%s5676_s8 + $0x60] sm:$0xff]  ;;  %v1602_v30 = vld [vmem:[%s5676_s8 + $0x68] sm:$0xff] }
 0x369   :  { %3250 = vmatpush1.bf16.msra.mxu1 %v3249_v15  ;;  %v3258_v15 = vpack.c.bf16 %v1598_v53, %v1597_v55  ;;  %v1603_v55 = vld [vmem:[%s5676_s8 + $0x70] sm:$0xff]  ;;  %v1604_v53 = vld [vmem:[%s5676_s8 + $0x78] sm:$0xff] }
 0x36a   :  { %3251 = vmatprep.subr.bf16.mxu1 %v5744_v51 }
 0x36d   :  { %3253 = vmatpush1.bf16.msra.mxu1 %v3252_v32  ;;  %v3261_v32 = vpack.c.bf16 %v1600_v3, %v1599_v12  ;;  %v1605_v12 = vld [vmem:[%s5676_s8 + $0x80] sm:$0xff]  ;;  %v1606_v3 = vld [vmem:[%s5676_s8 + $0x88] sm:$0xff] }
 0x36e   :  { %3254 = vmatprep.subr.bf16.mxu1 %v5744_v51 }
 0x371   :  { %3256 = vmatpush1.bf16.msra.mxu1 %v3255_v61  ;;  %v3264_v61 = vpack.c.bf16 %v1602_v30, %v1601_v50  ;;  %v1607_v50 = vld [vmem:[%s5676_s8 + $0x90] sm:$0xff]  ;;  %v1608_v30 = vld [vmem:[%s5676_s8 + $0x98] sm:$0xff] }
 0x372   :  { %3257 = vmatprep.subr.bf16.mxu1 %v5744_v51 }
 0x375   :  { %3259 = vmatpush1.bf16.msra.mxu1 %v3258_v15  ;;  %v3267_v15 = vpack.c.bf16 %v1604_v53, %v1603_v55  ;;  %v1609_v55 = vld [vmem:[%s5676_s8 + $0xa0] sm:$0xff]  ;;  %v1610_v53 = vld [vmem:[%s5676_s8 + $0xa8] sm:$0xff] }
 0x376   :  { %3260 = vmatprep.subr.bf16.mxu1 %v5744_v51 }
 0x379   :  { %3262 = vmatpush1.bf16.msra.mxu1 %v3261_v32  ;;  %v3270_v32 = vpack.c.bf16 %v1606_v3, %v1605_v12  ;;  %v1611_v12 = vld [vmem:[%s5676_s8 + $0xb0] sm:$0xff]  ;;  %v1612_v3 = vld [vmem:[%s5676_s8 + $0xb8] sm:$0xff] }
 0x37a   :  { %3263 = vmatprep.subr.bf16.mxu1 %v5744_v51 }
 0x37d   :  { %3265 = vmatpush1.bf16.msra.mxu1 %v3264_v61  ;;  %v3273_v61 = vpack.c.bf16 %v1608_v30, %v1607_v50  ;;  %v1613_v50 = vld [vmem:[%s5676_s8 + $0xc0] sm:$0xff] }
 0x37e   :  { %3266 = vmatprep.subr.bf16.mxu1 %v5744_v51  ;;  %v1694_v30 = vld [vmem:[#allocation13] sm:$0xff] }
 0x381   :  { %3268 = vmatpush1.bf16.msra.mxu1 %v3267_v15  ;;  %v3276_v15 = vpack.c.bf16 %v1610_v53, %v1609_v55  ;;  %v1718_v53 = vcombine.high %v1694_v30, %v1694_v30 }
 0x382   :  { %3269 = vmatprep.subr.bf16.mxu1 %v5744_v51 }
 0x385   :  { %3271 = vmatpush1.bf16.msra.mxu1 %v3270_v32  ;;  %v3279_v32 = vpack.c.bf16 %v1612_v3, %v1611_v12  ;;  %v2676_v3 = vld [vmem:[#allocation10] ss:$0 sm:$0xff] }
 0x386   :  { %3272 = vmatprep.subr.bf16.mxu1 %v5744_v51 }
 0x389   :  { %3274 = vmatpush1.bf16.msra.mxu1 %v3273_v61  ;;  %v1725_v61 = vrot.slane %v1694_v30, %v4148_v11 }
 0x38a   :  { %3275 = vmatprep.subr.bf16.mxu1 %v5744_v51 }
 0x38b   :  { %v1733_v55 = vcombine.high %v1725_v61, %v1725_v61 }
 0x38d   :  { %3277 = vmatpush1.bf16.msra.mxu1 %v3276_v15  ;;  %v1732_v15 = vrot.slane %v1718_v53, %v4148_v11 }
 0x38e   :  { %3278 = vmatprep.subr.bf16.mxu1 %v5744_v51 }
 0x38f   :  { %v1734_v12 = vcombine.high %v1732_v15, %v1732_v15 }
 0x391   :  { %3280 = vmatpush1.bf16.msra.mxu1 %v3279_v32 }
 0x392   :  { %1669 = vmatprep.subr.mxu1 %v5743_v35 }
 0x395   :  { %1670 = vmatpush1.msra.mxu1 %v1613_v50 }
 0x396   :  { %1686 = vmatmul.mubr.f32.vlgmr.msra.gmra.mrb[4].mxu1 %v1481_v26  ;;  %2680 = vmatprep.subr.msk.mxu1 %vm1739_vm4, %v1733_v55 }
 0x397   :  { %1812 = vmatprep.mubr.f32.mxu1 %v5743_v35  ;;  %2681 = vmatpush1.msk.msra.mxu1 %vm1739_vm4, %v1725_v61  ;;  %v2125_v61 = vld [vmem:[%s5680_s12 + $0x2a0] sm:$0xff] }
 0x398   :  { %2683 = vmatprep.subr.msk.mxu1 %vm1739_vm4, %v1734_v12 }
 0x437   :  { %v1585_v32 = vpop.f32.mrb[2].mxu1 }
 0x438   :  { %v1586_v26 = vadd.f32 %v2676_v3, %v1585_v32  ;;  %v1587_v50 = vpop.f32.mrb[3].mxu1  ;;  %v2140_v3 = vld [vmem:[%s5680_s12 + $0x318] sm:$0xff]  ;;  %v2147_v32 = vld [vmem:[%s5680_s12 + $0x350] sm:$0xff] }
 0x439   :  { %v3433_v50 = vpack.c.bf16 %v2147_v32, %v2140_v3  ;;  %v2054_v3 = vld [vmem:[%s5680_s12 + $0x68] sm:$0xff] }
 0x43a   :  { %2623 = vst.msk [vmem:[#allocation18] sm:$0x3] %vm2622_vm5, %v1586_v26  ;;  %v5765_v32 = vld [vmem:[#allocation47_spill] sm:$0xff] }
 0x469   :  { %v1687_v51 = vpop.f32.mrb[4].mxu1 }
 0x46a   :  { %v1688_v30 = vadd.f32 %v2678_v49, %v1687_v51  ;;  %v1689_v57 = vpop.f32.mrb[5].mxu1  ;;  %v2126_v51 = vld [vmem:[%s5680_s12 + $0x2a8] sm:$0xff]  ;;  %v2133_v49 = vld [vmem:[%s5680_s12 + $0x2e0] sm:$0xff] }
 0x46b   :  { %v2118_v57 = vld [vmem:[%s5680_s12 + $0x268] sm:$0xff]  ;;  %v3429_v53 = vpack.c.bf16 %v2133_v49, %v2126_v51  ;;  %v5762_v51 = vld [vmem:[#allocation29_spill] sm:$0xff] }
 0x46c   :  { %v1692_v44 = vmul.f32 %v1691_v0, %v1688_v30  ;;  %2624 = vst.msk [vmem:[#allocation20] sm:$0x3] %vm2622_vm5, %v1688_v30  ;;  %v2146_v30 = vld [vmem:[%s5680_s12 + $0x348] sm:$0xff] }
 0x46e   :  { %v1693_v55 = vadd.f32 %v1692_v44, %v1586_v26  ;;  %v2139_v26 = vld [vmem:[%s5680_s12 + $0x310] sm:$0xff] }
 0x470   :  { %2682 = vmatmul.mubr.msk.f32.vlgmr.msra.gmra.mrb[6].mxu1 %vm1735_vm6, %v1693_v55 }
 0x471   :  { %2684 = vmatpush1.msk.msra.mxu1 %vm1739_vm4, %v1732_v15  ;;  %1883 = vmatprep.mubr.f32.mxu1 %v5743_v35  ;;  %v2132_v15 = vld [vmem:[%s5680_s12 + $0x2d8] sm:$0xff] }
 0x472   :  { %3282 = vmatprep.subr.bf16.mxu1 %v4195_v45  ;;  %v2042_v45 = vld [vmem:[%s5680_s12 + $0x8] sm:$0xff]  ;;  %v3431_v12 = vpack.c.bf16 %v2132_v15, %v2125_v61  ;;  %v5763_v61 = vld [vmem:[#allocation45_spill] sm:$0xff] }
 0x474   :  { %2685 = vmatmul.mubr.msk.f32.vlgmr.msra.gmra.mrb[8].mxu1 %vm1735_vm6, %v1693_v55  ;;  %v3435_v55 = vpack.c.bf16 %v2146_v30, %v2139_v26  ;;  %v5766_v26 = vld [vmem:[#allocation48_spill] sm:$0xff] }
 0x475   :  { %3284 = vmatpush1.bf16.msra.mxu1 %v4211_v58  ;;  %v2049_v58 = vld [vmem:[%s5680_s12 + $0x40] sm:$0xff] }
 0x476   :  { %3286 = vmatprep.subr.bf16.mxu1 %v4214_v59  ;;  %v2041_v59 = vld [vmem:[%s5680_s12] sm:$0xff] }
 0x479   :  { %3288 = vmatpush1.bf16.msra.mxu1 %v4230_v1  ;;  %v3405_v1 = vpack.c.bf16 %v2049_v58, %v2042_v45  ;;  %v2154_v45 = vld [vmem:[%s5680_s12 + $0x388] sm:$0xff]  ;;  %v2161_v58 = vld [vmem:[%s5680_s12 + $0x3c0] sm:$0xff] }
 0x47a   :  { %3290 = vmatprep.subr.bf16.mxu1 %v4233_v22  ;;  %v2048_v22 = vld [vmem:[%s5680_s12 + $0x38] sm:$0xff] }
 0x47b   :  { %3406 = vmatprep.subr.bf16.mxu0 %v3405_v1  ;;  %v3437_v1 = vpack.c.bf16 %v2161_v58, %v2154_v45  ;;  %v2068_v45 = vld [vmem:[%s5680_s12 + $0xd8] sm:$0xff] }
 0x47c   :  { %v5767_v58 = vld [vmem:[#allocation49_spill] sm:$0xff] }
 0x47d   :  { %3292 = vmatpush1.bf16.msra.mxu1 %v4248_v6  ;;  %v3407_v6 = vpack.c.bf16 %v2048_v22, %v2041_v59  ;;  %v2153_v59 = vld [vmem:[%s5680_s12 + $0x380] sm:$0xff]  ;;  %v2160_v22 = vld [vmem:[%s5680_s12 + $0x3b8] sm:$0xff] }
 0x47e   :  { %3294 = vmatprep.subr.bf16.mxu1 %v4251_v7  ;;  %v2056_v7 = vld [vmem:[%s5680_s12 + $0x78] sm:$0xff] }
 0x47f   :  { %3408 = vmatpush1.bf16.msra.mxu0 %v3407_v6  ;;  %v3439_v6 = vpack.c.bf16 %v2160_v22, %v2153_v59  ;;  %v5768_v59 = vmov 0.0|0.0   ;;  %v2075_v22 = vld [vmem:[%s5680_s12 + $0x110] sm:$0xff] }
 0x481   :  { %3296 = vmatpush1.bf16.msra.mxu1 %v4266_v13  ;;  %v2063_v13 = vld [vmem:[%s5680_s12 + $0xb0] sm:$0xff] }
 0x482   :  { %3298 = vmatprep.subr.bf16.mxu1 %v4269_v14  ;;  %v2055_v14 = vld [vmem:[%s5680_s12 + $0x70] sm:$0xff] }
 0x485   :  { %3300 = vmatpush1.bf16.msra.mxu1 %v4284_v19  ;;  %v3409_v19 = vpack.c.bf16 %v2063_v13, %v2056_v7  ;;  %v2168_v7 = vld [vmem:[%s5680_s12 + $0x3f8] sm:$0xff]  ;;  %v2175_v13 = vld [vmem:[%s5680_s12 + $0x430] sm:$0xff] }
 0x486   :  { %3302 = vmatprep.subr.bf16.mxu1 %v4287_v20  ;;  %v2062_v20 = vld [vmem:[%s5680_s12 + $0xa8] sm:$0xff] }
 0x487   :  { %3410 = vmatprep.subr.bf16.mxu0 %v3409_v19  ;;  %v3441_v19 = vpack.c.bf16 %v2175_v13, %v2168_v7  ;;  %v2089_v13 = vld [vmem:[%s5680_s12 + $0x180] sm:$0xff] }
 0x489   :  { %3304 = vmatpush1.bf16.msra.mxu1 %v4302_v27  ;;  %v3411_v27 = vpack.c.bf16 %v2062_v20, %v2055_v14  ;;  %v2167_v14 = vld [vmem:[%s5680_s12 + $0x3f0] sm:$0xff]  ;;  %v2174_v20 = vld [vmem:[%s5680_s12 + $0x428] sm:$0xff] }
 0x48a   :  { %3306 = vmatprep.subr.bf16.mxu1 %v4305_v28  ;;  %v2070_v28 = vld [vmem:[%s5680_s12 + $0xe8] sm:$0xff] }
 0x48b   :  { %3412 = vmatpush1.bf16.msra.mxu0 %v3411_v27  ;;  %v3443_v27 = vpack.c.bf16 %v2174_v20, %v2167_v14  ;;  %v2096_v14 = vld [vmem:[%s5680_s12 + $0x1b8] sm:$0xff]  ;;  %v2103_v20 = vld [vmem:[%s5680_s12 + $0x1f0] sm:$0xff] }
 0x48d   :  { %3308 = vmatpush1.bf16.msra.mxu1 %v4320_v33  ;;  %v2077_v33 = vld [vmem:[%s5680_s12 + $0x120] sm:$0xff] }
 0x48e   :  { %3310 = vmatprep.subr.bf16.mxu1 %v4323_v34  ;;  %v2069_v34 = vld [vmem:[%s5680_s12 + $0xe0] sm:$0xff] }
 0x491   :  { %3312 = vmatpush1.bf16.msra.mxu1 %v4338_v40  ;;  %v3413_v40 = vpack.c.bf16 %v2077_v33, %v2070_v28  ;;  %v2182_v28 = vld [vmem:[%s5680_s12 + $0x468] sm:$0xff]  ;;  %v2189_v33 = vld [vmem:[%s5680_s12 + $0x4a0] sm:$0xff] }
 0x492   :  { %3314 = vmatprep.subr.bf16.mxu1 %v4341_v41  ;;  %v2076_v41 = vld [vmem:[%s5680_s12 + $0x118] sm:$0xff] }
 0x493   :  { %3414 = vmatprep.subr.bf16.mxu0 %v3413_v40  ;;  %v3445_v40 = vpack.c.bf16 %v2189_v33, %v2182_v28  ;;  %v2117_v33 = vld [vmem:[%s5680_s12 + $0x260] sm:$0xff] }
 0x495   :  { %3316 = vmatpush1.bf16.msra.mxu1 %v4356_v47  ;;  %v3415_v47 = vpack.c.bf16 %v2076_v41, %v2069_v34  ;;  %v2181_v34 = vld [vmem:[%s5680_s12 + $0x460] sm:$0xff]  ;;  %v2188_v41 = vld [vmem:[%s5680_s12 + $0x498] sm:$0xff] }
 0x496   :  { %3318 = vmatprep.subr.bf16.mxu1 %v4359_v48  ;;  %v2084_v48 = vld [vmem:[%s5680_s12 + $0x158] sm:$0xff] }
 0x497   :  { %3416 = vmatpush1.bf16.msra.mxu0 %v3415_v47  ;;  %v3447_v47 = vpack.c.bf16 %v2188_v41, %v2181_v34  ;;  %v2124_v34 = vld [vmem:[%s5680_s12 + $0x298] sm:$0xff]  ;;  %v2131_v41 = vld [vmem:[%s5680_s12 + $0x2d0] sm:$0xff] }
 0x499   :  { %3320 = vmatpush1.bf16.msra.mxu1 %v4374_v39  ;;  %v2091_v39 = vld [vmem:[%s5680_s12 + $0x190] sm:$0xff] }
 0x49a   :  { %3322 = vmatprep.subr.bf16.mxu1 %v4377_v25  ;;  %v2083_v25 = vld [vmem:[%s5680_s12 + $0x150] sm:$0xff] }
 0x49d   :  { %3324 = vmatpush1.bf16.msra.mxu1 %v4392_v60  ;;  %v3417_v60 = vpack.c.bf16 %v2091_v39, %v2084_v48  ;;  %v1695_v48 = vld [vmem:[#allocation14] sm:$0xf] }
 0x49e   :  { %3326 = vmatprep.subr.bf16.mxu1 %v4395_v62  ;;  %v2090_v62 = vld [vmem:[%s5680_s12 + $0x188] sm:$0xff]  ;;  %v1700_v39 = vrot.slane %v1695_v48, %v4568_v63  ;;  %v1708_v49 = vrot.slane %v1695_v48, %v5762_v51 }
 0x49f   :  { %3418 = vmatprep.subr.bf16.mxu0 %v3417_v60 }
 0x4a1   :  { %3328 = vmatpush1.bf16.msra.mxu1 %v4410_v4  ;;  %v3419_v4 = vpack.c.bf16 %v2090_v62, %v2083_v25  ;;  %v1704_v25 = vrot.slane %v1695_v48, %v4571_v2 }
 0x4a2   :  { %3330 = vmatprep.subr.bf16.mxu1 %v4413_v5  ;;  %v2098_v5 = vld [vmem:[%s5680_s12 + $0x1c8] sm:$0xff] }
 0x4a3   :  { %3420 = vmatpush1.bf16.msra.mxu0 %v3419_v4 }
 0x4a5   :  { %3332 = vmatpush1.bf16.msra.mxu1 %v4422_v10  ;;  %v2105_v10 = vld [vmem:[%s5680_s12 + $0x200] sm:$0xff] }
 0x4a6   :  { %3334 = vmatprep.subr.bf16.mxu1 %v4432_v16  ;;  %v2097_v16 = vld [vmem:[%s5680_s12 + $0x1c0] sm:$0xff] }
 0x4a9   :  { %3336 = vmatpush1.bf16.msra.mxu1 %v4440_v21  ;;  %v3421_v21 = vpack.c.bf16 %v2105_v10, %v2098_v5  ;;  %v1712_v10 = vrot.slane %v1695_v48, %v4577_v9 }
 0x4aa   :  { %3338 = vmatprep.subr.bf16.mxu1 %v4453_v29  ;;  %v2104_v29 = vld [vmem:[%s5680_s12 + $0x1f8] sm:$0xff] }
 0x4ab   :  { %3422 = vmatprep.subr.bf16.mxu0 %v3421_v21 }
 0x4ad   :  { %3340 = vmatpush1.bf16.msra.mxu1 %v4458_v31  ;;  %v3423_v31 = vpack.c.bf16 %v2104_v29, %v2097_v16 }
 0x4ae   :  { %3342 = vmatprep.subr.bf16.mxu1 %v4468_v36  ;;  %v2112_v36 = vld [vmem:[%s5680_s12 + $0x238] sm:$0xff] }
 0x4af   :  { %3424 = vmatpush1.bf16.msra.mxu0 %v3423_v31 }
 0x4b1   :  { %3344 = vmatpush1.bf16.msra.mxu1 %v4476_v42  ;;  %v2119_v42 = vld [vmem:[%s5680_s12 + $0x270] sm:$0xff] }
 0x4b2   :  { %3346 = vmatprep.subr.bf16.mxu1 %v4486_v46  ;;  %v2111_v46 = vld [vmem:[%s5680_s12 + $0x230] sm:$0xff]  ;;  %v3425_v44 = vpack.c.bf16 %v2119_v42, %v2112_v36 }
 0x4b3   :  { %v3427_v0 = vpack.c.bf16 %v2118_v57, %v2111_v46  ;;  %v5758_v46 = vld [vmem:[#allocation41_spill] sm:$0xff]  ;;  %v5760_v57 = vld [vmem:[#allocation43_spill] sm:$0xff] }
 0x4b4   :  { %3426 = vmatprep.subr.bf16.mxu0 %v3425_v44  ;;  %v5759_v44 = vld [vmem:[#allocation42_spill] sm:$0xff] }
 0x4b5   :  { %3428 = vmatpush1.bf16.msra.mxu0 %v3427_v0  ;;  %v5761_v0 = vld [vmem:[#allocation44_spill] sm:$0xff] }
 0x4b6   :  { %3430 = vmatprep.subr.bf16.mxu0 %v3429_v53  ;;  %v5764_v53 = vld [vmem:[#allocation46_spill] sm:$0xff] }
 0x4b9   :  { %3432 = vmatpush1.bf16.msra.mxu0 %v3431_v12  ;;  %v2047_v12 = vld [vmem:[%s5680_s12 + $0x30] sm:$0xff] }
 0x4ba   :  { %3434 = vmatprep.subr.bf16.mxu0 %v3433_v50  ;;  %v3550_v50 = vpack.c.bf16 %v2054_v3, %v2047_v12  ;;  %v5770_v12 = vld [vmem:[#allocation51_spill] sm:$0xff] }
 0x4bd   :  { %3436 = vmatpush1.bf16.msra.mxu0 %v3435_v55  ;;  %v2061_v55 = vld [vmem:[%s5680_s12 + $0xa0] sm:$0xff] }
 0x4be   :  { %3438 = vmatprep.subr.bf16.mxu0 %v3437_v1  ;;  %v3553_v1 = vpack.c.bf16 %v2068_v45, %v2061_v55 }
 0x4c1   :  { %3440 = vmatpush1.bf16.msra.mxu0 %v3439_v6  ;;  %v2082_v6 = vld [vmem:[%s5680_s12 + $0x148] sm:$0xff] }
 0x4c2   :  { %3442 = vmatprep.subr.bf16.mxu0 %v3441_v19  ;;  %v3556_v7 = vpack.c.bf16 %v2082_v6, %v2075_v22  ;;  %v3559_v19 = vpack.c.bf16 %v2096_v14, %v2089_v13  ;;  %v2079_v22 = vld [vmem:[%s5680_s12 + $0x130] sm:$0xff]  ;;  %v2078_v14 = vld [vmem:[%s5680_s12 + $0x128] sm:$0xff] }
 0x4c3   :  { %v2071_v13 = vld [vmem:[%s5680_s12 + $0xf0] sm:$0xff] }
 0x4c5   :  { %3444 = vmatpush1.bf16.msra.mxu0 %v3443_v27  ;;  %v2110_v27 = vld [vmem:[%s5680_s12 + $0x228] sm:$0xff] }
 0x4c6   :  { %3446 = vmatprep.subr.bf16.mxu0 %v3445_v40  ;;  %v3562_v28 = vpack.c.bf16 %v2110_v27, %v2103_v20  ;;  %v3565_v40 = vpack.c.bf16 %v2124_v34, %v2117_v33  ;;  %v2093_v20 = vld [vmem:[%s5680_s12 + $0x1a0] sm:$0xff]  ;;  %v3463_v27 = vpack.c.bf16 %v2078_v14, %v2071_v13  ;;  %v2092_v34 = vld [vmem:[%s5680_s12 + $0x198] sm:$0xff]  ;;  %v2046_v14 = vld [vmem:[%s5680_s12 + $0x28] sm:$0xff] }
 0x4c7   :  { %v2085_v33 = vld [vmem:[%s5680_s12 + $0x160] sm:$0xff]  ;;  %v2212_v13 = vld [vmem:[%s5680_s12 + $0x558] sm:$0xff] }
 0x4c9   :  { %3448 = vmatpush1.bf16.msra.mxu0 %v3447_v47  ;;  %v2138_v47 = vld [vmem:[%s5680_s12 + $0x308] sm:$0xff] }
 0x4ca   :  { %v3568_v48 = vpack.c.bf16 %v2138_v47, %v2131_v41  ;;  %v2107_v41 = vld [vmem:[%s5680_s12 + $0x210] sm:$0xff]  ;;  %v3467_v47 = vpack.c.bf16 %v2092_v34, %v2085_v33 }
 0x4cb   :  { %v2067_v33 = vld [vmem:[%s5680_s12 + $0xd0] sm:$0xff] }
 0x4cc   :  { %v2211_v34 = vld [vmem:[%s5680_s12 + $0x550] sm:$0xff] }
 0x543   :  { %v1814_v60 = vpop.f32.mrb[6].mxu1 }
 0x544   :  { %v1815_v62 = vadd.f32 %v1814_v60, %v1700_v39  ;;  %v1816_v4 = vpop.f32.mrb[7].mxu1  ;;  %v2145_v39 = vld [vmem:[%s5680_s12 + $0x340] sm:$0xff] }
 0x545   :  { %v1817_v5 = vadd.f32 %v1816_v4, %v1704_v25  ;;  %v2152_v25 = vld [vmem:[%s5680_s12 + $0x378] sm:$0xff]  ;;  %v2166_v4 = vld [vmem:[%s5680_s12 + $0x3e8] sm:$0xff] }
 0x546   :  { %v1890_v29 = vmax.f32 %v1815_v62, 0.0  ;;  %v3571_v60 = vpack.c.bf16 %v2152_v25, %v2145_v39  ;;  %v2159_v62 = vld [vmem:[%s5680_s12 + $0x3b0] sm:$0xff]  ;;  %v2106_v25 = vld [vmem:[%s5680_s12 + $0x208] sm:$0xff] }
 0x547   :  { %v1891_v16 = vmax.f32 %v1817_v5, 0.0  ;;  %v1885_v21 = vpop.f32.mrb[8].mxu1  ;;  %v3574_v5 = vpack.c.bf16 %v2166_v4, %v2159_v62  ;;  %v2099_v39 = vld [vmem:[%s5680_s12 + $0x1d0] sm:$0xff]  ;;  %v2121_v62 = vld [vmem:[%s5680_s12 + $0x280] sm:$0xff] }
 0x548   :  { %v1887_v31 = vpop.f32.mrb[9].mxu1  ;;  %v1886_v15 = vadd.f32 %v1885_v21, %v1708_v49  ;;  %v3471_v4 = vpack.c.bf16 %v2106_v25, %v2099_v39  ;;  %v2066_v39 = vld [vmem:[%s5680_s12 + $0xc8] sm:$0xff] }
 0x549   :  { %v1888_v36 = vadd.f32 %v1887_v31, %v1712_v10  ;;  %1961 = vmatprep.mubr.f32.mxu1 %v1891_v16  ;;  %v2173_v10 = vld [vmem:[%s5680_s12 + $0x420] sm:$0xff]  ;;  %v2180_v16 = vld [vmem:[%s5680_s12 + $0x458] sm:$0xff]  ;;  %v2194_v31 = vld [vmem:[%s5680_s12 + $0x4c8] sm:$0xff] }
 0x54a   :  { %1962 = vmatmul.mubr.f32.vlgmr.msra.gmra.mrb[10].mxu1 %v1890_v29  ;;  %v1892_v30 = vmax.f32 %v1886_v15, 0.0  ;;  %v3577_v21 = vpack.c.bf16 %v2180_v16, %v2173_v10  ;;  %v2187_v29 = vld [vmem:[%s5680_s12 + $0x490] sm:$0xff]  ;;  %v2050_v15 = vld [vmem:[%s5680_s12 + $0x48] sm:$0xff]  ;;  %v2113_v10 = vld [vmem:[%s5680_s12 + $0x240] sm:$0xff] }
 0x54b   :  { %v1893_v42 = vmax.f32 %v1888_v36, 0.0  ;;  %3348 = vmatpush1.bf16.msra.mxu1 %v4595_v52  ;;  %v5747_v52 = vld [vmem:[#allocation30_spill] sm:$0xff]  ;;  %v3580_v36 = vpack.c.bf16 %v2194_v31, %v2187_v29  ;;  %v2135_v29 = vld [vmem:[%s5680_s12 + $0x2f0] sm:$0xff]  ;;  %v2074_v25 = vld [vmem:[%s5680_s12 + $0x108] sm:$0xff] }
 0x54c   :  { %3350 = vmatprep.subr.bf16.mxu1 %v4599_v8  ;;  %v5748_v8 = vld [vmem:[#allocation31_spill] sm:$0xff]  ;;  %v2120_v16 = vld [vmem:[%s5680_s12 + $0x278] sm:$0xff] }
 0x54d   :  { %2688 = vmatprep.mubr.msk.f32.mxu1 %vm1328_vm1, %v1893_v42  ;;  %v2196_v42 = vld [vmem:[%s5680_s12 + $0x4d8] sm:$0xff]  ;;  %v3475_v31 = vpack.c.bf16 %v2120_v16, %v2113_v10 }
 0x54e   :  { %v2080_v10 = vld [vmem:[%s5680_s12 + $0x138] sm:$0xff] }
 0x54f   :  { %3352 = vmatpush1.bf16.msra.mxu1 %v4614_v23  ;;  %v5749_v23 = vld [vmem:[#allocation32_spill] sm:$0xff]  ;;  %v2088_v16 = vld [vmem:[%s5680_s12 + $0x178] sm:$0xff] }
 0x550   :  { %3354 = vmatprep.subr.bf16.mxu1 %v4617_v24  ;;  %v5750_v24 = vld [vmem:[#allocation33_spill] sm:$0xff] }
 0x553   :  { %3356 = vmatpush1.bf16.msra.mxu1 %v4633_v37  ;;  %v5751_v37 = vld [vmem:[#allocation34_spill] sm:$0xff] }
 0x554   :  { %3358 = vmatprep.subr.bf16.mxu1 %v4636_v38  ;;  %v5752_v38 = vld [vmem:[#allocation35_spill] sm:$0xff] }
 0x557   :  { %3360 = vmatpush1.bf16.msra.mxu1 %v4651_v54  ;;  %v5753_v54 = vld [vmem:[#allocation36_spill] sm:$0xff] }
 0x558   :  { %3362 = vmatprep.subr.bf16.mxu1 %v4654_v56  ;;  %v5754_v56 = vld [vmem:[#allocation37_spill] sm:$0xff] }
 0x55b   :  { %3364 = vmatpush1.bf16.msra.mxu1 %v4669_v17  ;;  %v5755_v17 = vld [vmem:[#allocation38_spill] sm:$0xff] }
 0x55c   :  { %3366 = vmatprep.subr.bf16.mxu1 %v4672_v18  ;;  %v5756_v18 = vld [vmem:[#allocation39_spill] sm:$0xff] }
 0x55f   :  { %3368 = vmatpush1.bf16.msra.mxu1 %v4687_v43  ;;  %v5757_v43 = vld [vmem:[#allocation40_spill] sm:$0xff] }
 0x560   :  { %3370 = vmatprep.subr.bf16.mxu1 %v5747_v52  ;;  %v2203_v52 = vld [vmem:[%s5680_s12 + $0x510] sm:$0xff] }
 0x563   :  { %3372 = vmatpush1.bf16.msra.mxu1 %v5748_v8  ;;  %v3449_v8 = vpack.c.bf16 %v2203_v52, %v2196_v42  ;;  %v2127_v42 = vld [vmem:[%s5680_s12 + $0x2b0] sm:$0xff]  ;;  %v2134_v52 = vld [vmem:[%s5680_s12 + $0x2e8] sm:$0xff] }
 0x564   :  { %3374 = vmatprep.subr.bf16.mxu1 %v5749_v23  ;;  %v2195_v23 = vld [vmem:[%s5680_s12 + $0x4d0] sm:$0xff] }
 0x565   :  { %3450 = vmatprep.subr.bf16.mxu0 %v3449_v8  ;;  %v2142_v8 = vld [vmem:[%s5680_s12 + $0x328] sm:$0xff] }
 0x567   :  { %3376 = vmatpush1.bf16.msra.mxu1 %v5750_v24  ;;  %v2202_v24 = vld [vmem:[%s5680_s12 + $0x508] sm:$0xff] }
 0x568   :  { %3378 = vmatprep.subr.bf16.mxu1 %v5751_v37  ;;  %v3451_v37 = vpack.c.bf16 %v2202_v24, %v2195_v23  ;;  %v2149_v23 = vld [vmem:[%s5680_s12 + $0x360] sm:$0xff]  ;;  %v3479_v24 = vpack.c.bf16 %v2134_v52, %v2127_v42  ;;  %v2102_v42 = vld [vmem:[%s5680_s12 + $0x1e8] sm:$0xff] }
 0x569   :  { %v2109_v52 = vld [vmem:[%s5680_s12 + $0x220] sm:$0xff] }
 0x56a   :  { %3452 = vmatpush1.bf16.msra.mxu0 %v3451_v37  ;;  %v3481_v37 = vpack.c.bf16 %v2149_v23, %v2142_v8  ;;  %v3517_v23 = vpack.c.bf16 %v2109_v52, %v2102_v42 }
 0x56b   :  { %3380 = vmatpush1.bf16.msra.mxu1 %v5752_v38  ;;  %v2201_v38 = vld [vmem:[%s5680_s12 + $0x500] sm:$0xff] }
 0x56c   :  { %3382 = vmatprep.subr.bf16.mxu1 %v5753_v54  ;;  %v2208_v54 = vld [vmem:[%s5680_s12 + $0x538] sm:$0xff] }
 0x56f   :  { %3384 = vmatpush1.bf16.msra.mxu1 %v5754_v56  ;;  %v3583_v56 = vpack.c.bf16 %v2208_v54, %v2201_v38  ;;  %v2141_v38 = vld [vmem:[%s5680_s12 + $0x320] sm:$0xff]  ;;  %v2148_v54 = vld [vmem:[%s5680_s12 + $0x358] sm:$0xff] }
 0x570   :  { %3386 = vmatprep.subr.bf16.mxu1 %v5755_v17  ;;  %v2210_v17 = vld [vmem:[%s5680_s12 + $0x548] sm:$0xff] }
 0x571   :  { %2304 = vmatprep.subr.mxu0 %v2210_v17  ;;  %v2163_v17 = vld [vmem:[%s5680_s12 + $0x3d0] sm:$0xff] }
 0x573   :  { %3388 = vmatpush1.bf16.msra.mxu1 %v5756_v18  ;;  %v2044_v18 = vld [vmem:[%s5680_s12 + $0x18] sm:$0xff] }
 0x574   :  { %3390 = vmatprep.subr.bf16.mxu1 %v5757_v43  ;;  %v2051_v43 = vld [vmem:[%s5680_s12 + $0x50] sm:$0xff] }
 0x577   :  { %3392 = vmatpush1.bf16.msra.mxu1 %v5758_v46  ;;  %v2209_v46 = vld [vmem:[%s5680_s12 + $0x540] sm:$0xff] }
 0x578   :  { %3394 = vmatprep.subr.bf16.mxu1 %v5759_v44  ;;  %v3453_v44 = vpack.c.bf16 %v2051_v43, %v2044_v18  ;;  %2305 = vmatpush1.msra.mxu0 %v2209_v46  ;;  %v3483_v18 = vpack.c.bf16 %v2148_v54, %v2141_v38  ;;  %v2155_v46 = vld [vmem:[%s5680_s12 + $0x390] sm:$0xff]  ;;  %v2116_v38 = vld [vmem:[%s5680_s12 + $0x258] sm:$0xff] }
 0x579   :  { %v2123_v54 = vld [vmem:[%s5680_s12 + $0x290] sm:$0xff] }
 0x57a   :  { %3454 = vmatprep.subr.bf16.mxu0 %v3453_v44  ;;  %v2162_v44 = vld [vmem:[%s5680_s12 + $0x3c8] sm:$0xff] }
 0x57b   :  { %3396 = vmatpush1.bf16.msra.mxu1 %v5760_v57  ;;  %v2215_v57 = vld [vmem:[%s5680_s12 + $0x570] sm:$0xff] }
 0x57c   :  { %3398 = vmatprep.subr.bf16.mxu1 %v5761_v0  ;;  %v5769_v0 = vld [vmem:[#allocation50_spill] sm:$0xff] }
 0x57f   :  { %3400 = vmatpush1.bf16.msra.mxu1 %v5763_v61 }
 0x580   :  { %3402 = vmatprep.subr.bf16.mxu1 %v5764_v53  ;;  %v2043_v53 = vld [vmem:[%s5680_s12 + $0x10] sm:$0xff] }
 0x583   :  { %3404 = vmatpush1.bf16.msra.mxu1 %v5765_v32  ;;  %v2058_v32 = vld [vmem:[%s5680_s12 + $0x88] sm:$0xff] }
 0x584   :  { %2686 = vmatprep.subr.msk.mxu1 %vm1332_vm2, %v5766_v26  ;;  %v2065_v26 = vld [vmem:[%s5680_s12 + $0xc0] sm:$0xff] }
 0x585   :  { %v3457_v45 = vpack.c.bf16 %v2065_v26, %v2058_v32  ;;  %v2183_v26 = vld [vmem:[%s5680_s12 + $0x470] sm:$0xff] }
 0x587   :  { %2687 = vmatpush1.msk.msra.mxu1 %vm1332_vm2, %v5767_v58  ;;  %v2057_v58 = vld [vmem:[%s5680_s12 + $0x80] sm:$0xff] }
 0x588   :  { %2033 = vmatmul.mubr.f32.vlgmr.msra.gmra.mrb[10].mxu1 %v1892_v30  ;;  %3549 = vmatprep.subr.bf16.mxu1 %v5768_v59  ;;  %v3455_v30 = vpack.c.bf16 %v2050_v15, %v2043_v53  ;;  %v2176_v53 = vld [vmem:[%s5680_s12 + $0x438] sm:$0xff] }
 0x589   :  { %3551 = vmatpush1.bf16.msra.mxu1 %v3550_v50  ;;  %v2184_v15 = vld [vmem:[%s5680_s12 + $0x478] sm:$0xff] }
 0x58a   :  { %3552 = vmatprep.subr.bf16.mxu1 %v5768_v59 }
 0x58d   :  { %3554 = vmatpush1.bf16.msra.mxu1 %v3553_v1  ;;  %v2072_v1 = vld [vmem:[%s5680_s12 + $0xf8] sm:$0xff] }
 0x58e   :  { %3555 = vmatprep.subr.bf16.mxu1 %v5768_v59 }
 0x591   :  { %3557 = vmatpush1.bf16.msra.mxu1 %v3556_v7  ;;  %v3461_v7 = vpack.c.bf16 %v2079_v22, %v2072_v1  ;;  %v2197_v22 = vld [vmem:[%s5680_s12 + $0x4e0] sm:$0xff] }
 0x592   :  { %3558 = vmatprep.subr.bf16.mxu1 %v5768_v59 }
 0x595   :  { %3560 = vmatpush1.bf16.msra.mxu1 %v3559_v19  ;;  %v2086_v19 = vld [vmem:[%s5680_s12 + $0x168] sm:$0xff] }
 0x596   :  { %3561 = vmatprep.subr.bf16.mxu1 %v5768_v59 }
 0x599   :  { %3563 = vmatpush1.bf16.msra.mxu1 %v3562_v28  ;;  %v3465_v28 = vpack.c.bf16 %v2093_v20, %v2086_v19  ;;  %v2053_v19 = vld [vmem:[%s5680_s12 + $0x60] sm:$0xff] }
 0x59a   :  { %3564 = vmatprep.subr.bf16.mxu1 %v5768_v59  ;;  %v2045_v20 = vld [vmem:[%s5680_s12 + $0x20] sm:$0xff] }
 0x59d   :  { %3566 = vmatpush1.bf16.msra.mxu1 %v3565_v40  ;;  %v2100_v40 = vld [vmem:[%s5680_s12 + $0x1d8] sm:$0xff] }
 0x59e   :  { %3567 = vmatprep.subr.bf16.mxu1 %v5768_v59 }
 0x5a1   :  { %3569 = vmatpush1.bf16.msra.mxu1 %v3568_v48  ;;  %v3469_v48 = vpack.c.bf16 %v2107_v41, %v2100_v40  ;;  %v3501_v40 = vpack.c.bf16 %v2053_v19, %v2046_v14  ;;  %v2171_v14 = vld [vmem:[%s5680_s12 + $0x410] sm:$0xff]  ;;  %v2178_v19 = vld [vmem:[%s5680_s12 + $0x448] sm:$0xff] }
 0x5a2   :  { %3570 = vmatprep.subr.bf16.mxu1 %v5768_v59 }
 0x5a5   :  { %3572 = vmatpush1.bf16.msra.mxu1 %v3571_v60  ;;  %v2114_v60 = vld [vmem:[%s5680_s12 + $0x248] sm:$0xff] }
 0x5a6   :  { %3573 = vmatprep.subr.bf16.mxu1 %v5768_v59 }
 0x5a9   :  { %3575 = vmatpush1.bf16.msra.mxu1 %v3574_v5  ;;  %v3473_v5 = vpack.c.bf16 %v2121_v62, %v2114_v60  ;;  %v2081_v60 = vld [vmem:[%s5680_s12 + $0x140] sm:$0xff] }
 0x5aa   :  { %3576 = vmatprep.subr.bf16.mxu1 %v5768_v59 }
 0x5ad   :  { %3578 = vmatpush1.bf16.msra.mxu1 %v3577_v21  ;;  %v2128_v21 = vld [vmem:[%s5680_s12 + $0x2b8] sm:$0xff] }
 0x5ae   :  { %3579 = vmatprep.subr.bf16.mxu1 %v5768_v59 }
 0x5b1   :  { %3581 = vmatpush1.bf16.msra.mxu1 %v3580_v36  ;;  %v3477_v36 = vpack.c.bf16 %v2135_v29, %v2128_v21  ;;  %v2095_v21 = vld [vmem:[%s5680_s12 + $0x1b0] sm:$0xff] }
 0x5b2   :  { %3582 = vmatprep.subr.bf16.mxu1 %v5768_v59  ;;  %v2064_v59 = vld [vmem:[%s5680_s12 + $0xb8] sm:$0xff]  ;;  %v3513_v29 = vpack.c.bf16 %v2095_v21, %v2088_v16 }
 0x5b3   :  { %v3459_v6 = vpack.c.bf16 %v2064_v59, %v2057_v58  ;;  %v2205_v58 = vld [vmem:[%s5680_s12 + $0x520] sm:$0xff] }
 0x5b5   :  { %3584 = vmatpush1.bf16.msra.mxu1 %v3583_v56  ;;  %v2156_v56 = vld [vmem:[%s5680_s12 + $0x398] sm:$0xff] }
 0x5b6   :  { %2517 = vmatprep.subr.mxu1 %v5743_v35  ;;  %v3485_v43 = vpack.c.bf16 %v2163_v17, %v2156_v56  ;;  %v3521_v17 = vpack.c.bf16 %v2123_v54, %v2116_v38 }
 0x5b9   :  { %2518 = vmatpush1.msra.mxu1 %v2215_v57  ;;  %v2170_v57 = vld [vmem:[%s5680_s12 + $0x408] sm:$0xff] }
 0x65b   :  { %v2034_v35 = vpop.f32.mrb[10].mxu1 }
 0x65c   :  { %v3593_v49 = vadd.f32 %v2034_v35, %v5769_v0  ;;  %v2036_v61 = vpop.f32.mrb[11].mxu1  ;;  %v2177_v35 = vld [vmem:[%s5680_s12 + $0x440] sm:$0xff]  ;;  %v3487_v0 = vpack.c.bf16 %v2162_v44, %v2155_v46  ;;  %v2130_v46 = vld [vmem:[%s5680_s12 + $0x2c8] sm:$0xff] }
 0x65d   :  { %v3594_v3 = vadd.f32 %v2036_v61, %v5770_v12  ;;  %v2169_v61 = vld [vmem:[%s5680_s12 + $0x400] sm:$0xff]  ;;  %v2191_v12 = vld [vmem:[%s5680_s12 + $0x4b0] sm:$0xff] }
 0x65e   :  { %v5312_v55 = vmax.f32 %v3593_v49, 0.0  ;;  %v3489_v49 = vpack.c.bf16 %v2177_v35, %v2170_v57  ;;  %v3493_v32 = vpack.c.bf16 %v2191_v12, %v2184_v15  ;;  %v2137_v44 = vld [vmem:[%s5680_s12 + $0x300] sm:$0xff] }
 0x65f   :  { %v5310_v50 = vmax.f32 %v3594_v3, 0.0  ;;  %v3491_v3 = vpack.c.bf16 %v2176_v53, %v2169_v61  ;;  %v3525_v35 = vpack.c.bf16 %v2137_v44, %v2130_v46  ;;  %v2144_v61 = vld [vmem:[%s5680_s12 + $0x338] sm:$0xff]  ;;  %v2151_v53 = vld [vmem:[%s5680_s12 + $0x370] sm:$0xff] }
 0x660   :  { %v3529_v12 = vpack.c.bf16 %v2151_v53, %v2144_v61 }
 0x661   :  { %2689 = vmatprep.mubr.msk.f32.mxu0 %vm1515_vm3, %v5310_v50  ;;  %2692 = vmatprep.mubr.msk.f32.mxu1 %vm1515_vm3, %v5310_v50 }
 0x662   :  { %2321 = vmatmul.mubr.f32.vlgmr.msra.gmra.mrb[6].mxu0 %v5312_v55  ;;  %2534 = vmatmul.mubr.f32.vlgmr.msra.gmra.mrb[12].mxu1 %v5312_v55 }
 0x663   :  { %3456 = vmatpush1.bf16.msra.mxu0 %v3455_v30  ;;  %2690 = vmatprep.mubr.msk.f32.mxu0 %vm1515_vm3, %v5310_v50  ;;  %v2190_v30 = vld [vmem:[%s5680_s12 + $0x4a8] sm:$0xff] }
 0x664   :  { %3458 = vmatprep.subr.bf16.mxu0 %v3457_v45  ;;  %v2198_v45 = vld [vmem:[%s5680_s12 + $0x4e8] sm:$0xff]  ;;  %v3495_v59 = vpack.c.bf16 %v2190_v30, %v2183_v26  ;;  %v2165_v30 = vld [vmem:[%s5680_s12 + $0x3e0] sm:$0xff] }
 0x665   :  { %v3497_v1 = vpack.c.bf16 %v2205_v58, %v2198_v45  ;;  %v2158_v26 = vld [vmem:[%s5680_s12 + $0x3a8] sm:$0xff] }
 0x666   :  { %v3533_v58 = vpack.c.bf16 %v2165_v30, %v2158_v26 }
 0x667   :  { %3460 = vmatpush1.bf16.msra.mxu0 %v3459_v6  ;;  %v2204_v6 = vld [vmem:[%s5680_s12 + $0x518] sm:$0xff] }
 0x668   :  { %3462 = vmatprep.subr.bf16.mxu0 %v3461_v7  ;;  %v3499_v7 = vpack.c.bf16 %v2204_v6, %v2197_v22  ;;  %v2172_v22 = vld [vmem:[%s5680_s12 + $0x418] sm:$0xff]  ;;  %v2179_v6 = vld [vmem:[%s5680_s12 + $0x450] sm:$0xff] }
 0x66b   :  { %3464 = vmatpush1.bf16.msra.mxu0 %v3463_v27  ;;  %v2052_v27 = vld [vmem:[%s5680_s12 + $0x58] sm:$0xff] }
 0x66c   :  { %3466 = vmatprep.subr.bf16.mxu0 %v3465_v28  ;;  %v2060_v28 = vld [vmem:[%s5680_s12 + $0x98] sm:$0xff]  ;;  %v3503_v41 = vpack.c.bf16 %v2052_v27, %v2045_v20  ;;  %v2186_v20 = vld [vmem:[%s5680_s12 + $0x488] sm:$0xff]  ;;  %v2193_v27 = vld [vmem:[%s5680_s12 + $0x4c0] sm:$0xff] }
 0x66f   :  { %3468 = vmatpush1.bf16.msra.mxu0 %v3467_v47  ;;  %v3505_v47 = vpack.c.bf16 %v2067_v33, %v2060_v28  ;;  %v3539_v28 = vpack.c.bf16 %v2178_v19, %v2171_v14  ;;  %v3541_v33 = vpack.c.bf16 %v2193_v27, %v2186_v20 }
 0x670   :  { %3470 = vmatprep.subr.bf16.mxu0 %v3469_v48  ;;  %v2059_v48 = vld [vmem:[%s5680_s12 + $0x90] sm:$0xff] }
 0x671   :  { %v3507_v62 = vpack.c.bf16 %v2066_v39, %v2059_v48 }
 0x673   :  { %3472 = vmatpush1.bf16.msra.mxu0 %v3471_v4  ;;  %v3509_v4 = vpack.c.bf16 %v2081_v60, %v2074_v25  ;;  %v2199_v25 = vld [vmem:[%s5680_s12 + $0x4f0] sm:$0xff]  ;;  %v2206_v60 = vld [vmem:[%s5680_s12 + $0x528] sm:$0xff] }
 0x674   :  { %3474 = vmatprep.subr.bf16.mxu0 %v3473_v5  ;;  %v2073_v5 = vld [vmem:[%s5680_s12 + $0x100] sm:$0xff] }
 0x677   :  { %3476 = vmatpush1.bf16.msra.mxu0 %v3475_v31  ;;  %v2087_v31 = vld [vmem:[%s5680_s12 + $0x170] sm:$0xff] }
 0x678   :  { %3478 = vmatprep.subr.bf16.mxu0 %v3477_v36  ;;  %v2094_v36 = vld [vmem:[%s5680_s12 + $0x1a8] sm:$0xff] }
 0x679   :  { %v3515_v8 = vpack.c.bf16 %v2094_v36, %v2087_v31 }
 0x67b   :  { %3480 = vmatpush1.bf16.msra.mxu0 %v3479_v24  ;;  %v2101_v24 = vld [vmem:[%s5680_s12 + $0x1e0] sm:$0xff] }
 0x67c   :  { %3482 = vmatprep.subr.bf16.mxu0 %v3481_v37  ;;  %v2108_v37 = vld [vmem:[%s5680_s12 + $0x218] sm:$0xff] }
 0x67d   :  { %v3519_v56 = vpack.c.bf16 %v2108_v37, %v2101_v24 }
 0x67f   :  { %3484 = vmatpush1.bf16.msra.mxu0 %v3483_v18  ;;  %v2115_v18 = vld [vmem:[%s5680_s12 + $0x250] sm:$0xff] }
 0x680   :  { %3486 = vmatprep.subr.bf16.mxu0 %v3485_v43  ;;  %v2122_v43 = vld [vmem:[%s5680_s12 + $0x288] sm:$0xff] }
 0x681   :  { %v3523_v57 = vpack.c.bf16 %v2122_v43, %v2115_v18 }
 0x683   :  { %3488 = vmatpush1.bf16.msra.mxu0 %v3487_v0  ;;  %v2129_v0 = vld [vmem:[%s5680_s12 + $0x2c0] sm:$0xff] }
 0x684   :  { %3490 = vmatprep.subr.bf16.mxu0 %v3489_v49  ;;  %v2136_v49 = vld [vmem:[%s5680_s12 + $0x2f8] sm:$0xff] }
 0x685   :  { %v3527_v15 = vpack.c.bf16 %v2136_v49, %v2129_v0 }
 0x687   :  { %3492 = vmatpush1.bf16.msra.mxu0 %v3491_v3  ;;  %v2143_v3 = vld [vmem:[%s5680_s12 + $0x330] sm:$0xff] }
 0x688   :  { %3494 = vmatprep.subr.bf16.mxu0 %v3493_v32  ;;  %v2150_v32 = vld [vmem:[%s5680_s12 + $0x368] sm:$0xff] }
 0x689   :  { %v3531_v45 = vpack.c.bf16 %v2150_v32, %v2143_v3 }
 0x68b   :  { %3496 = vmatpush1.bf16.msra.mxu0 %v3495_v59  ;;  %v2157_v59 = vld [vmem:[%s5680_s12 + $0x3a0] sm:$0xff] }
 0x68c   :  { %3498 = vmatprep.subr.bf16.mxu0 %v3497_v1  ;;  %v2164_v1 = vld [vmem:[%s5680_s12 + $0x3d8] sm:$0xff] }
 0x68f   :  { %3500 = vmatpush1.bf16.msra.mxu0 %v3499_v7  ;;  %v3535_v7 = vpack.c.bf16 %v2164_v1, %v2157_v59 }
 0x690   :  { %2375 = vmatprep.subr.mxu0 %v2212_v13  ;;  %v3537_v13 = vpack.c.bf16 %v2179_v6, %v2172_v22 }
 0x693   :  { %2376 = vmatpush1.msra.mxu0 %v2211_v34  ;;  %v2185_v34 = vld [vmem:[%s5680_s12 + $0x480] sm:$0xff] }
 0x694   :  { %2392 = vmatmul.mubr.f32.vlgmr.msra.gmra.mrb[8].mxu0 %v5312_v55  ;;  %3502 = vmatprep.subr.bf16.mxu0 %v3501_v40  ;;  %v2192_v40 = vld [vmem:[%s5680_s12 + $0x4b8] sm:$0xff] }
 0x695   :  { %3504 = vmatpush1.bf16.msra.mxu0 %v3503_v41  ;;  %2691 = vmatprep.mubr.msk.f32.mxu0 %vm1515_vm3, %v5310_v50  ;;  %v3511_v50 = vpack.c.bf16 %v2080_v10, %v2073_v5  ;;  %v2200_v41 = vld [vmem:[%s5680_s12 + $0x4f8] sm:$0xff]  ;;  %v3543_v48 = vpack.c.bf16 %v2192_v40, %v2185_v34  ;;  %v2213_v5 = vld [vmem:[%s5680_s12 + $0x560] sm:$0xff]  ;;  %v5608_v10 = vld [vmem:[#allocation16] sm:$0x7f] }
 0x696   :  { %3506 = vmatprep.subr.bf16.mxu0 %v3505_v47  ;;  %v2207_v47 = vld [vmem:[%s5680_s12 + $0x530] sm:$0xff] }
 0x697   :  { %v3545_v39 = vpack.c.bf16 %v2207_v47, %v2200_v41 }
 0x699   :  { %3508 = vmatpush1.bf16.msra.mxu0 %v3507_v62  ;;  %v3547_v62 = vpack.c.bf16 %v2206_v60, %v2199_v25 }
 0x69a   :  { %3510 = vmatprep.subr.bf16.mxu0 %v3509_v4  ;;  %v2214_v4 = vld [vmem:[%s5680_s12 + $0x568] sm:$0xff] }
 0x69d   :  { %3512 = vmatpush1.bf16.msra.mxu0 %v3511_v50 }
 0x69e   :  { %3514 = vmatprep.subr.bf16.mxu0 %v3513_v29 }
 0x6a1   :  { %3516 = vmatpush1.bf16.msra.mxu0 %v3515_v8 }
 0x6a2   :  { %3518 = vmatprep.subr.bf16.mxu0 %v3517_v23 }
 0x6a5   :  { %3520 = vmatpush1.bf16.msra.mxu0 %v3519_v56 }
 0x6a6   :  { %3522 = vmatprep.subr.bf16.mxu0 %v3521_v17 }
 0x6a9   :  { %3524 = vmatpush1.bf16.msra.mxu0 %v3523_v57 }
 0x6aa   :  { %3526 = vmatprep.subr.bf16.mxu0 %v3525_v35 }
 0x6ad   :  { %3528 = vmatpush1.bf16.msra.mxu0 %v3527_v15 }
 0x6ae   :  { %3530 = vmatprep.subr.bf16.mxu0 %v3529_v12 }
 0x6b1   :  { %3532 = vmatpush1.bf16.msra.mxu0 %v3531_v45 }
 0x6b2   :  { %3534 = vmatprep.subr.bf16.mxu0 %v3533_v58 }
 0x6b5   :  { %3536 = vmatpush1.bf16.msra.mxu0 %v3535_v7 }
 0x6b6   :  { %3538 = vmatprep.subr.bf16.mxu0 %v3537_v13 }
 0x6b9   :  { %3540 = vmatpush1.bf16.msra.mxu0 %v3539_v28 }
 0x6ba   :  { %3542 = vmatprep.subr.bf16.mxu0 %v3541_v33 }
 0x6bd   :  { %3544 = vmatpush1.bf16.msra.mxu0 %v3543_v48 }
 0x6be   :  { %3546 = vmatprep.subr.bf16.mxu0 %v3545_v39 }
 0x6c1   :  { %3548 = vmatpush1.bf16.msra.mxu0 %v3547_v62 }
 0x6c2   :  { %2446 = vmatprep.subr.mxu0 %v2214_v4 }
 0x6c5   :  { %2447 = vmatpush1.msra.mxu0 %v2213_v5 }
 0x6c6   :  { %2463 = vmatmul.mubr.f32.vlgmr.msra.gmra.mrb[10].mxu0 %v5312_v55 }
 0x6c7   :  { %3866 = shalt.err (!%p3863_p6)
}
 0x6c8   :  { %s3867_s0 = scalar_lea.hbm %s5683_s15, 32 }
 0x6c9   :  { %p3868_p7 = scmp.ne.s32.totalorder %s5683_s15, %s3867_s0  ;;  %p3871_p8 = scmp.lt.u32.totalorder %s3867_s0, %s5683_s15 }
 0x6cb   :  { %p3873_p9 = pnand %p3871_p8, %p3868_p7 }
 0x6cd   :  { %3876 = shalt.err (!%p3873_p9)
}
 0x6ce   :  { %2644 = dma.vmem_to_hbm [thread:$0]  %s2642_s30, 32, %s5683_s15, [#allocation19]   ;;  %v2221_v55 = vrot.slane %v5608_v10, %v4568_v63  ;;  %v2225_v16 = vrot.slane %v5608_v10, %v4571_v2 }
 0x6cf   :  { %s3950_s15 = smov [#allocation20]  }
 0x6d0   :  { %s2651_s13 = sshll.u32 %s3950_s15, 4  ;;  %s2652_s13 = int_to_ptr.vmem [resolvable:$true] %s2651_s13 }
 0x6d1   :  { %s3877_s20 = scalar_lea.vmem %s2652_s13, 32  ;;  %p3882_p11 = scmp.lt.s32.totalorder %s2652_s13, %s2652_s13 }
 0x6d2   :  { %p3878_p10 = scmp.ne.s32.totalorder %s2652_s13, %s3877_s20  ;;  %p3883_p12 = scmp.lt.s32.totalorder %s3877_s20, %s3877_s20 }
 0x6d4   :  { %p3884_p13 = por %p3883_p12, %p3882_p11 }
 0x6d6   :  { %p3885_p0 = pnand %p3884_p13, %p3878_p10 }
 0x735   :  { %v2322_v21 = vpop.f32.mrb[6].mxu0  ;;  %v5626_v50 = vpop.f32.mrb[12].mxu1 }
 0x736   :  { %v2323_v29 = vadd.f32 %v2322_v21, %v2221_v55  ;;  %v2324_v31 = vpop.f32.mrb[7].mxu0  ;;  %v2537_v36 = vpop.f32.mrb[13].mxu1 }
 0x737   :  { %v2325_v42 = vadd.f32 %v2324_v31, %v2225_v16 }
 0x738   :  { %v2539_v52 = vsub.f32 0.0, %v2323_v29 }
 0x739   :  { %v2540_v8 = vsub.f32 0.0, %v2325_v42 }
 0x73a   :  { %v2546_v23 = vmul.f32 1.442695, %v2539_v52 }
 0x73b   :  { %v2548_v24 = vmul.f32 1.442695, %v2540_v8 }
 0x73c   :  { %3629 = vpow2.f32 %v2546_v23 }
 0x73d   :  { %3631 = vpow2.f32 %v2548_v24 }
 0x73e   :  { %3888 = shalt.err (!%p3885_p0)
}
 0x73f   :  { %s3889_s24 = scalar_lea.hbm %s5684_s16, 32 }
 0x740   :  { %p3890_p1 = scmp.ne.s32.totalorder %s5684_s16, %s3889_s24  ;;  %p3893_p2 = scmp.lt.u32.totalorder %s3889_s24, %s5684_s16 }
 0x742   :  { %p3895_p3 = pnand %p3893_p2, %p3890_p1 }
 0x744   :  { %3898 = shalt.err (!%p3895_p3)
}
 0x745   :  { %2654 = dma.vmem_to_hbm [thread:$0]  %s2652_s13, 32, %s5684_s16, [#allocation19]   ;;  %v2229_v18 = vrot.slane %v5608_v10, %v5762_v51  ;;  %v2233_v43 = vrot.slane %v5608_v10, %v4577_v9  ;;  %v5771_v30 = vld [vmem:[#allocation28_spill] sm:$0xff]  ;;  %vm2617_vm7 = vcmask 1043458   ;;  %vm2619_vm9 = vcmask 128004  }
 0x746   :  { %v3630_v63 = vpop.eup %3629  ;;  %v2244_v9 = vsub.s32 6, %v5771_v30  ;;  %v2236_v7 = vsub.s32 4, %v5771_v30  ;;  %v2240_v14 = vsub.s32 5, %v5771_v30  ;;  %vm2618_vm8 = vmor %vm2617_vm7, %vm1739_vm4  ;;  %s3951_s16 = smov [#allocation17]  }
 0x747   :  { %v2560_v2 = vadd.f32 1.0, %v3630_v63  ;;  %v3632_v37 = vpop.eup %3631  ;;  %s2631_s2 = sshll.u32 %s3951_s16, 4  ;;  %vm2620_vm10 = vmor %vm2619_vm9, %vm2618_vm8  ;;  %s2632_s2 = int_to_ptr.vmem [resolvable:$true] %s2631_s2 }
 0x748   :  { %v2561_v38 = vadd.f32 1.0, %v3632_v37  ;;  %v2245_v1 = vrot.slane %v5608_v10, %v2244_v9  ;;  %v2237_v19 = vrot.slane %v5608_v10, %v2236_v7  ;;  %v2241_v27 = vrot.slane %v5608_v10, %v2240_v14  ;;  %s3899_s27 = scalar_lea.vmem %s2632_s2, 224  ;;  %p3904_p5 = scmp.lt.s32.totalorder %s2632_s2, %s2632_s2 }
 0x749   :  { %3633 = vrcp.f32 %v2560_v2  ;;  %p3900_p4 = scmp.ne.s32.totalorder %s2632_s2, %s3899_s27  ;;  %p3905_p6 = scmp.lt.s32.totalorder %s3899_s27, %s3899_s27 }
 0x74a   :  { %3635 = vrcp.f32 %v2561_v38  ;;  %v2536_v6 = vadd.f32 %v5626_v50, %v2245_v1 }
 0x74b   :  { %p3906_p7 = por %p3905_p6, %p3904_p5 }
 0x74c   :  { %v2545_v13 = vsub.f32 0.0, %v2536_v6 }
 0x74d   :  { %p3907_p8 = pnand %p3906_p7, %p3900_p4 }
 0x74e   :  { %v2558_v20 = vmul.f32 1.442695, %v2545_v13 }
 0x753   :  { %v3634_v54 = vpop.eup %3633 }
 0x754   :  { %v3636_v56 = vpop.eup %3635 }
 0x755   :  { %v2581_v17 = vcombine.low %v3634_v54, %v3636_v56 }
 0x757   :  { %v2589_v58 = vrot.slane %v2581_v17, %v4148_v11 }
 0x767   :  { %v2393_v46 = vpop.f32.mrb[8].mxu0 }
 0x768   :  { %v2394_v44 = vadd.f32 %v2393_v46, %v2229_v18  ;;  %v2395_v57 = vpop.f32.mrb[9].mxu0 }
 0x769   :  { %v2396_v35 = vadd.f32 %v2395_v57, %v2233_v43 }
 0x76a   :  { %v2541_v0 = vsub.f32 0.0, %v2394_v44 }
 0x76b   :  { %v2542_v49 = vsub.f32 0.0, %v2396_v35 }
 0x76c   :  { %v2550_v61 = vmul.f32 1.442695, %v2541_v0 }
 0x76d   :  { %v2552_v53 = vmul.f32 1.442695, %v2542_v49 }
 0x76e   :  { %3637 = vpow2.f32 %v2550_v61 }
 0x76f   :  { %3639 = vpow2.f32 %v2552_v53 }
 0x778   :  { %v3638_v15 = vpop.eup %3637 }
 0x779   :  { %v3640_v12 = vpop.eup %3639  ;;  %v2562_v3 = vadd.f32 1.0, %v3638_v15 }
 0x77a   :  { %v2563_v32 = vadd.f32 1.0, %v3640_v12 }
 0x77b   :  { %3641 = vrcp.f32 %v2562_v3 }
 0x77c   :  { %3643 = vrcp.f32 %v2563_v32 }
 0x77d   :  { %3645 = vpow2.f32 %v2558_v20 }
 0x785   :  { %v3642_v51 = vpop.eup %3641 }
 0x786   :  { %v3644_v26 = vpop.eup %3643 }
 0x787   :  { %v2582_v45 = vcombine.low %v3642_v51, %v3644_v26  ;;  %v3646_v25 = vpop.eup %3645 }
 0x788   :  { %v2566_v60 = vadd.f32 1.0, %v3646_v25 }
 0x789   :  { %v2596_v59 = vrot.slane %v2582_v45, %v4148_v11 }
 0x78b   :  { %v2597_v22 = vcombine.low %v2589_v58, %v2596_v59 }
 0x78d   :  { %2616 = vst [vmem:[#allocation17] sm:$0xff] %v2597_v22 }
 0x799   :  { %v2464_v28 = vpop.f32.mrb[10].mxu0 }
 0x79a   :  { %v2465_v33 = vadd.f32 %v2464_v28, %v2237_v19  ;;  %v2466_v34 = vpop.f32.mrb[11].mxu0 }
 0x79b   :  { %v2467_v40 = vadd.f32 %v2466_v34, %v2241_v27 }
 0x79c   :  { %v2543_v41 = vsub.f32 0.0, %v2465_v33 }
 0x79d   :  { %v2544_v47 = vsub.f32 0.0, %v2467_v40 }
 0x79e   :  { %v2554_v48 = vmul.f32 1.442695, %v2543_v41 }
 0x79f   :  { %v2556_v39 = vmul.f32 1.442695, %v2544_v47 }
 0x7a0   :  { %3647 = vpow2.f32 %v2554_v48 }
 0x7a1   :  { %3649 = vpow2.f32 %v2556_v39 }
 0x7a2   :  { %3651 = vrcp.f32 %v2566_v60 }
 0x7aa   :  { %v3648_v62 = vpop.eup %3647 }
 0x7ab   :  { %v3650_v4 = vpop.eup %3649  ;;  %v2564_v5 = vadd.f32 1.0, %v3648_v62 }
 0x7ac   :  { %v2565_v55 = vadd.f32 1.0, %v3650_v4  ;;  %v3652_v10 = vpop.eup %3651 }
 0x7ad   :  { %3653 = vrcp.f32 %v2564_v5  ;;  %v2612_v31 = vrot.slane %v3652_v10, %v4148_v11 }
 0x7ae   :  { %3655 = vrcp.f32 %v2565_v55 }
 0x7b7   :  { %v3654_v16 = vpop.eup %3653 }
 0x7b8   :  { %v3656_v21 = vpop.eup %3655 }
 0x7b9   :  { %v2598_v50 = vcombine.low %v3654_v16, %v3656_v21 }
 0x7bb   :  { %v2605_v29 = vrot.slane %v2598_v50, %v4148_v11 }
 0x7bd   :  { %v2613_v36 = vcombine.low %v2605_v29, %v2612_v31 }
 0x7bf   :  { %2621 = vst.msk [vmem:[#allocation17 + $0x8] sm:$0x3f] %vm2620_vm10, %v2613_v36 }
 0x7c0   :  { %3910 = shalt.err (!%p3907_p8)
}
 0x7c1   :  { %s5772_s19 = sld [smem:[#allocation53_spill]] }
 0x7c7   :  { %s3911_s21 = scalar_lea.hbm %s5772_s19, 224 }
 0x7c8   :  { %p3912_p9 = scmp.ne.s32.totalorder %s5772_s19, %s3911_s21  ;;  %p3915_p10 = scmp.lt.u32.totalorder %s3911_s21, %s5772_s19 }
 0x7ca   :  { %p3917_p11 = pnand %p3915_p10, %p3912_p9 }
 0x7cc   :  { %3920 = shalt.err (!%p3917_p11)
}
 0x7cd   :  { %2634 = dma.vmem_to_hbm [thread:$0]  %s2632_s2, 224, %s5772_s19, [#allocation4]  }
 0x7ce   :  { %3931 = dma.done.wait [#allocation4], 224  }
 0x7cf   :  { %3932 = vsyncadd [#allocation4], 4294967072 }
 0x7d0   :  { %3933 = dma.done.wait [#allocation19], 64  }
 0x7d1   :  { %3934 = vsyncadd [#allocation19], 4294967232 }
 0x7d2   :  { %2664 = vsyncpa [#allocation3], 1 }
 0x7d3   :  { %2665 = vsyncpa [#allocation6], 1 }
 0x7d4   :  { %2666 = vsyncpa [#allocation9], 1 }
 0x7d5   :  { %2667 = vsyncpa [#allocation12], 1 }
 0x7d6   :  { %2668 = vsyncpa [#allocation15], 1 }
 0x7d7   :  { %2669 = vsyncpa [#allocation4], 1 }
 0x7d8   :  { %2670 = vsyncpa [#allocation19], 1 }

</bundles_post_ra>
